<compile_context>
chip_gen: v7x
topology: tpu7x:2x2x1
jax: 0.10.0
libtpu: 0.0.40
codegen_flags: <defaults>
</compile_context>

<pallas_src>
import functools

import jax
import jax.numpy as jnp
from jax import lax
from jax.experimental import pallas as pl
from jax.experimental.pallas import tpu as pltpu


# ----------------------------------------------------------------------------
# Fused kernel: one batch element, all CRP stages.
# ----------------------------------------------------------------------------
def _crp_fused_kernel(x_ref, w_ref, out_ref, hpad, cpad, *, n_stages):
    """Refs (batch dim squeezed away by the BlockSpec):
      x_ref, out_ref : (H, W, C)            activations (NHWC block)
      w_ref          : (n_stages*9, C, C)   conv taps, flattened (stage, kh, kw)
      hpad           : (H+4, W+10, C) f32   -inf bordered buffer for 5x5 max pool
      cpad           : (H+2, W+9,  C) f32   zero bordered buffer for 3x3 conv

    Data layout inside the scratch buffers:
      hpad: payload at rows [2, 2+H), cols [8, 8+W);   reads touch rows [0,H+4),
            cols [6, W+10).
      cpad: payload at rows [1, 1+H), cols [8, 8+W);   reads touch rows [0,H+2),
            cols [7, W+9).
    """
    H, W, C = out_ref.shape
    NEG = jnp.float32(-jnp.inf)
    flat = (W % 8) == 0                 # (H*W, C) reshape is layout-free then
    acc_in_out = out_ref.dtype == jnp.float32

    # ---- halo borders only (interior is fully overwritten every stage) ------
    neg_rows = jnp.full((2, W + 10, C), NEG, jnp.float32)
    hpad[pl.ds(0, 2), :, :] = neg_rows                      # top 2 rows
    hpad[pl.ds(H + 2, 2), :, :] = neg_rows                  # bottom 2 rows
    hpad[:, pl.ds(0, 8), :] = jnp.full((H + 4, 8, C), NEG, jnp.float32)   # left (aligned)
    hpad[:, pl.ds(8 + W, 2), :] = jnp.full((H + 4, 2, C), NEG, jnp.float32)  # right

    zero_row = jnp.zeros((1, W + 9, C), jnp.float32)
    cpad[pl.ds(0, 1), :, :] = zero_row                      # top row
    cpad[pl.ds(H + 1, 1), :, :] = zero_row                  # bottom row
    cpad[:, pl.ds(0, 8), :] = jnp.zeros((H + 2, 8, C), jnp.float32)       # left (aligned)
    cpad[:, pl.ds(8 + W, 1), :] = jnp.zeros((H + 2, 1, C), jnp.float32)   # right

    # ---- residual init -------------------------------------------------------
    top = x_ref[...].astype(jnp.float32)     # stage input ("top")
    if acc_in_out:
        out_ref[...] = top                    # residual lives in the output block
        res = None
    else:
        res = top                             # keep f32 residual as a value

    for s in range(n_stages):
        # ---- 5x5 max pool, stride 1, pad 2 (separable: H pass then W pass) --
        hpad[pl.ds(2, H), pl.ds(8, W), :] = top
        hm = hpad[0:H, :, :]
        for dh in range(1, 5):
            hm = jnp.maximum(hm, hpad[dh:dh + H, :, :])
        pooled = hm[:, 6:6 + W, :]
        for dw in range(1, 5):
            pooled = jnp.maximum(pooled, hm[:, 6 + dw:6 + dw + W, :])

        # ---- 3x3 conv (stride 1, zero pad 1, no bias): 9 MXU taps -----------
        cpad[pl.ds(1, H), pl.ds(8, W), :] = pooled
        acc = None                             # accumulate in a traced value
        for dh in range(3):
            for dw in range(3):
                patch = cpad[dh:dh + H, 7 + dw:7 + dw + W, :]      # (H, W, C) f32
                patch = patch.astype(w_ref.dtype)                  # bf16 MXU feed
                w_tap = w_ref[s * 9 + dh * 3 + dw]                 # (Cin, Cout)
                if flat:
                    contrib = jnp.dot(patch.reshape(H * W, C), w_tap,
                                      preferred_element_type=jnp.float32)
                else:
                    contrib = lax.dot_general(
                        patch, w_tap,
                        dimension_numbers=(((2,), (0,)), ((), ())),
                        preferred_element_type=jnp.float32)
                acc = contrib if acc is None else acc + contrib
        top = acc.reshape(H, W, C) if flat else acc

        # ---- residual: x = top + x ------------------------------------------
        if acc_in_out:
            out_ref[...] += top
        else:
            res = res + top

    if not acc_in_out:
        out_ref[...] = res.astype(out_ref.dtype)


# ----------------------------------------------------------------------------
# pallas_call wrapper.
# ----------------------------------------------------------------------------
def _crp_pallas(x_nhwc, w_all, n_stages):
    N, H, W, C = x_nhwc.shape
    kernel = functools.partial(_crp_fused_kernel, n_stages=n_stages)
    act_spec = pl.BlockSpec((None, H, W, C), lambda n: (n, 0, 0, 0))
    return pl.pallas_call(
        kernel,
        out_shape=jax.ShapeDtypeStruct((N, H, W, C), x_nhwc.dtype),
        grid_spec=pltpu.PrefetchScalarGridSpec(
            num_scalar_prefetch=0,
            grid=(N,),
            in_specs=[
                act_spec,                                               # x (NHWC)
                pl.BlockSpec((n_stages * 9, C, C), lambda n: (0, 0, 0)),  # weights
            ],
            out_specs=act_spec,
            scratch_shapes=[
                pltpu.VMEM((H + 4, W + 10, C), jnp.float32),   # pool halo buffer
                pltpu.VMEM((H + 2, W + 9, C), jnp.float32),    # conv halo buffer
            ],
        ),
        compiler_params=pltpu.CompilerParams(
            dimension_semantics=("parallel",),
        ),
        # Bandwidth-bound op: write x in place.  (XLA inserts a copy if the
        # caller's buffer is not actually donatable.)
        input_output_aliases={0: 0},
    )(x_nhwc, w_all)


def _forward_nhwc(x_nhwc, weights_hwio, mxu_dtype):
    n_stages = len(weights_hwio)
    N, H, W, C = x_nhwc.shape
    for w in weights_hwio:
        assert w.shape == (3, 3, C, C), "CRPBlock requires in_planes == out_planes"
    # Pre-cast + stack weights on the host side of the kernel (no per-tap astype).
    w_all = (jnp.stack(list(weights_hwio), axis=0)
             .astype(mxu_dtype)
             .reshape(n_stages * 9, C, C))
    return _crp_pallas(x_nhwc, w_all, n_stages)


@functools.partial(jax.jit, static_argnames=("mxu_dtype",))
def crp_block_forward_nhwc(x_nhwc, weights_hwio, *, mxu_dtype=jnp.bfloat16):
    """Preferred entry point for NHWC-native pipelines (no layout transposes)."""
    return _forward_nhwc(x_nhwc, weights_hwio, mxu_dtype)


@functools.partial(jax.jit, static_argnames=("mxu_dtype",))
def crp_block_forward(x_nchw, weights_hwio, *, mxu_dtype=jnp.bfloat16):
    """PyTorch-layout entry point: x_nchw (N,C,H,W), weights_hwio list of (3,3,C,C).

    Note: the NCHW<->NHWC transposes exist only to match the PyTorch interface;
    use crp_block_forward_nhwc to avoid them in an NHWC-native model.
    """
    x = jnp.transpose(x_nchw, (0, 2, 3, 1))            # NCHW -> NHWC
    out = _forward_nhwc(x, weights_hwio, mxu_dtype)
    return jnp.transpose(out, (0, 3, 1, 2))            # NHWC -> NCHW


# ----------------------------------------------------------------------------
# Pure-JAX reference.  With mxu_dtype=jnp.bfloat16 it emulates the kernel's MXU
# feed (bf16 operands, f32 accumulation); with jnp.float32 it is the exact
# PyTorch-equivalent f32 forward.
# ----------------------------------------------------------------------------
def crp_block_reference(x_nchw, weights_hwio, mxu_dtype=jnp.float32):
    x = jnp.transpose(x_nchw, (0, 2, 3, 1)).astype(jnp.float32)
    top = x
    for w in weights_hwio:
        top = lax.reduce_window(
            top, -jnp.inf, lax.max,
            window_dimensions=(1, 5, 5, 1),
            window_strides=(1, 1, 1, 1),
            padding=((0, 0), (2, 2), (2, 2), (0, 0)))
        lhs = top.astype(mxu_dtype).astype(jnp.float32)
        rhs = w.astype(mxu_dtype).astype(jnp.float32)
        top = lax.conv_general_dilated(
            lhs, rhs, window_strides=(1, 1),
            padding=((1, 1), (1, 1)),
            dimension_numbers=('NHWC', 'HWIO', 'NHWC'),
            precision=lax.Precision.HIGHEST)
        x = top + x
    return jnp.transpose(x, (0, 3, 1, 2))


if __name__ == "__main__":
    # Small module-consistent shapes: in_planes == out_planes, n_stages = 2.
    N, C, H, W = 2, 4, 16, 16
    n_stages = 2

    key = jax.random.PRNGKey(0)
    kx, *kws = jax.random.split(key, 1 + n_stages)
    x = jax.random.normal(kx, (N, C, H, W), dtype=jnp.float32)   # NCHW like PyTorch
    weights = [0.1 * jax.random.normal(k, (3, 3, C, C), dtype=jnp.float32)
               for k in kws]

    out = crp_block_forward(x, weights, mxu_dtype=jnp.bfloat16)
    out = jax.block_until_ready(out)

    # Reference emulating the same bf16-operand / f32-accumulate MXU precision.
    ref = crp_block_reference(x, weights, mxu_dtype=jnp.bfloat16)
    assert out.shape == (N, C, H, W)
    assert jnp.allclose(out, ref, rtol=1e-3, atol=1e-3), "mismatch vs reference"

    print("KERNEL_OK")
</pallas_src>

<mosaic_0001>
module attributes {stable_mosaic.version = 11 : i64} {
  func.func @_crp_fused_kernel(%arg0: i32, %arg1: memref<1x16x16x4xf32, #tpu.memory_space<vmem>>, %arg2: memref<18x4x4xbf16, #tpu.memory_space<vmem>>, %arg3: memref<1x16x16x4xf32, #tpu.memory_space<vmem>>, %arg4: memref<20x26x4xf32, #tpu.memory_space<vmem>>, %arg5: memref<18x25x4xf32, #tpu.memory_space<vmem>>) attributes {dimension_semantics = [#tpu.dimension_semantics<parallel>], iteration_bounds = array<i64: 2>, scalar_prefetch = 0 : i64, scratch_operands = 2 : i64, tpu.core_type = #tpu.core_type<tc>, window_params = [{transform_indices = @transform_0, window_bounds = array<i64: 1, 16, 16, 4>}, {pipeline_mode = #tpu.pipeline_mode<synchronous>, transform_indices = @transform_1, window_bounds = array<i64: 18, 4, 4>}, {transform_indices = @transform_2, window_bounds = array<i64: 1, 16, 16, 4>}]} {
    %cst = arith.constant 0xFF800000 : f32
    %0 = vector.broadcast %cst : f32 to vector<2x26x4xf32>
    %c0 = arith.constant 0 : index
    %c0_0 = arith.constant 0 : index
    %c0_1 = arith.constant 0 : index
    %1 = vector.load %arg4[%c0, %c0_0, %c0_1] : memref<20x26x4xf32, #tpu.memory_space<vmem>>, vector<2x26x4xf32>
    tpu.vector_store %arg4[%c0, %c0_0, %c0_1], %0 {strides = array<i32>} : memref<20x26x4xf32, #tpu.memory_space<vmem>>, vector<2x26x4xf32>,
    %c18 = arith.constant 18 : index
    %c0_2 = arith.constant 0 : index
    %c0_3 = arith.constant 0 : index
    %2 = vector.load %arg4[%c18, %c0_2, %c0_3] : memref<20x26x4xf32, #tpu.memory_space<vmem>>, vector<2x26x4xf32>
    tpu.vector_store %arg4[%c18, %c0_2, %c0_3], %0 {strides = array<i32>} : memref<20x26x4xf32, #tpu.memory_space<vmem>>, vector<2x26x4xf32>,
    %cst_4 = arith.constant 0xFF800000 : f32
    %3 = vector.broadcast %cst_4 : f32 to vector<20x8x4xf32>
    %c0_5 = arith.constant 0 : index
    %c0_6 = arith.constant 0 : index
    %c0_7 = arith.constant 0 : index
    %4 = vector.load %arg4[%c0_5, %c0_6, %c0_7] : memref<20x26x4xf32, #tpu.memory_space<vmem>>, vector<20x8x4xf32>
    tpu.vector_store %arg4[%c0_5, %c0_6, %c0_7], %3 {strides = array<i32>} : memref<20x26x4xf32, #tpu.memory_space<vmem>>, vector<20x8x4xf32>,
    %cst_8 = arith.constant 0xFF800000 : f32
    %5 = vector.broadcast %cst_8 : f32 to vector<20x2x4xf32>
    %c0_9 = arith.constant 0 : index
    %c24 = arith.constant 24 : index
    %c0_10 = arith.constant 0 : index
    %6 = vector.load %arg4[%c0_9, %c24, %c0_10] : memref<20x26x4xf32, #tpu.memory_space<vmem>>, vector<20x2x4xf32>
    tpu.vector_store %arg4[%c0_9, %c24, %c0_10], %5 {strides = array<i32>} : memref<20x26x4xf32, #tpu.memory_space<vmem>>, vector<20x2x4xf32>,
    %cst_11 = arith.constant 0.000000e+00 : f32
    %7 = vector.broadcast %cst_11 : f32 to vector<1x25x4xf32>
    %c0_12 = arith.constant 0 : index
    %c0_13 = arith.constant 0 : index
    %c0_14 = arith.constant 0 : index
    %8 = vector.load %arg5[%c0_12, %c0_13, %c0_14] : memref<18x25x4xf32, #tpu.memory_space<vmem>>, vector<1x25x4xf32>
    tpu.vector_store %arg5[%c0_12, %c0_13, %c0_14], %7 {strides = array<i32>} : memref<18x25x4xf32, #tpu.memory_space<vmem>>, vector<1x25x4xf32>,
    %c17 = arith.constant 17 : index
    %c0_15 = arith.constant 0 : index
    %c0_16 = arith.constant 0 : index
    %9 = vector.load %arg5[%c17, %c0_15, %c0_16] : memref<18x25x4xf32, #tpu.memory_space<vmem>>, vector<1x25x4xf32>
    tpu.vector_store %arg5[%c17, %c0_15, %c0_16], %7 {strides = array<i32>} : memref<18x25x4xf32, #tpu.memory_space<vmem>>, vector<1x25x4xf32>,
    %cst_17 = arith.constant 0.000000e+00 : f32
    %10 = vector.broadcast %cst_17 : f32 to vector<18x8x4xf32>
    %c0_18 = arith.constant 0 : index
    %c0_19 = arith.constant 0 : index
    %c0_20 = arith.constant 0 : index
    %11 = vector.load %arg5[%c0_18, %c0_19, %c0_20] : memref<18x25x4xf32, #tpu.memory_space<vmem>>, vector<18x8x4xf32>
    tpu.vector_store %arg5[%c0_18, %c0_19, %c0_20], %10 {strides = array<i32>} : memref<18x25x4xf32, #tpu.memory_space<vmem>>, vector<18x8x4xf32>,
    %cst_21 = arith.constant 0.000000e+00 : f32
    %12 = vector.broadcast %cst_21 : f32 to vector<18x1x4xf32>
    %c0_22 = arith.constant 0 : index
    %c24_23 = arith.constant 24 : index
    %c0_24 = arith.constant 0 : index
    %13 = vector.load %arg5[%c0_22, %c24_23, %c0_24] : memref<18x25x4xf32, #tpu.memory_space<vmem>>, vector<18x1x4xf32>
    tpu.vector_store %arg5[%c0_22, %c24_23, %c0_24], %12 {strides = array<i32>} : memref<18x25x4xf32, #tpu.memory_space<vmem>>, vector<18x1x4xf32>,
    %c0_25 = arith.constant 0 : index
    %c0_26 = arith.constant 0 : index
    %c0_27 = arith.constant 0 : index
    %c0_28 = arith.constant 0 : index
    %14 = vector.load %arg1[%c0_25, %c0_26, %c0_27, %c0_28] : memref<1x16x16x4xf32, #tpu.memory_space<vmem>>, vector<1x16x16x4xf32>
    %15 = vector.shape_cast %14 : vector<1x16x16x4xf32> to vector<16x16x4xf32>
    %c0_29 = arith.constant 0 : index
    %c0_30 = arith.constant 0 : index
    %c0_31 = arith.constant 0 : index
    %c0_32 = arith.constant 0 : index
    %16 = vector.load %arg3[%c0_29, %c0_30, %c0_31, %c0_32] : memref<1x16x16x4xf32, #tpu.memory_space<vmem>>, vector<1x16x16x4xf32>
    %17 = vector.shape_cast %16 : vector<1x16x16x4xf32> to vector<16x16x4xf32>
    %18 = vector.shape_cast %15 : vector<16x16x4xf32> to vector<1x16x16x4xf32>
    tpu.vector_store %arg3[%c0_29, %c0_30, %c0_31, %c0_32], %18 {strides = array<i32>} : memref<1x16x16x4xf32, #tpu.memory_space<vmem>>, vector<1x16x16x4xf32>,
    %c2 = arith.constant 2 : index
    %c8 = arith.constant 8 : index
    %c0_33 = arith.constant 0 : index
    %19 = vector.load %arg4[%c2, %c8, %c0_33] : memref<20x26x4xf32, #tpu.memory_space<vmem>>, vector<16x16x4xf32>
    tpu.vector_store %arg4[%c2, %c8, %c0_33], %15 {strides = array<i32>} : memref<20x26x4xf32, #tpu.memory_space<vmem>>, vector<16x16x4xf32>,
    %c0_34 = arith.constant 0 : index
    %c0_35 = arith.constant 0 : index
    %c0_36 = arith.constant 0 : index
    %20 = vector.load %arg4[%c0_34, %c0_35, %c0_36] : memref<20x26x4xf32, #tpu.memory_space<vmem>>, vector<16x26x4xf32>
    %c1 = arith.constant 1 : index
    %c0_37 = arith.constant 0 : index
    %c0_38 = arith.constant 0 : index
    %21 = vector.load %arg4[%c1, %c0_37, %c0_38] : memref<20x26x4xf32, #tpu.memory_space<vmem>>, vector<16x26x4xf32>
    %22 = arith.maximumf %20, %21 : vector<16x26x4xf32>
    %c2_39 = arith.constant 2 : index
    %c0_40 = arith.constant 0 : index
    %c0_41 = arith.constant 0 : index
    %23 = vector.load %arg4[%c2_39, %c0_40, %c0_41] : memref<20x26x4xf32, #tpu.memory_space<vmem>>, vector<16x26x4xf32>
    %24 = arith.maximumf %22, %23 : vector<16x26x4xf32>
    %c3 = arith.constant 3 : index
    %c0_42 = arith.constant 0 : index
    %c0_43 = arith.constant 0 : index
    %25 = vector.load %arg4[%c3, %c0_42, %c0_43] : memref<20x26x4xf32, #tpu.memory_space<vmem>>, vector<16x26x4xf32>
    %26 = arith.maximumf %24, %25 : vector<16x26x4xf32>
    %c4 = arith.constant 4 : index
    %c0_44 = arith.constant 0 : index
    %c0_45 = arith.constant 0 : index
    %27 = vector.load %arg4[%c4, %c0_44, %c0_45] : memref<20x26x4xf32, #tpu.memory_space<vmem>>, vector<16x26x4xf32>
    %28 = arith.maximumf %26, %27 : vector<16x26x4xf32>
    %29 = vector.extract_strided_slice %28 {offsets = [0, 6, 0], sizes = [16, 16, 4], strides = [1, 1, 1]} : vector<16x26x4xf32> to vector<16x16x4xf32>
    %30 = vector.extract_strided_slice %28 {offsets = [0, 7, 0], sizes = [16, 16, 4], strides = [1, 1, 1]} : vector<16x26x4xf32> to vector<16x16x4xf32>
    %31 = arith.maximumf %29, %30 : vector<16x16x4xf32>
    %32 = vector.extract_strided_slice %28 {offsets = [0, 8, 0], sizes = [16, 16, 4], strides = [1, 1, 1]} : vector<16x26x4xf32> to vector<16x16x4xf32>
    %33 = arith.maximumf %31, %32 : vector<16x16x4xf32>
    %34 = vector.extract_strided_slice %28 {offsets = [0, 9, 0], sizes = [16, 16, 4], strides = [1, 1, 1]} : vector<16x26x4xf32> to vector<16x16x4xf32>
    %35 = arith.maximumf %33, %34 : vector<16x16x4xf32>
    %36 = vector.extract_strided_slice %28 {offsets = [0, 10, 0], sizes = [16, 16, 4], strides = [1, 1, 1]} : vector<16x26x4xf32> to vector<16x16x4xf32>
    %37 = arith.maximumf %35, %36 : vector<16x16x4xf32>
    %c1_46 = arith.constant 1 : index
    %c8_47 = arith.constant 8 : index
    %c0_48 = arith.constant 0 : index
    %38 = vector.load %arg5[%c1_46, %c8_47, %c0_48] : memref<18x25x4xf32, #tpu.memory_space<vmem>>, vector<16x16x4xf32>
    tpu.vector_store %arg5[%c1_46, %c8_47, %c0_48], %37 {strides = array<i32>} : memref<18x25x4xf32, #tpu.memory_space<vmem>>, vector<16x16x4xf32>,
    %c0_49 = arith.constant 0 : index
    %c7 = arith.constant 7 : index
    %c0_50 = arith.constant 0 : index
    %39 = vector.load %arg5[%c0_49, %c7, %c0_50] : memref<18x25x4xf32, #tpu.memory_space<vmem>>, vector<16x16x4xf32>
    %40 = arith.truncf %39 : vector<16x16x4xf32> to vector<16x16x4xbf16>
    %c0_51 = arith.constant 0 : index
    %c0_52 = arith.constant 0 : index
    %c0_53 = arith.constant 0 : index
    %41 = vector.load %arg2[%c0_51, %c0_52, %c0_53] : memref<18x4x4xbf16, #tpu.memory_space<vmem>>, vector<1x4x4xbf16>
    %42 = vector.shape_cast %41 : vector<1x4x4xbf16> to vector<4x4xbf16>
    %43 = vector.shape_cast %40 : vector<16x16x4xbf16> to vector<256x4xbf16>
    %cst_54 = arith.constant dense<0.000000e+00> : vector<256x4xf32>
    %44 = tpu.matmul %43, %42, %cst_54 {dimension_numbers = #tpu.dot_dimension_numbers<[1], [0], [0], [1], [0, 0, 1, 1], [], []>} : vector<256x4xbf16>, vector<4x4xbf16>, vector<256x4xf32> -> vector<256x4xf32>
    %c0_55 = arith.constant 0 : index
    %c8_56 = arith.constant 8 : index
    %c0_57 = arith.constant 0 : index
    %45 = vector.load %arg5[%c0_55, %c8_56, %c0_57] : memref<18x25x4xf32, #tpu.memory_space<vmem>>, vector<16x16x4xf32>
    %46 = arith.truncf %45 : vector<16x16x4xf32> to vector<16x16x4xbf16>
    %c1_58 = arith.constant 1 : index
    %c0_59 = arith.constant 0 : index
    %c0_60 = arith.constant 0 : index
    %47 = vector.load %arg2[%c1_58, %c0_59, %c0_60] : memref<18x4x4xbf16, #tpu.memory_space<vmem>>, vector<1x4x4xbf16>
    %48 = vector.shape_cast %47 : vector<1x4x4xbf16> to vector<4x4xbf16>
    %49 = vector.shape_cast %46 : vector<16x16x4xbf16> to vector<256x4xbf16>
    %cst_61 = arith.constant dense<0.000000e+00> : vector<256x4xf32>
    %50 = tpu.matmul %49, %48, %cst_61 {dimension_numbers = #tpu.dot_dimension_numbers<[1], [0], [0], [1], [0, 0, 1, 1], [], []>} : vector<256x4xbf16>, vector<4x4xbf16>, vector<256x4xf32> -> vector<256x4xf32>
    %51 = arith.addf %44, %50 : vector<256x4xf32>
    %c0_62 = arith.constant 0 : index
    %c9 = arith.constant 9 : index
    %c0_63 = arith.constant 0 : index
    %52 = vector.load %arg5[%c0_62, %c9, %c0_63] : memref<18x25x4xf32, #tpu.memory_space<vmem>>, vector<16x16x4xf32>
    %53 = arith.truncf %52 : vector<16x16x4xf32> to vector<16x16x4xbf16>
    %c2_64 = arith.constant 2 : index
    %c0_65 = arith.constant 0 : index
    %c0_66 = arith.constant 0 : index
    %54 = vector.load %arg2[%c2_64, %c0_65, %c0_66] : memref<18x4x4xbf16, #tpu.memory_space<vmem>>, vector<1x4x4xbf16>
    %55 = vector.shape_cast %54 : vector<1x4x4xbf16> to vector<4x4xbf16>
    %56 = vector.shape_cast %53 : vector<16x16x4xbf16> to vector<256x4xbf16>
    %cst_67 = arith.constant dense<0.000000e+00> : vector<256x4xf32>
    %57 = tpu.matmul %56, %55, %cst_67 {dimension_numbers = #tpu.dot_dimension_numbers<[1], [0], [0], [1], [0, 0, 1, 1], [], []>} : vector<256x4xbf16>, vector<4x4xbf16>, vector<256x4xf32> -> vector<256x4xf32>
    %58 = arith.addf %51, %57 : vector<256x4xf32>
    %c1_68 = arith.constant 1 : index
    %c7_69 = arith.constant 7 : index
    %c0_70 = arith.constant 0 : index
    %59 = vector.load %arg5[%c1_68, %c7_69, %c0_70] : memref<18x25x4xf32, #tpu.memory_space<vmem>>, vector<16x16x4xf32>
    %60 = arith.truncf %59 : vector<16x16x4xf32> to vector<16x16x4xbf16>
    %c3_71 = arith.constant 3 : index
    %c0_72 = arith.constant 0 : index
    %c0_73 = arith.constant 0 : index
    %61 = vector.load %arg2[%c3_71, %c0_72, %c0_73] : memref<18x4x4xbf16, #tpu.memory_space<vmem>>, vector<1x4x4xbf16>
    %62 = vector.shape_cast %61 : vector<1x4x4xbf16> to vector<4x4xbf16>
    %63 = vector.shape_cast %60 : vector<16x16x4xbf16> to vector<256x4xbf16>
    %cst_74 = arith.constant dense<0.000000e+00> : vector<256x4xf32>
    %64 = tpu.matmul %63, %62, %cst_74 {dimension_numbers = #tpu.dot_dimension_numbers<[1], [0], [0], [1], [0, 0, 1, 1], [], []>} : vector<256x4xbf16>, vector<4x4xbf16>, vector<256x4xf32> -> vector<256x4xf32>
    %65 = arith.addf %58, %64 : vector<256x4xf32>
    %c1_75 = arith.constant 1 : index
    %c8_76 = arith.constant 8 : index
    %c0_77 = arith.constant 0 : index
    %66 = vector.load %arg5[%c1_75, %c8_76, %c0_77] : memref<18x25x4xf32, #tpu.memory_space<vmem>>, vector<16x16x4xf32>
    %67 = arith.truncf %66 : vector<16x16x4xf32> to vector<16x16x4xbf16>
    %c4_78 = arith.constant 4 : index
    %c0_79 = arith.constant 0 : index
    %c0_80 = arith.constant 0 : index
    %68 = vector.load %arg2[%c4_78, %c0_79, %c0_80] : memref<18x4x4xbf16, #tpu.memory_space<vmem>>, vector<1x4x4xbf16>
    %69 = vector.shape_cast %68 : vector<1x4x4xbf16> to vector<4x4xbf16>
    %70 = vector.shape_cast %67 : vector<16x16x4xbf16> to vector<256x4xbf16>
    %cst_81 = arith.constant dense<0.000000e+00> : vector<256x4xf32>
    %71 = tpu.matmul %70, %69, %cst_81 {dimension_numbers = #tpu.dot_dimension_numbers<[1], [0], [0], [1], [0, 0, 1, 1], [], []>} : vector<256x4xbf16>, vector<4x4xbf16>, vector<256x4xf32> -> vector<256x4xf32>
    %72 = arith.addf %65, %71 : vector<256x4xf32>
    %c1_82 = arith.constant 1 : index
    %c9_83 = arith.constant 9 : index
    %c0_84 = arith.constant 0 : index
    %73 = vector.load %arg5[%c1_82, %c9_83, %c0_84] : memref<18x25x4xf32, #tpu.memory_space<vmem>>, vector<16x16x4xf32>
    %74 = arith.truncf %73 : vector<16x16x4xf32> to vector<16x16x4xbf16>
    %c5 = arith.constant 5 : index
    %c0_85 = arith.constant 0 : index
    %c0_86 = arith.constant 0 : index
    %75 = vector.load %arg2[%c5, %c0_85, %c0_86] : memref<18x4x4xbf16, #tpu.memory_space<vmem>>, vector<1x4x4xbf16>
    %76 = vector.shape_cast %75 : vector<1x4x4xbf16> to vector<4x4xbf16>
    %77 = vector.shape_cast %74 : vector<16x16x4xbf16> to vector<256x4xbf16>
    %cst_87 = arith.constant dense<0.000000e+00> : vector<256x4xf32>
    %78 = tpu.matmul %77, %76, %cst_87 {dimension_numbers = #tpu.dot_dimension_numbers<[1], [0], [0], [1], [0, 0, 1, 1], [], []>} : vector<256x4xbf16>, vector<4x4xbf16>, vector<256x4xf32> -> vector<256x4xf32>
    %79 = arith.addf %72, %78 : vector<256x4xf32>
    %c2_88 = arith.constant 2 : index
    %c7_89 = arith.constant 7 : index
    %c0_90 = arith.constant 0 : index
    %80 = vector.load %arg5[%c2_88, %c7_89, %c0_90] : memref<18x25x4xf32, #tpu.memory_space<vmem>>, vector<16x16x4xf32>
    %81 = arith.truncf %80 : vector<16x16x4xf32> to vector<16x16x4xbf16>
    %c6 = arith.constant 6 : index
    %c0_91 = arith.constant 0 : index
    %c0_92 = arith.constant 0 : index
    %82 = vector.load %arg2[%c6, %c0_91, %c0_92] : memref<18x4x4xbf16, #tpu.memory_space<vmem>>, vector<1x4x4xbf16>
    %83 = vector.shape_cast %82 : vector<1x4x4xbf16> to vector<4x4xbf16>
    %84 = vector.shape_cast %81 : vector<16x16x4xbf16> to vector<256x4xbf16>
    %cst_93 = arith.constant dense<0.000000e+00> : vector<256x4xf32>
    %85 = tpu.matmul %84, %83, %cst_93 {dimension_numbers = #tpu.dot_dimension_numbers<[1], [0], [0], [1], [0, 0, 1, 1], [], []>} : vector<256x4xbf16>, vector<4x4xbf16>, vector<256x4xf32> -> vector<256x4xf32>
    %86 = arith.addf %79, %85 : vector<256x4xf32>
    %c2_94 = arith.constant 2 : index
    %c8_95 = arith.constant 8 : index
    %c0_96 = arith.constant 0 : index
    %87 = vector.load %arg5[%c2_94, %c8_95, %c0_96] : memref<18x25x4xf32, #tpu.memory_space<vmem>>, vector<16x16x4xf32>
    %88 = arith.truncf %87 : vector<16x16x4xf32> to vector<16x16x4xbf16>
    %c7_97 = arith.constant 7 : index
    %c0_98 = arith.constant 0 : index
    %c0_99 = arith.constant 0 : index
    %89 = vector.load %arg2[%c7_97, %c0_98, %c0_99] : memref<18x4x4xbf16, #tpu.memory_space<vmem>>, vector<1x4x4xbf16>
    %90 = vector.shape_cast %89 : vector<1x4x4xbf16> to vector<4x4xbf16>
    %91 = vector.shape_cast %88 : vector<16x16x4xbf16> to vector<256x4xbf16>
    %cst_100 = arith.constant dense<0.000000e+00> : vector<256x4xf32>
    %92 = tpu.matmul %91, %90, %cst_100 {dimension_numbers = #tpu.dot_dimension_numbers<[1], [0], [0], [1], [0, 0, 1, 1], [], []>} : vector<256x4xbf16>, vector<4x4xbf16>, vector<256x4xf32> -> vector<256x4xf32>
    %93 = arith.addf %86, %92 : vector<256x4xf32>
    %c2_101 = arith.constant 2 : index
    %c9_102 = arith.constant 9 : index
    %c0_103 = arith.constant 0 : index
    %94 = vector.load %arg5[%c2_101, %c9_102, %c0_103] : memref<18x25x4xf32, #tpu.memory_space<vmem>>, vector<16x16x4xf32>
    %95 = arith.truncf %94 : vector<16x16x4xf32> to vector<16x16x4xbf16>
    %c8_104 = arith.constant 8 : index
    %c0_105 = arith.constant 0 : index
    %c0_106 = arith.constant 0 : index
    %96 = vector.load %arg2[%c8_104, %c0_105, %c0_106] : memref<18x4x4xbf16, #tpu.memory_space<vmem>>, vector<1x4x4xbf16>
    %97 = vector.shape_cast %96 : vector<1x4x4xbf16> to vector<4x4xbf16>
    %98 = vector.shape_cast %95 : vector<16x16x4xbf16> to vector<256x4xbf16>
    %cst_107 = arith.constant dense<0.000000e+00> : vector<256x4xf32>
    %99 = tpu.matmul %98, %97, %cst_107 {dimension_numbers = #tpu.dot_dimension_numbers<[1], [0], [0], [1], [0, 0, 1, 1], [], []>} : vector<256x4xbf16>, vector<4x4xbf16>, vector<256x4xf32> -> vector<256x4xf32>
    %100 = arith.addf %93, %99 : vector<256x4xf32>
    %101 = vector.shape_cast %100 : vector<256x4xf32> to vector<16x16x4xf32>
    %c0_108 = arith.constant 0 : index
    %c0_109 = arith.constant 0 : index
    %c0_110 = arith.constant 0 : index
    %c0_111 = arith.constant 0 : index
    %102 = vector.load %arg3[%c0_108, %c0_109, %c0_110, %c0_111] : memref<1x16x16x4xf32, #tpu.memory_space<vmem>>, vector<1x16x16x4xf32>
    %103 = vector.shape_cast %102 : vector<1x16x16x4xf32> to vector<16x16x4xf32>
    %104 = arith.addf %103, %101 : vector<16x16x4xf32>
    %c0_112 = arith.constant 0 : index
    %c0_113 = arith.constant 0 : index
    %c0_114 = arith.constant 0 : index
    %c0_115 = arith.constant 0 : index
    %105 = vector.load %arg3[%c0_112, %c0_113, %c0_114, %c0_115] : memref<1x16x16x4xf32, #tpu.memory_space<vmem>>, vector<1x16x16x4xf32>
    %106 = vector.shape_cast %105 : vector<1x16x16x4xf32> to vector<16x16x4xf32>
    %107 = vector.shape_cast %104 : vector<16x16x4xf32> to vector<1x16x16x4xf32>
    tpu.vector_store %arg3[%c0_112, %c0_113, %c0_114, %c0_115], %107 {strides = array<i32>} : memref<1x16x16x4xf32, #tpu.memory_space<vmem>>, vector<1x16x16x4xf32>,
    %c2_116 = arith.constant 2 : index
    %c8_117 = arith.constant 8 : index
    %c0_118 = arith.constant 0 : index
    %108 = vector.load %arg4[%c2_116, %c8_117, %c0_118] : memref<20x26x4xf32, #tpu.memory_space<vmem>>, vector<16x16x4xf32>
    tpu.vector_store %arg4[%c2_116, %c8_117, %c0_118], %101 {strides = array<i32>} : memref<20x26x4xf32, #tpu.memory_space<vmem>>, vector<16x16x4xf32>,
    %c0_119 = arith.constant 0 : index
    %c0_120 = arith.constant 0 : index
    %c0_121 = arith.constant 0 : index
    %109 = vector.load %arg4[%c0_119, %c0_120, %c0_121] : memref<20x26x4xf32, #tpu.memory_space<vmem>>, vector<16x26x4xf32>
    %c1_122 = arith.constant 1 : index
    %c0_123 = arith.constant 0 : index
    %c0_124 = arith.constant 0 : index
    %110 = vector.load %arg4[%c1_122, %c0_123, %c0_124] : memref<20x26x4xf32, #tpu.memory_space<vmem>>, vector<16x26x4xf32>
    %111 = arith.maximumf %109, %110 : vector<16x26x4xf32>
    %c2_125 = arith.constant 2 : index
    %c0_126 = arith.constant 0 : index
    %c0_127 = arith.constant 0 : index
    %112 = vector.load %arg4[%c2_125, %c0_126, %c0_127] : memref<20x26x4xf32, #tpu.memory_space<vmem>>, vector<16x26x4xf32>
    %113 = arith.maximumf %111, %112 : vector<16x26x4xf32>
    %c3_128 = arith.constant 3 : index
    %c0_129 = arith.constant 0 : index
    %c0_130 = arith.constant 0 : index
    %114 = vector.load %arg4[%c3_128, %c0_129, %c0_130] : memref<20x26x4xf32, #tpu.memory_space<vmem>>, vector<16x26x4xf32>
    %115 = arith.maximumf %113, %114 : vector<16x26x4xf32>
    %c4_131 = arith.constant 4 : index
    %c0_132 = arith.constant 0 : index
    %c0_133 = arith.constant 0 : index
    %116 = vector.load %arg4[%c4_131, %c0_132, %c0_133] : memref<20x26x4xf32, #tpu.memory_space<vmem>>, vector<16x26x4xf32>
    %117 = arith.maximumf %115, %116 : vector<16x26x4xf32>
    %118 = vector.extract_strided_slice %117 {offsets = [0, 6, 0], sizes = [16, 16, 4], strides = [1, 1, 1]} : vector<16x26x4xf32> to vector<16x16x4xf32>
    %119 = vector.extract_strided_slice %117 {offsets = [0, 7, 0], sizes = [16, 16, 4], strides = [1, 1, 1]} : vector<16x26x4xf32> to vector<16x16x4xf32>
    %120 = arith.maximumf %118, %119 : vector<16x16x4xf32>
    %121 = vector.extract_strided_slice %117 {offsets = [0, 8, 0], sizes = [16, 16, 4], strides = [1, 1, 1]} : vector<16x26x4xf32> to vector<16x16x4xf32>
    %122 = arith.maximumf %120, %121 : vector<16x16x4xf32>
    %123 = vector.extract_strided_slice %117 {offsets = [0, 9, 0], sizes = [16, 16, 4], strides = [1, 1, 1]} : vector<16x26x4xf32> to vector<16x16x4xf32>
    %124 = arith.maximumf %122, %123 : vector<16x16x4xf32>
    %125 = vector.extract_strided_slice %117 {offsets = [0, 10, 0], sizes = [16, 16, 4], strides = [1, 1, 1]} : vector<16x26x4xf32> to vector<16x16x4xf32>
    %126 = arith.maximumf %124, %125 : vector<16x16x4xf32>
    %c1_134 = arith.constant 1 : index
    %c8_135 = arith.constant 8 : index
    %c0_136 = arith.constant 0 : index
    %127 = vector.load %arg5[%c1_134, %c8_135, %c0_136] : memref<18x25x4xf32, #tpu.memory_space<vmem>>, vector<16x16x4xf32>
    tpu.vector_store %arg5[%c1_134, %c8_135, %c0_136], %126 {strides = array<i32>} : memref<18x25x4xf32, #tpu.memory_space<vmem>>, vector<16x16x4xf32>,
    %c0_137 = arith.constant 0 : index
    %c7_138 = arith.constant 7 : index
    %c0_139 = arith.constant 0 : index
    %128 = vector.load %arg5[%c0_137, %c7_138, %c0_139] : memref<18x25x4xf32, #tpu.memory_space<vmem>>, vector<16x16x4xf32>
    %129 = arith.truncf %128 : vector<16x16x4xf32> to vector<16x16x4xbf16>
    %c9_140 = arith.constant 9 : index
    %c0_141 = arith.constant 0 : index
    %c0_142 = arith.constant 0 : index
    %130 = vector.load %arg2[%c9_140, %c0_141, %c0_142] : memref<18x4x4xbf16, #tpu.memory_space<vmem>>, vector<1x4x4xbf16>
    %131 = vector.shape_cast %130 : vector<1x4x4xbf16> to vector<4x4xbf16>
    %132 = vector.shape_cast %129 : vector<16x16x4xbf16> to vector<256x4xbf16>
    %cst_143 = arith.constant dense<0.000000e+00> : vector<256x4xf32>
    %133 = tpu.matmul %132, %131, %cst_143 {dimension_numbers = #tpu.dot_dimension_numbers<[1], [0], [0], [1], [0, 0, 1, 1], [], []>} : vector<256x4xbf16>, vector<4x4xbf16>, vector<256x4xf32> -> vector<256x4xf32>
    %c0_144 = arith.constant 0 : index
    %c8_145 = arith.constant 8 : index
    %c0_146 = arith.constant 0 : index
    %134 = vector.load %arg5[%c0_144, %c8_145, %c0_146] : memref<18x25x4xf32, #tpu.memory_space<vmem>>, vector<16x16x4xf32>
    %135 = arith.truncf %134 : vector<16x16x4xf32> to vector<16x16x4xbf16>
    %c10 = arith.constant 10 : index
    %c0_147 = arith.constant 0 : index
    %c0_148 = arith.constant 0 : index
    %136 = vector.load %arg2[%c10, %c0_147, %c0_148] : memref<18x4x4xbf16, #tpu.memory_space<vmem>>, vector<1x4x4xbf16>
    %137 = vector.shape_cast %136 : vector<1x4x4xbf16> to vector<4x4xbf16>
    %138 = vector.shape_cast %135 : vector<16x16x4xbf16> to vector<256x4xbf16>
    %cst_149 = arith.constant dense<0.000000e+00> : vector<256x4xf32>
    %139 = tpu.matmul %138, %137, %cst_149 {dimension_numbers = #tpu.dot_dimension_numbers<[1], [0], [0], [1], [0, 0, 1, 1], [], []>} : vector<256x4xbf16>, vector<4x4xbf16>, vector<256x4xf32> -> vector<256x4xf32>
    %140 = arith.addf %133, %139 : vector<256x4xf32>
    %c0_150 = arith.constant 0 : index
    %c9_151 = arith.constant 9 : index
    %c0_152 = arith.constant 0 : index
    %141 = vector.load %arg5[%c0_150, %c9_151, %c0_152] : memref<18x25x4xf32, #tpu.memory_space<vmem>>, vector<16x16x4xf32>
    %142 = arith.truncf %141 : vector<16x16x4xf32> to vector<16x16x4xbf16>
    %c11 = arith.constant 11 : index
    %c0_153 = arith.constant 0 : index
    %c0_154 = arith.constant 0 : index
    %143 = vector.load %arg2[%c11, %c0_153, %c0_154] : memref<18x4x4xbf16, #tpu.memory_space<vmem>>, vector<1x4x4xbf16>
    %144 = vector.shape_cast %143 : vector<1x4x4xbf16> to vector<4x4xbf16>
    %145 = vector.shape_cast %142 : vector<16x16x4xbf16> to vector<256x4xbf16>
    %cst_155 = arith.constant dense<0.000000e+00> : vector<256x4xf32>
    %146 = tpu.matmul %145, %144, %cst_155 {dimension_numbers = #tpu.dot_dimension_numbers<[1], [0], [0], [1], [0, 0, 1, 1], [], []>} : vector<256x4xbf16>, vector<4x4xbf16>, vector<256x4xf32> -> vector<256x4xf32>
    %147 = arith.addf %140, %146 : vector<256x4xf32>
    %c1_156 = arith.constant 1 : index
    %c7_157 = arith.constant 7 : index
    %c0_158 = arith.constant 0 : index
    %148 = vector.load %arg5[%c1_156, %c7_157, %c0_158] : memref<18x25x4xf32, #tpu.memory_space<vmem>>, vector<16x16x4xf32>
    %149 = arith.truncf %148 : vector<16x16x4xf32> to vector<16x16x4xbf16>
    %c12 = arith.constant 12 : index
    %c0_159 = arith.constant 0 : index
    %c0_160 = arith.constant 0 : index
    %150 = vector.load %arg2[%c12, %c0_159, %c0_160] : memref<18x4x4xbf16, #tpu.memory_space<vmem>>, vector<1x4x4xbf16>
    %151 = vector.shape_cast %150 : vector<1x4x4xbf16> to vector<4x4xbf16>
    %152 = vector.shape_cast %149 : vector<16x16x4xbf16> to vector<256x4xbf16>
    %cst_161 = arith.constant dense<0.000000e+00> : vector<256x4xf32>
    %153 = tpu.matmul %152, %151, %cst_161 {dimension_numbers = #tpu.dot_dimension_numbers<[1], [0], [0], [1], [0, 0, 1, 1], [], []>} : vector<256x4xbf16>, vector<4x4xbf16>, vector<256x4xf32> -> vector<256x4xf32>
    %154 = arith.addf %147, %153 : vector<256x4xf32>
    %c1_162 = arith.constant 1 : index
    %c8_163 = arith.constant 8 : index
    %c0_164 = arith.constant 0 : index
    %155 = vector.load %arg5[%c1_162, %c8_163, %c0_164] : memref<18x25x4xf32, #tpu.memory_space<vmem>>, vector<16x16x4xf32>
    %156 = arith.truncf %155 : vector<16x16x4xf32> to vector<16x16x4xbf16>
    %c13 = arith.constant 13 : index
    %c0_165 = arith.constant 0 : index
    %c0_166 = arith.constant 0 : index
    %157 = vector.load %arg2[%c13, %c0_165, %c0_166] : memref<18x4x4xbf16, #tpu.memory_space<vmem>>, vector<1x4x4xbf16>
    %158 = vector.shape_cast %157 : vector<1x4x4xbf16> to vector<4x4xbf16>
    %159 = vector.shape_cast %156 : vector<16x16x4xbf16> to vector<256x4xbf16>
    %cst_167 = arith.constant dense<0.000000e+00> : vector<256x4xf32>
    %160 = tpu.matmul %159, %158, %cst_167 {dimension_numbers = #tpu.dot_dimension_numbers<[1], [0], [0], [1], [0, 0, 1, 1], [], []>} : vector<256x4xbf16>, vector<4x4xbf16>, vector<256x4xf32> -> vector<256x4xf32>
    %161 = arith.addf %154, %160 : vector<256x4xf32>
    %c1_168 = arith.constant 1 : index
    %c9_169 = arith.constant 9 : index
    %c0_170 = arith.constant 0 : index
    %162 = vector.load %arg5[%c1_168, %c9_169, %c0_170] : memref<18x25x4xf32, #tpu.memory_space<vmem>>, vector<16x16x4xf32>
    %163 = arith.truncf %162 : vector<16x16x4xf32> to vector<16x16x4xbf16>
    %c14 = arith.constant 14 : index
    %c0_171 = arith.constant 0 : index
    %c0_172 = arith.constant 0 : index
    %164 = vector.load %arg2[%c14, %c0_171, %c0_172] : memref<18x4x4xbf16, #tpu.memory_space<vmem>>, vector<1x4x4xbf16>
    %165 = vector.shape_cast %164 : vector<1x4x4xbf16> to vector<4x4xbf16>
    %166 = vector.shape_cast %163 : vector<16x16x4xbf16> to vector<256x4xbf16>
    %cst_173 = arith.constant dense<0.000000e+00> : vector<256x4xf32>
    %167 = tpu.matmul %166, %165, %cst_173 {dimension_numbers = #tpu.dot_dimension_numbers<[1], [0], [0], [1], [0, 0, 1, 1], [], []>} : vector<256x4xbf16>, vector<4x4xbf16>, vector<256x4xf32> -> vector<256x4xf32>
    %168 = arith.addf %161, %167 : vector<256x4xf32>
    %c2_174 = arith.constant 2 : index
    %c7_175 = arith.constant 7 : index
    %c0_176 = arith.constant 0 : index
    %169 = vector.load %arg5[%c2_174, %c7_175, %c0_176] : memref<18x25x4xf32, #tpu.memory_space<vmem>>, vector<16x16x4xf32>
    %170 = arith.truncf %169 : vector<16x16x4xf32> to vector<16x16x4xbf16>
    %c15 = arith.constant 15 : index
    %c0_177 = arith.constant 0 : index
    %c0_178 = arith.constant 0 : index
    %171 = vector.load %arg2[%c15, %c0_177, %c0_178] : memref<18x4x4xbf16, #tpu.memory_space<vmem>>, vector<1x4x4xbf16>
    %172 = vector.shape_cast %171 : vector<1x4x4xbf16> to vector<4x4xbf16>
    %173 = vector.shape_cast %170 : vector<16x16x4xbf16> to vector<256x4xbf16>
    %cst_179 = arith.constant dense<0.000000e+00> : vector<256x4xf32>
    %174 = tpu.matmul %173, %172, %cst_179 {dimension_numbers = #tpu.dot_dimension_numbers<[1], [0], [0], [1], [0, 0, 1, 1], [], []>} : vector<256x4xbf16>, vector<4x4xbf16>, vector<256x4xf32> -> vector<256x4xf32>
    %175 = arith.addf %168, %174 : vector<256x4xf32>
    %c2_180 = arith.constant 2 : index
    %c8_181 = arith.constant 8 : index
    %c0_182 = arith.constant 0 : index
    %176 = vector.load %arg5[%c2_180, %c8_181, %c0_182] : memref<18x25x4xf32, #tpu.memory_space<vmem>>, vector<16x16x4xf32>
    %177 = arith.truncf %176 : vector<16x16x4xf32> to vector<16x16x4xbf16>
    %c16 = arith.constant 16 : index
    %c0_183 = arith.constant 0 : index
    %c0_184 = arith.constant 0 : index
    %178 = vector.load %arg2[%c16, %c0_183, %c0_184] : memref<18x4x4xbf16, #tpu.memory_space<vmem>>, vector<1x4x4xbf16>
    %179 = vector.shape_cast %178 : vector<1x4x4xbf16> to vector<4x4xbf16>
    %180 = vector.shape_cast %177 : vector<16x16x4xbf16> to vector<256x4xbf16>
    %cst_185 = arith.constant dense<0.000000e+00> : vector<256x4xf32>
    %181 = tpu.matmul %180, %179, %cst_185 {dimension_numbers = #tpu.dot_dimension_numbers<[1], [0], [0], [1], [0, 0, 1, 1], [], []>} : vector<256x4xbf16>, vector<4x4xbf16>, vector<256x4xf32> -> vector<256x4xf32>
    %182 = arith.addf %175, %181 : vector<256x4xf32>
    %c2_186 = arith.constant 2 : index
    %c9_187 = arith.constant 9 : index
    %c0_188 = arith.constant 0 : index
    %183 = vector.load %arg5[%c2_186, %c9_187, %c0_188] : memref<18x25x4xf32, #tpu.memory_space<vmem>>, vector<16x16x4xf32>
    %184 = arith.truncf %183 : vector<16x16x4xf32> to vector<16x16x4xbf16>
    %c17_189 = arith.constant 17 : index
    %c0_190 = arith.constant 0 : index
    %c0_191 = arith.constant 0 : index
    %185 = vector.load %arg2[%c17_189, %c0_190, %c0_191] : memref<18x4x4xbf16, #tpu.memory_space<vmem>>, vector<1x4x4xbf16>
    %186 = vector.shape_cast %185 : vector<1x4x4xbf16> to vector<4x4xbf16>
    %187 = vector.shape_cast %184 : vector<16x16x4xbf16> to vector<256x4xbf16>
    %cst_192 = arith.constant dense<0.000000e+00> : vector<256x4xf32>
    %188 = tpu.matmul %187, %186, %cst_192 {dimension_numbers = #tpu.dot_dimension_numbers<[1], [0], [0], [1], [0, 0, 1, 1], [], []>} : vector<256x4xbf16>, vector<4x4xbf16>, vector<256x4xf32> -> vector<256x4xf32>
    %189 = arith.addf %182, %188 : vector<256x4xf32>
    %190 = vector.shape_cast %189 : vector<256x4xf32> to vector<16x16x4xf32>
    %c0_193 = arith.constant 0 : index
    %c0_194 = arith.constant 0 : index
    %c0_195 = arith.constant 0 : index
    %c0_196 = arith.constant 0 : index
    %191 = vector.load %arg3[%c0_193, %c0_194, %c0_195, %c0_196] : memref<1x16x16x4xf32, #tpu.memory_space<vmem>>, vector<1x16x16x4xf32>
    %192 = vector.shape_cast %191 : vector<1x16x16x4xf32> to vector<16x16x4xf32>
    %193 = arith.addf %192, %190 : vector<16x16x4xf32>
    %c0_197 = arith.constant 0 : index
    %c0_198 = arith.constant 0 : index
    %c0_199 = arith.constant 0 : index
    %c0_200 = arith.constant 0 : index
    %194 = vector.load %arg3[%c0_197, %c0_198, %c0_199, %c0_200] : memref<1x16x16x4xf32, #tpu.memory_space<vmem>>, vector<1x16x16x4xf32>
    %195 = vector.shape_cast %194 : vector<1x16x16x4xf32> to vector<16x16x4xf32>
    %196 = vector.shape_cast %193 : vector<16x16x4xf32> to vector<1x16x16x4xf32>
    tpu.vector_store %arg3[%c0_197, %c0_198, %c0_199, %c0_200], %196 {strides = array<i32>} : memref<1x16x16x4xf32, #tpu.memory_space<vmem>>, vector<1x16x16x4xf32>,
    return
  }
  func.func @transform_0(%arg0: i32) -> (i32, i32, i32, i32) {
    %c0_i32 = arith.constant 0 : i32
    %c0_i32_0 = arith.constant 0 : i32
    %c0_i32_1 = arith.constant 0 : i32
    %c0_i32_2 = arith.constant 0 : i32
    return %arg0, %c0_i32, %c0_i32_0, %c0_i32_1 : i32, i32, i32, i32
  }
  func.func @transform_1(%arg0: i32) -> (i32, i32, i32) {
    %c0_i32 = arith.constant 0 : i32
    %c0_i32_0 = arith.constant 0 : i32
    %c0_i32_1 = arith.constant 0 : i32
    %c0_i32_2 = arith.constant 0 : i32
    return %c0_i32, %c0_i32_0, %c0_i32_1 : i32, i32, i32
  }
  func.func @transform_2(%arg0: i32) -> (i32, i32, i32, i32) {
    %c0_i32 = arith.constant 0 : i32
    %c0_i32_0 = arith.constant 0 : i32
    %c0_i32_1 = arith.constant 0 : i32
    %c0_i32_2 = arith.constant 0 : i32
    return %arg0, %c0_i32, %c0_i32_0, %c0_i32_1 : i32, i32, i32, i32
  }
}

</mosaic_0001>

<bundles_post_ra>
// kernel: crp_block_forward.1
= control target key start
LH: loop header
LB: loop body
LE: loop exit
PB: predicated region body
PF: predicated region fallthrough
CT: control target
= control target key end

     0   :  { %s10323_s9 = smov 0   ;;  %s13458_s0 = inlined_call_operand.vmem [shape: f32[2,16,16,4], index: 0, kind: input, shape index: {}, may-alias: {0,2}]   ;;  %s13459_s1 = inlined_call_operand.vmem [shape: bf16[18,4,4], index: 1, kind: input, shape index: {}]   ;;  %s13460_s2 = inlined_call_operand.vmem [shape: f32[2,16,16,4], index: 2, kind: output, shape index: {}, may-alias: {0,2}]  }
   0x1 LB: > { %s8521_s10 = sadd.s32 4294967295, %s10304_s9   ;;  %p8525_p0 = scmp.ge.s32.totalorder %s10304_s9, 1  ;;  %s10304_s9 = sphi %s10323_s9, %s12_s9  }
   0x2   : > { %p112_p1 = scmp.lt.s32.totalorder %s10304_s9, 3 }
   0x4   : > { %p113_p2 = pnand %p8525_p0, %p112_p1 }
   0x6   : > { %116 = sbr.rel (%p113_p2) target bundleno = 1875 (0x753), region = 28 }
   0xd   : > { %v8530_v0 = vld [vmem:[%s13459_s1 + $0x2] sm:$0x3]  ;;  %vm1864_vm0 = vcmask 1041408   ;;  %vm145_vm1 = vcmask 31744   ;;  %p10336_p3 = scmp.lt.s32.totalorder %s8521_s10, 1  ;;  %v13461_v2 = vmov 0.0  }
   0xe   : > { %10269 = vmatprep.subr.msk.bf16.mxu0 %vm1864_vm0, %v8530_v0  ;;  %v1866_v1 = vsel %vm1864_vm0, %v8530_v0, 0  ;;  %205 = vst.msk [vmem:[#allocation3 + $0x8] sm:$0xff] %vm145_vm1, %v13461_v2  ;;  %206 = vst.msk [vmem:[#allocation3 + $0x10] sm:$0xff] %vm145_vm1, %v13461_v2  ;;  %v10389_v3 = vld [vmem:[%s13459_s1] sm:$0x3]  ;;  %vm149_vm2 = vcmask 25600  }
   0xf   : > { %204 = vst.msk [vmem:[#allocation3] sm:$0xff] %vm145_vm1, %v13461_v2  ;;  %210 = vst.msk [vmem:[#allocation3 + $0x220] sm:$0xff] %vm145_vm1, %v13461_v2  ;;  %9146 = vmatpush3.bf16.msra.mxu0 %v1866_v1  ;;  %s13600_s10 = smov (!%p10336_p3, %s8521_s10), 1  ;;  %v10307_v4 = vmov -inf   ;;  %vm974_vm3 = vcmask 1046528   ;;  %vm1151_vm4 = vcmask 1045504  }
  0x10   : > { %211 = vst.msk [vmem:[#allocation3 + $0x228] sm:$0xff] %vm145_vm1, %v13461_v2  ;;  %212 = vst.msk [vmem:[#allocation3 + $0x230] sm:$0xff] %vm145_vm1, %v13461_v2  ;;  %10270 = vmatprep.subr.msk.bf16.mxu0 %vm1864_vm0, %v10389_v3  ;;  %s8837_s16 = sshll.u32 %s13600_s10, 8  ;;  %vm1312_vm5 = vcmask 1044480   ;;  %v10513_v35 = vsel %vm1864_vm0, %v10389_v3, 0  ;;  %vm1489_vm6 = vcmask 1043456  }
  0x11   : > { %215 = vst.msk [vmem:[#allocation3 + $0x20] sm:$0xff] %vm145_vm1, %v13461_v2  ;;  %216 = vst.msk [vmem:[#allocation3 + $0x40] sm:$0xff] %vm145_vm1, %v13461_v2  ;;  %s10465_s19 = scalar_lea.vmem %s13458_s0, %s8837_s16  ;;  %vm1670_vm7 = vcmask 29696   ;;  %vm1667_vm8 = vcmask 31750   ;;  %s10794_s22 = scalar_lea.vmem %s13460_s2, %s8837_s16  ;;  %vm207_vm9 = vcmask 24576  }
  0x12   : > { %217 = vst.msk [vmem:[#allocation3 + $0x60] sm:$0xff] %vm145_vm1, %v13461_v2  ;;  %218 = vst.msk [vmem:[#allocation3 + $0x80] sm:$0xff] %vm145_vm1, %v13461_v2  ;;  %v10468_v5 = vld [vmem:[%s10465_s19] sm:$0xff]  ;;  %v10471_v6 = vld [vmem:[%s10465_s19 + $0x8] sm:$0xff] }
  0x13   : > { %219 = vst.msk [vmem:[#allocation3 + $0xa0] sm:$0xff] %vm145_vm1, %v13461_v2  ;;  %220 = vst.msk [vmem:[#allocation3 + $0xc0] sm:$0xff] %vm145_vm1, %v13461_v2  ;;  %v10474_v7 = vld [vmem:[%s10465_s19 + $0x10] sm:$0xff]  ;;  %v10477_v8 = vld [vmem:[%s10465_s19 + $0x18] sm:$0xff] }
  0x14   : > { %221 = vst.msk [vmem:[#allocation3 + $0xe0] sm:$0xff] %vm145_vm1, %v13461_v2  ;;  %222 = vst.msk [vmem:[#allocation3 + $0x100] sm:$0xff] %vm145_vm1, %v13461_v2  ;;  %v10480_v9 = vld [vmem:[%s10465_s19 + $0x20] sm:$0xff]  ;;  %v10483_v10 = vld [vmem:[%s10465_s19 + $0x28] sm:$0xff] }
  0x15   : > { %223 = vst.msk [vmem:[#allocation3 + $0x120] sm:$0xff] %vm145_vm1, %v13461_v2  ;;  %224 = vst.msk [vmem:[#allocation3 + $0x140] sm:$0xff] %vm145_vm1, %v13461_v2  ;;  %v1766_v11 = vld [vmem:[#allocation3 + $0x8] sm:$0xff]  ;;  %v1767_v12 = vld [vmem:[#allocation3 + $0x10] sm:$0xff] }
  0x16   : > { %225 = vst.msk [vmem:[#allocation3 + $0x160] sm:$0xff] %vm145_vm1, %v13461_v2  ;;  %226 = vst.msk [vmem:[#allocation3 + $0x180] sm:$0xff] %vm145_vm1, %v13461_v2  ;;  %v10498_v13 = vld [vmem:[%s10465_s19 + $0x30] sm:$0xff]  ;;  %v1798_v14 = vpack.c.bf16 %v1767_v12, %v1766_v11  ;;  %v10516_v36 = vld [vmem:[%s10465_s19 + $0x38] sm:$0xff] }
  0x17   : > { %227 = vst.msk [vmem:[#allocation3 + $0x1a0] sm:$0xff] %vm145_vm1, %v13461_v2  ;;  %228 = vst.msk [vmem:[#allocation3 + $0x1c0] sm:$0xff] %vm145_vm1, %v13461_v2  ;;  %v10559_v11 = vld [vmem:[%s10465_s19 + $0x48] sm:$0xff] }
  0x18   : > { %229 = vst.msk [vmem:[#allocation3 + $0x1e0] sm:$0xff] %vm145_vm1, %v13461_v2  ;;  %230 = vst.msk [vmem:[#allocation3 + $0x200] sm:$0xff] %vm145_vm1, %v13461_v2  ;;  %9147 = vmatprep.mubr.msk.bf16.mxu0 %vm145_vm1, %v1798_v14 }
  0x19   : > { %214 = vst.msk [vmem:[#allocation3] sm:$0xff] %vm145_vm1, %v13461_v2  ;;  %231 = vst.msk [vmem:[#allocation3 + $0x220] sm:$0xff] %vm145_vm1, %v13461_v2 }
  0x1a   : > { %146 = vst.msk [vmem:[#allocation2] sm:$0xff] %vm145_vm1, %v10307_v4  ;;  %147 = vst.msk [vmem:[#allocation2 + $0x8] sm:$0xff] %vm145_vm1, %v10307_v4 }
  0x1b   : > { %148 = vst.msk [vmem:[#allocation2 + $0x10] sm:$0xff] %vm145_vm1, %v10307_v4  ;;  %151 = vst.msk [vmem:[#allocation2 + $0x20] sm:$0xff] %vm145_vm1, %v10307_v4 }
  0x1c   : > { %150 = vst.msk [vmem:[#allocation2 + $0x18] sm:$0x3] %vm149_vm2, %v10307_v4  ;;  %154 = vst.msk [vmem:[#allocation2 + $0x38] sm:$0x3] %vm149_vm2, %v10307_v4 }
  0x1d   : > { %152 = vst.msk [vmem:[#allocation2 + $0x28] sm:$0xff] %vm145_vm1, %v10307_v4  ;;  %153 = vst.msk [vmem:[#allocation2 + $0x30] sm:$0xff] %vm145_vm1, %v10307_v4 }
  0x1e   : > { %166 = vst.msk [vmem:[#allocation2 + $0x40] sm:$0xff] %vm145_vm1, %v10307_v4  ;;  %167 = vst.msk [vmem:[#allocation2 + $0x60] sm:$0xff] %vm145_vm1, %v10307_v4 }
  0x1f   : > { %168 = vst.msk [vmem:[#allocation2 + $0x80] sm:$0xff] %vm145_vm1, %v10307_v4  ;;  %156 = vst.msk [vmem:[#allocation2 + $0x240] sm:$0xff] %vm145_vm1, %v10307_v4 }
  0x20   : > { %186 = vst.msk [vmem:[#allocation2 + $0x58] sm:$0x3] %vm149_vm2, %v10307_v4  ;;  %187 = vst.msk [vmem:[#allocation2 + $0x78] sm:$0x3] %vm149_vm2, %v10307_v4 }
  0x21   : > { %188 = vst.msk [vmem:[#allocation2 + $0x98] sm:$0x3] %vm149_vm2, %v10307_v4  ;;  %159 = vst.msk [vmem:[#allocation2 + $0x258] sm:$0x3] %vm149_vm2, %v10307_v4  ;;  %v348_v15 = vld [vmem:[#allocation2 + $0x8] sm:$0xff] }
  0x22   : > { %157 = vst.msk [vmem:[#allocation2 + $0x248] sm:$0xff] %vm145_vm1, %v10307_v4  ;;  %158 = vst.msk [vmem:[#allocation2 + $0x250] sm:$0xff] %vm145_vm1, %v10307_v4  ;;  %v349_v16 = vld [vmem:[#allocation2 + $0x10] sm:$0xff] }
  0x23   : > { %160 = vst.msk [vmem:[#allocation2 + $0x260] sm:$0xff] %vm145_vm1, %v10307_v4  ;;  %161 = vst.msk [vmem:[#allocation2 + $0x268] sm:$0xff] %vm145_vm1, %v10307_v4 }
  0x24   : > { %162 = vst.msk [vmem:[#allocation2 + $0x270] sm:$0xff] %vm145_vm1, %v10307_v4  ;;  %169 = vst.msk [vmem:[#allocation2 + $0xa0] sm:$0xff] %vm145_vm1, %v10307_v4  ;;  %v413_v17 = vld [vmem:[#allocation2 + $0x28] sm:$0xff]  ;;  %v414_v21 = vld [vmem:[#allocation2 + $0x30] sm:$0xff] }
  0x25   : > { %163 = vst.msk [vmem:[#allocation2 + $0x278] sm:$0x3] %vm149_vm2, %v10307_v4  ;;  %189 = vst.msk [vmem:[#allocation2 + $0xb8] sm:$0x3] %vm149_vm2, %v10307_v4  ;;  %v477_v24 = vmax.f32 %v348_v15, %v413_v17  ;;  %v10503_v25 = vld [vmem:[#allocation2 + $0x40] sm:$0xff]  ;;  %v478_v26 = vmax.f32 %v349_v16, %v414_v21 }
  0x26   : > { %170 = vst.msk [vmem:[#allocation2 + $0xc0] sm:$0xff] %vm145_vm1, %v10307_v4  ;;  %171 = vst.msk [vmem:[#allocation2 + $0xe0] sm:$0xff] %vm145_vm1, %v10307_v4  ;;  %v10505_v29 = vld [vmem:[#allocation2 + $0x60] sm:$0xff] }
  0x27   : > { %172 = vst.msk [vmem:[#allocation2 + $0x100] sm:$0xff] %vm145_vm1, %v10307_v4  ;;  %173 = vst.msk [vmem:[#allocation2 + $0x120] sm:$0xff] %vm145_vm1, %v10307_v4  ;;  %v543_v28 = vld [vmem:[#allocation2 + $0x58] sm:$0x3]  ;;  %v10509_v33 = vld [vmem:[#allocation2 + $0x80] sm:$0xff]  ;;  %v484_v42 = vmax.f32 %v10503_v25, %v10505_v29 }
  0x28   : > { %174 = vst.msk [vmem:[#allocation2 + $0x140] sm:$0xff] %vm145_vm1, %v10307_v4  ;;  %175 = vst.msk [vmem:[#allocation2 + $0x160] sm:$0xff] %vm145_vm1, %v10307_v4  ;;  %v672_v30 = vld [vmem:[#allocation2 + $0x78] sm:$0x3]  ;;  %v488_v43 = vmax.f32 %v10505_v29, %v10509_v33 }
  0x29   : > { %176 = vst.msk [vmem:[#allocation2 + $0x180] sm:$0xff] %vm145_vm1, %v10307_v4  ;;  %177 = vst.msk [vmem:[#allocation2 + $0x1a0] sm:$0xff] %vm145_vm1, %v10307_v4  ;;  %v801_v34 = vld [vmem:[#allocation2 + $0x98] sm:$0x3] }
  0x2a   : > { %178 = vst.msk [vmem:[#allocation2 + $0x1c0] sm:$0xff] %vm145_vm1, %v10307_v4  ;;  %179 = vst.msk [vmem:[#allocation2 + $0x1e0] sm:$0xff] %vm145_vm1, %v10307_v4  ;;  %v419_v53 = vld [vmem:[#allocation2 + $0x58] sm:$0x3] }
  0x2b   : > { %180 = vst.msk [vmem:[#allocation2 + $0x200] sm:$0xff] %vm145_vm1, %v10307_v4  ;;  %181 = vst.msk [vmem:[#allocation2 + $0x220] sm:$0xff] %vm145_vm1, %v10307_v4  ;;  %v547_v55 = vld [vmem:[#allocation2 + $0x78] sm:$0x3]  ;;  %v10548_v62 = vld [vmem:[#allocation2 + $0xa0] sm:$0xff] }
  0x2c   : > { %190 = vst.msk [vmem:[#allocation2 + $0xd8] sm:$0x3] %vm149_vm2, %v10307_v4  ;;  %191 = vst.msk [vmem:[#allocation2 + $0xf8] sm:$0x3] %vm149_vm2, %v10307_v4 }
  0x2d   : > { %192 = vst.msk [vmem:[#allocation2 + $0x118] sm:$0x3] %vm149_vm2, %v10307_v4  ;;  %193 = vst.msk [vmem:[#allocation2 + $0x138] sm:$0x3] %vm149_vm2, %v10307_v4 }
  0x2e   : > { %194 = vst.msk [vmem:[#allocation2 + $0x158] sm:$0x3] %vm149_vm2, %v10307_v4  ;;  %195 = vst.msk [vmem:[#allocation2 + $0x178] sm:$0x3] %vm149_vm2, %v10307_v4 }
  0x2f   : > { %196 = vst.msk [vmem:[#allocation2 + $0x198] sm:$0x3] %vm149_vm2, %v10307_v4  ;;  %197 = vst.msk [vmem:[#allocation2 + $0x1b8] sm:$0x3] %vm149_vm2, %v10307_v4 }
  0x30   : > { %198 = vst.msk [vmem:[#allocation2 + $0x1d8] sm:$0x3] %vm149_vm2, %v10307_v4  ;;  %199 = vst.msk [vmem:[#allocation2 + $0x1f8] sm:$0x3] %vm149_vm2, %v10307_v4 }
  0x31   : > { %200 = vst.msk [vmem:[#allocation2 + $0x218] sm:$0x3] %vm149_vm2, %v10307_v4  ;;  %201 = vst.msk [vmem:[#allocation2 + $0x238] sm:$0x3] %vm149_vm2, %v10307_v4 }
  0x32   : > { %164 = vst.msk [vmem:[#allocation2] sm:$0xff] %vm145_vm1, %v10307_v4  ;;  %165 = vst.msk [vmem:[#allocation2 + $0x20] sm:$0xff] %vm145_vm1, %v10307_v4 }
  0x33   : > { %184 = vst.msk [vmem:[#allocation2 + $0x18] sm:$0x3] %vm149_vm2, %v10307_v4  ;;  %185 = vst.msk [vmem:[#allocation2 + $0x38] sm:$0x3] %vm149_vm2, %v10307_v4 }
  0x34   : > { %182 = vst.msk [vmem:[#allocation2 + $0x240] sm:$0xff] %vm145_vm1, %v10307_v4  ;;  %183 = vst.msk [vmem:[#allocation2 + $0x260] sm:$0xff] %vm145_vm1, %v10307_v4 }
  0x35   : > { %202 = vst.msk [vmem:[#allocation2 + $0x258] sm:$0x3] %vm149_vm2, %v10307_v4  ;;  %203 = vst.msk [vmem:[#allocation2 + $0x278] sm:$0x3] %vm149_vm2, %v10307_v4  ;;  %v10556_v4 = vld [vmem:[%s10465_s19 + $0x40] sm:$0xff] }
  0x36   : > { %315 = vst.msk [vmem:[#allocation2 + $0x48] sm:$0xff] %vm145_vm1, %v10468_v5  ;;  %316 = vst.msk [vmem:[#allocation2 + $0x50] sm:$0xff] %vm145_vm1, %v10471_v6 }
  0x37   : > { %317 = vst.msk [vmem:[#allocation2 + $0x68] sm:$0xff] %vm145_vm1, %v10474_v7  ;;  %318 = vst.msk [vmem:[#allocation2 + $0x70] sm:$0xff] %vm145_vm1, %v10477_v8 }
  0x38   : > { %319 = vst.msk [vmem:[#allocation2 + $0x88] sm:$0xff] %vm145_vm1, %v10480_v9  ;;  %320 = vst.msk [vmem:[#allocation2 + $0x90] sm:$0xff] %vm145_vm1, %v10483_v10 }
  0x39   : > { %321 = vst.msk [vmem:[#allocation2 + $0xa8] sm:$0xff] %vm145_vm1, %v10498_v13  ;;  %v347_v18 = vld [vmem:[#allocation2] sm:$0xff]  ;;  %322 = vst.msk [vmem:[#allocation2 + $0xb0] sm:$0xff] %vm145_vm1, %v10516_v36 }
  0x3a   : > { %v350_v19 = vld [vmem:[#allocation2 + $0x18] sm:$0x3]  ;;  %v412_v20 = vld [vmem:[#allocation2 + $0x20] sm:$0xff]  ;;  %323 = vst.msk [vmem:[#allocation2 + $0xc8] sm:$0xff] %vm145_vm1, %v10556_v4  ;;  %324 = vst.msk [vmem:[#allocation2 + $0xd0] sm:$0xff] %vm145_vm1, %v10559_v11 }
  0x3b   : > { %v415_v22 = vld [vmem:[#allocation2 + $0x38] sm:$0x3]  ;;  %v476_v23 = vmax.f32 %v347_v18, %v412_v20  ;;  %v480_v31 = vmax.f32 %v412_v20, %v10503_v25 }
  0x3c   : > { %v479_v27 = vmax.f32 %v350_v19, %v415_v22  ;;  %v354_v52 = vld [vmem:[#allocation2 + $0x38] sm:$0x3] }
  0x3d   : > { %v604_v32 = vmax.f32 %v476_v23, %v10503_v25  ;;  %v10518_v37 = vld [vmem:[#allocation2 + $0x48] sm:$0xff]  ;;  %v10520_v38 = vld [vmem:[#allocation2 + $0x50] sm:$0xff]  ;;  %v608_v41 = vmax.f32 %v480_v31, %v10505_v29  ;;  %v483_v61 = vmax.f32 %v354_v52, %v419_v53 }
  0x3e   : > { %v607_v39 = vmax.f32 %v479_v27, %v543_v28  ;;  %v10522_v40 = vld [vmem:[#allocation2 + $0x68] sm:$0xff]  ;;  %v605_v44 = vmax.f32 %v477_v24, %v10518_v37  ;;  %v606_v45 = vmax.f32 %v478_v26, %v10520_v38  ;;  %v10533_v46 = vld [vmem:[#allocation2 + $0x70] sm:$0xff]  ;;  %v481_v50 = vmax.f32 %v413_v17, %v10518_v37 }
  0x3f   : > { %v733_v47 = vmax.f32 %v604_v32, %v10505_v29  ;;  %v10536_v48 = vld [vmem:[#allocation2 + $0x88] sm:$0xff]  ;;  %v10538_v49 = vld [vmem:[#allocation2 + $0x90] sm:$0xff]  ;;  %v482_v54 = vmax.f32 %v414_v21, %v10520_v38  ;;  %v737_v56 = vmax.f32 %v608_v41, %v10509_v33  ;;  %v485_v57 = vmax.f32 %v10518_v37, %v10522_v40  ;;  %v676_v32 = vld [vmem:[#allocation2 + $0x98] sm:$0x3] }
  0x40   : > { %v736_v51 = vmax.f32 %v607_v39, %v672_v30  ;;  %v734_v58 = vmax.f32 %v605_v44, %v10522_v40  ;;  %v735_v59 = vmax.f32 %v606_v45, %v10533_v46  ;;  %v609_v0 = vmax.f32 %v481_v50, %v10522_v40  ;;  %v10574_v26 = vld [vmem:[%s10465_s19 + $0x50] sm:$0xff]  ;;  %v10583_v45 = vld [vmem:[#allocation2 + $0xa8] sm:$0xff]  ;;  %v10588_v50 = vld [vmem:[%s10465_s19 + $0x58] sm:$0xff] }
  0x41   : > { %v862_v60 = vmax.f32 %v733_v47, %v10509_v33  ;;  %v610_v1 = vmax.f32 %v482_v54, %v10533_v46  ;;  %v10553_v3 = vmax.f32 %v737_v56, %v10548_v62  ;;  %v611_v16 = vmax.f32 %v483_v61, %v547_v55  ;;  %325 = vst.msk [vmem:[#allocation2 + $0xe8] sm:$0xff] %vm145_vm1, %v10574_v26  ;;  %v10585_v47 = vld [vmem:[#allocation2 + $0xb0] sm:$0xff]  ;;  %v805_v55 = vld [vmem:[#allocation2 + $0xb8] sm:$0x3]  ;;  %v10667_v25 = vld [vmem:[#allocation2 + $0xc8] sm:$0xff] }
  0x42   : > { %v865_v63 = vmax.f32 %v736_v51, %v801_v34  ;;  %v10562_v12 = vmax.f32 %v734_v58, %v10536_v48  ;;  %v864_v14 = vmax.f32 %v735_v59, %v10538_v49  ;;  %v738_v19 = vmax.f32 %v609_v0, %v10536_v48  ;;  %326 = vst.msk [vmem:[#allocation2 + $0xf0] sm:$0xff] %vm145_vm1, %v10588_v50  ;;  %v10601_v0 = vld [vmem:[%s10465_s19 + $0x68] sm:$0xff] }
  0x43   : > { %v975_v15 = vrot.slane %v862_v60, 1  ;;  %v739_v20 = vmax.f32 %v610_v1, %v10538_v49  ;;  %v740_v61 = vmax.f32 %v611_v16, %v676_v32  ;;  %328 = vst.msk [vmem:[#allocation2 + $0x110] sm:$0xff] %vm145_vm1, %v10601_v0  ;;  %v10618_v32 = vld [vmem:[%s10465_s19 + $0x70] sm:$0xff]  ;;  %v489_v37 = vmax.f32 %v10522_v40, %v10536_v48 }
  0x44   : > { %v1316_v17 = vrot.slane %v865_v63, 3  ;;  %v1493_v18 = vrot.slane %v865_v63, 4  ;;  %v976_v21 = vrot.slane %v10562_v12, 1  ;;  %v978_v22 = vrot.slane %v864_v14, 1  ;;  %v10598_v63 = vld [vmem:[%s10465_s19 + $0x60] sm:$0xff]  ;;  %329 = vst.msk [vmem:[#allocation2 + $0x128] sm:$0xff] %vm145_vm1, %v10618_v32 }
  0x45   : > { %v1152_v23 = vrot.slane %v10562_v12, 2  ;;  %v1153_v24 = vrot.slane %v864_v14, 2  ;;  %v1313_v27 = vrot.slane %v10562_v12, 3  ;;  %v1314_v28 = vrot.slane %v864_v14, 3  ;;  %327 = vst.msk [vmem:[#allocation2 + $0x108] sm:$0xff] %vm145_vm1, %v10598_v63 }
  0x46   : > { %v1490_v30 = vrot.slane %v10562_v12, 4  ;;  %v1491_v31 = vrot.slane %v864_v14, 4  ;;  %v977_v34 = vsel %vm974_vm3, %v975_v15, %v976_v21  ;;  %v979_v39 = vsel %vm974_vm3, %v976_v21, %v978_v22 }
  0x47   : > { %v1105_v41 = vmax.f32 %v864_v14, %v978_v22  ;;  %v1154_v44 = vsel %vm1151_vm4, %v1152_v23, %v1153_v24  ;;  %v1103_v51 = vmax.f32 %v862_v60, %v977_v34  ;;  %v1104_v52 = vmax.f32 %v10562_v12, %v979_v39  ;;  %v10621_v34 = vld [vmem:[%s10465_s19 + $0x78] sm:$0xff] }
  0x48   : > { %v1315_v53 = vsel %vm1312_vm5, %v1313_v27, %v1314_v28  ;;  %v1317_v54 = vsel %vm1312_vm5, %v1314_v28, %v1316_v17  ;;  %v1492_v58 = vsel %vm1489_vm6, %v1490_v30, %v1491_v31  ;;  %v1494_v59 = vsel %vm1489_vm6, %v1491_v31, %v1493_v18  ;;  %330 = vst.msk [vmem:[#allocation2 + $0x130] sm:$0xff] %vm145_vm1, %v10621_v34 }
  0x49   : > { %v1250_v56 = vmax.f32 %v1105_v41, %v1153_v24  ;;  %v1248_v60 = vmax.f32 %v1103_v51, %v1152_v23  ;;  %v1249_v1 = vmax.f32 %v1104_v52, %v1154_v44  ;;  %v10604_v12 = vmax.f32 %v738_v19, %v10583_v45 }
  0x4a   : > { %v868_v14 = vmax.f32 %v739_v20, %v10585_v47  ;;  %v869_v16 = vmax.f32 %v740_v61, %v805_v55  ;;  %v980_v17 = vrot.slane %v10553_v3, 1  ;;  %v486_v18 = vmax.f32 %v10520_v38, %v10533_v46 }
  0x4b   : > { %v1443_v15 = vmax.f32 %v1250_v56, %v1317_v54  ;;  %v1441_v21 = vmax.f32 %v1248_v60, %v1313_v27  ;;  %v1442_v19 = vmax.f32 %v1249_v1, %v1315_v53  ;;  %v981_v22 = vrot.slane %v10604_v12, 1  ;;  %v358_v53 = vld [vmem:[#allocation2 + $0x58] sm:$0x3] }
  0x4c   : > { %v983_v23 = vrot.slane %v868_v14, 1  ;;  %v1155_v24 = vrot.slane %v10604_v12, 2  ;;  %v1156_v28 = vrot.slane %v868_v14, 2  ;;  %v1318_v31 = vrot.slane %v10604_v12, 3  ;;  %v423_v54 = vld [vmem:[#allocation2 + $0x78] sm:$0x3] }
  0x4d   : > { %v1620_v20 = vmax.f32 %v1443_v15, %v1494_v59  ;;  %v1618_v39 = vmax.f32 %v1441_v21, %v1490_v30  ;;  %v1619_v41 = vmax.f32 %v1442_v19, %v1492_v58  ;;  %v982_v44 = vsel %vm974_vm3, %v980_v17, %v981_v22  ;;  %v551_v15 = vld [vmem:[#allocation2 + $0x98] sm:$0x3]  ;;  %v10637_v17 = vld [vmem:[%s10465_s19 + $0x80] sm:$0xff] }
  0x4e   : > { %v984_v38 = vsel %vm974_vm3, %v981_v22, %v983_v23  ;;  %v1106_v27 = vmax.f32 %v10553_v3, %v982_v44  ;;  %v1108_v52 = vmax.f32 %v868_v14, %v983_v23  ;;  %v1157_v30 = vsel %vm1151_vm4, %v1155_v24, %v1156_v28  ;;  %331 = vst.msk [vmem:[#allocation2 + $0x148] sm:$0xff] %vm145_vm1, %v10637_v17 }
  0x4f   : > { %1671 = vst.msk [vmem:[#allocation3 + $0x32] sm:$0x3f] %vm1670_vm7, %v1620_v20  ;;  %v1107_v51 = vmax.f32 %v10604_v12, %v984_v38  ;;  %v1319_v55 = vrot.slane %v868_v14, 3  ;;  %v1321_v56 = vrot.slane %v869_v16, 3  ;;  %v1495_v58 = vrot.slane %v10604_v12, 4  ;;  %v10643_v20 = vld [vmem:[%s10465_s19 + $0x88] sm:$0xff] }
  0x50   : > { %1668 = vst.msk [vmem:[#allocation3 + $0x22] sm:$0xc0] %vm1667_vm8, %v1618_v39  ;;  %v1496_v59 = vrot.slane %v868_v14, 4  ;;  %v1251_v61 = vmax.f32 %v1106_v27, %v1155_v24  ;;  %v1253_v60 = vmax.f32 %v1108_v52, %v1156_v28  ;;  %v1498_v1 = vrot.slane %v869_v16, 4  ;;  %v680_v28 = vld [vmem:[#allocation2 + $0xb8] sm:$0x3] }
  0x51   : > { %1669 = vst.msk [vmem:[#allocation3 + $0x2a] sm:$0xff] %vm145_vm1, %v1619_v41  ;;  %v1252_v3 = vmax.f32 %v1107_v51, %v1157_v30  ;;  %v1320_v21 = vsel %vm1312_vm5, %v1318_v31, %v1319_v55  ;;  %v1322_v19 = vsel %vm1312_vm5, %v1319_v55, %v1321_v56  ;;  %v487_v23 = vmax.f32 %v358_v53, %v423_v54  ;;  %v362_v39 = vld [vmem:[#allocation2 + $0x78] sm:$0x3]  ;;  %v10660_v51 = vld [vmem:[%s10465_s19 + $0x90] sm:$0xff]  ;;  %v10665_v55 = vld [vmem:[#allocation2 + $0xc0] sm:$0xff] }
  0x52   : > { %v1497_v22 = vsel %vm1489_vm6, %v1495_v58, %v1496_v59  ;;  %v1444_v12 = vmax.f32 %v1251_v61, %v1318_v31  ;;  %v1446_v16 = vmax.f32 %v1253_v60, %v1322_v19  ;;  %v1499_v24 = vsel %vm1489_vm6, %v1496_v59, %v1498_v1  ;;  %332 = vst.msk [vmem:[#allocation2 + $0x150] sm:$0xff] %vm145_vm1, %v10643_v20  ;;  %v427_v27 = vld [vmem:[#allocation2 + $0x98] sm:$0x3] }
  0x53   : > { %v1445_v14 = vmax.f32 %v1252_v3, %v1320_v21  ;;  %v612_v41 = vmax.f32 %v484_v42, %v10509_v33  ;;  %v613_v44 = vmax.f32 %v485_v57, %v10536_v48  ;;  %v614_v31 = vmax.f32 %v486_v18, %v10538_v49  ;;  %v10663_v52 = vld [vmem:[%s10465_s19 + $0x98] sm:$0xff]  ;;  %v10669_v42 = vld [vmem:[#allocation2 + $0xd0] sm:$0xff]  ;;  %333 = vst.msk [vmem:[#allocation2 + $0x168] sm:$0xff] %vm145_vm1, %v10660_v51 }
  0x54   : > { %v615_v38 = vmax.f32 %v487_v23, %v551_v15  ;;  %v1621_v30 = vmax.f32 %v1444_v12, %v1495_v58  ;;  %v1623_v54 = vmax.f32 %v1446_v16, %v1499_v24  ;;  %334 = vst.msk [vmem:[#allocation2 + $0x170] sm:$0xff] %vm145_vm1, %v10663_v52  ;;  %v809_v59 = vld [vmem:[#allocation2 + $0xd8] sm:$0x3]  ;;  %v490_v40 = vmax.f32 %v10533_v46, %v10538_v49  ;;  %v10701_v46 = vld [vmem:[%s10465_s19 + $0xa8] sm:$0xff] }
  0x55   : > { %v1622_v53 = vmax.f32 %v1445_v14, %v1497_v22  ;;  %v741_v57 = vmax.f32 %v612_v41, %v10548_v62  ;;  %v742_v18 = vmax.f32 %v613_v44, %v10583_v45  ;;  %v743_v56 = vmax.f32 %v614_v31, %v10585_v47  ;;  %v555_v61 = vld [vmem:[#allocation2 + $0xb8] sm:$0x3]  ;;  %v10698_v14 = vld [vmem:[%s10465_s19 + $0xa0] sm:$0xff]  ;;  %336 = vst.msk [vmem:[#allocation2 + $0x190] sm:$0xff] %vm145_vm1, %v10701_v46 }
  0x56   : > { %v744_v58 = vmax.f32 %v615_v38, %v680_v28  ;;  %1672 = vst.msk [vmem:[#allocation3 + $0x42] sm:$0xc0] %vm1667_vm8, %v1621_v30  ;;  %v491_v1 = vmax.f32 %v362_v39, %v427_v27  ;;  %v616_v15 = vmax.f32 %v488_v43, %v10548_v62  ;;  %v10690_v21 = vmax.f32 %v489_v37, %v10583_v45 }
  0x57   : > { %1673 = vst.msk [vmem:[#allocation3 + $0x4a] sm:$0xff] %vm145_vm1, %v1622_v53  ;;  %v870_v22 = vmax.f32 %v741_v57, %v10665_v55  ;;  %v10694_v23 = vmax.f32 %v742_v18, %v10667_v25  ;;  %v872_v12 = vmax.f32 %v743_v56, %v10669_v42  ;;  %v618_v24 = vmax.f32 %v490_v40, %v10585_v47 }
  0x58   : > { %v1768_v3 = vld [vmem:[#allocation3 + $0x28] sm:$0xff]  ;;  %v1769_v60 = vld [vmem:[#allocation3 + $0x30] sm:$0xff]  ;;  %1674 = vst.msk [vmem:[#allocation3 + $0x52] sm:$0x3f] %vm1670_vm7, %v1623_v54  ;;  %v873_v16 = vmax.f32 %v744_v58, %v809_v59  ;;  %v619_v29 = vmax.f32 %v491_v1, %v555_v61  ;;  %v745_v43 = vmax.f32 %v616_v15, %v10665_v55 }
  0x59   : > { %v1799_v19 = vpack.c.bf16 %v1769_v60, %v1768_v3  ;;  %335 = vst.msk [vmem:[#allocation2 + $0x188] sm:$0xff] %vm145_vm1, %v10698_v14  ;;  %v985_v28 = vrot.slane %v870_v22, 1  ;;  %v986_v39 = vrot.slane %v10694_v23, 1  ;;  %v988_v41 = vrot.slane %v872_v12, 1  ;;  %v10721_v61 = vld [vmem:[%s10465_s19 + $0xb0] sm:$0xff]  ;;  %v10724_v3 = vld [vmem:[%s10465_s19 + $0xb8] sm:$0xff] }
  0x5a   : > { %v1158_v44 = vrot.slane %v10694_v23, 2  ;;  %v1159_v31 = vrot.slane %v872_v12, 2  ;;  %v1323_v38 = vrot.slane %v10694_v23, 3  ;;  %v1324_v27 = vrot.slane %v872_v12, 3  ;;  %337 = vst.msk [vmem:[#allocation2 + $0x1a8] sm:$0xff] %vm145_vm1, %v10721_v61  ;;  %338 = vst.msk [vmem:[#allocation2 + $0x1b0] sm:$0xff] %vm145_vm1, %v10724_v3 }
  0x5b   : > { %9148 = vmatmul.mubr.msk.bf16.vlgmr.msra.gmra.mrb[0].mxu0 %vm145_vm1, %v1799_v19  ;;  %v1326_v30 = vrot.slane %v873_v16, 3  ;;  %v987_v53 = vsel %vm974_vm3, %v985_v28, %v986_v39  ;;  %v989_v54 = vsel %vm974_vm3, %v986_v39, %v988_v41  ;;  %v1111_v37 = vmax.f32 %v872_v12, %v988_v41  ;;  %v10727_v39 = vld [vmem:[#allocation2 + $0xe0] sm:$0xff] }
  0x5c   : > { %9180 = vmatpush3.bf16.msra.mxu0 %v10513_v35  ;;  %v1500_v57 = vrot.slane %v10694_v23, 4  ;;  %v1109_v18 = vmax.f32 %v870_v22, %v987_v53  ;;  %v1110_v56 = vmax.f32 %v10694_v23, %v989_v54  ;;  %v1160_v58 = vsel %vm1151_vm4, %v1158_v44, %v1159_v31  ;;  %v684_v35 = vld [vmem:[#allocation2 + $0xd8] sm:$0x3]  ;;  %v10735_v53 = vld [vmem:[#allocation2 + $0xe8] sm:$0xff] }
  0x5d   : > { %v1325_v59 = vsel %vm1312_vm5, %v1323_v38, %v1324_v27  ;;  %v1256_v1 = vmax.f32 %v1111_v37, %v1159_v31  ;;  %v1327_v15 = vsel %vm1312_vm5, %v1324_v27, %v1326_v30  ;;  %v1501_v19 = vrot.slane %v872_v12, 4  ;;  %v10737_v12 = vld [vmem:[#allocation2 + $0xf0] sm:$0xff]  ;;  %v813_v37 = vld [vmem:[#allocation2 + $0xf8] sm:$0x3] }
  0x5e   : > { %v1770_v60 = vld [vmem:[#allocation3 + $0x48] sm:$0xff]  ;;  %v1503_v28 = vrot.slane %v873_v16, 4  ;;  %v1254_v23 = vmax.f32 %v1109_v18, %v1158_v44  ;;  %v1255_v41 = vmax.f32 %v1110_v56, %v1160_v58  ;;  %v746_v31 = vmax.f32 %v10690_v21, %v10667_v25  ;;  %13493 = vst [vmem:[#allocation4_spill] sm:$0xff] %v10737_v12  ;;  %v10745_v21 = vld [vmem:[%s10465_s19 + $0xc0] sm:$0xff] }
  0x5f   : > { %v1771_v40 = vld [vmem:[#allocation3 + $0x50] sm:$0xff]  ;;  %v1449_v16 = vmax.f32 %v1256_v1, %v1327_v15  ;;  %v1502_v27 = vsel %vm1489_vm6, %v1500_v57, %v1501_v19  ;;  %v747_v54 = vmax.f32 %v618_v24, %v10669_v42  ;;  %v748_v56 = vmax.f32 %v619_v29, %v684_v35  ;;  %339 = vst.msk [vmem:[#allocation2 + $0x1c8] sm:$0xff] %vm145_vm1, %v10745_v21 }
  0x60   : > { %v1800_v22 = vpack.c.bf16 %v1771_v40, %v1770_v60  ;;  %v1504_v30 = vsel %vm1489_vm6, %v1501_v19, %v1503_v28  ;;  %v1447_v44 = vmax.f32 %v1254_v23, %v1323_v38  ;;  %v1448_v18 = vmax.f32 %v1255_v41, %v1325_v59  ;;  %v10748_v60 = vld [vmem:[%s10465_s19 + $0xc8] sm:$0xff]  ;;  %v10764_v23 = vld [vmem:[%s10465_s19 + $0xd0] sm:$0xff] }
  0x61   : > { %v874_v58 = vmax.f32 %v745_v43, %v10727_v39  ;;  %v1626_v40 = vmax.f32 %v1449_v16, %v1504_v30  ;;  %v10751_v1 = vmax.f32 %v746_v31, %v10735_v53  ;;  %v876_v24 = vmax.f32 %v747_v54, %v10737_v12  ;;  %340 = vst.msk [vmem:[#allocation2 + $0x1d0] sm:$0xff] %vm145_vm1, %v10748_v60 }
  0x62   : > { %9151 = vmatprep.mubr.msk.bf16.mxu0 %vm145_vm1, %v1800_v22  ;;  %v492_v15 = vmax.f32 %v10509_v33, %v10548_v62  ;;  %v1624_v29 = vmax.f32 %v1447_v44, %v1500_v57  ;;  %v1625_v43 = vmax.f32 %v1448_v18, %v1502_v27  ;;  %v877_v38 = vmax.f32 %v748_v56, %v813_v37  ;;  %v10767_v33 = vld [vmem:[%s10465_s19 + $0xd8] sm:$0xff] }
  0x63   : > { %v990_v59 = vrot.slane %v874_v58, 1  ;;  %1677 = vst.msk [vmem:[#allocation3 + $0x72] sm:$0x3f] %vm1670_vm7, %v1626_v40  ;;  %v991_v35 = vrot.slane %v10751_v1, 1  ;;  %v993_v19 = vrot.slane %v876_v24, 1  ;;  %v1161_v28 = vrot.slane %v10751_v1, 2 }
  0x64   : > { %v1162_v22 = vrot.slane %v876_v24, 2  ;;  %1675 = vst.msk [vmem:[#allocation3 + $0x62] sm:$0xc0] %vm1667_vm8, %v1624_v29  ;;  %v1328_v57 = vrot.slane %v10751_v1, 3  ;;  %v1329_v41 = vrot.slane %v876_v24, 3  ;;  %v1331_v31 = vrot.slane %v877_v38, 3 }
  0x65   : > { %1676 = vst.msk [vmem:[#allocation3 + $0x6a] sm:$0xff] %vm145_vm1, %v1625_v43  ;;  %341 = vst.msk [vmem:[#allocation2 + $0x1e8] sm:$0xff] %vm145_vm1, %v10764_v23  ;;  %v992_v27 = vsel %vm974_vm3, %v990_v59, %v991_v35  ;;  %v994_v30 = vsel %vm974_vm3, %v991_v35, %v993_v19  ;;  %v1114_v54 = vmax.f32 %v876_v24, %v993_v19  ;;  %v366_v44 = vld [vmem:[#allocation2 + $0x98] sm:$0x3]  ;;  %v1506_v16 = vrot.slane %v876_v24, 4  ;;  %v278_v35 = vld [vmem:[%s10465_s19 + $0xe0] sm:$0xff] }
  0x66   : > { %342 = vst.msk [vmem:[#allocation2 + $0x1f0] sm:$0xff] %vm145_vm1, %v10767_v33  ;;  %v1163_v37 = vsel %vm1151_vm4, %v1161_v28, %v1162_v22  ;;  %v431_v18 = vld [vmem:[#allocation2 + $0xb8] sm:$0x3]  ;;  %v1112_v56 = vmax.f32 %v874_v58, %v992_v27  ;;  %v1113_v40 = vmax.f32 %v10751_v1, %v994_v30  ;;  %v10782_v29 = vsel %vm1312_vm5, %v1328_v57, %v1329_v41  ;;  %v279_v19 = vld [vmem:[%s10465_s19 + $0xe8] sm:$0xff] }
  0x67   : > { %v1332_v43 = vsel %vm1312_vm5, %v1329_v41, %v1331_v31  ;;  %v1259_v2 = vmax.f32 %v1114_v54, %v1162_v22  ;;  %v1508_v12 = vrot.slane %v877_v38, 4  ;;  %v493_v59 = vmax.f32 %v10536_v48, %v10583_v45  ;;  %v559_v24 = vld [vmem:[#allocation2 + $0xd8] sm:$0x3]  ;;  %343 = vst.msk [vmem:[#allocation2 + $0x208] sm:$0xff] %vm145_vm1, %v278_v35  ;;  %344 = vst.msk [vmem:[#allocation2 + $0x210] sm:$0xff] %vm145_vm1, %v279_v19 }
  0x68   : > { %v1257_v58 = vmax.f32 %v1112_v56, %v1161_v28  ;;  %v10796_v27 = vmax.f32 %v1113_v40, %v1163_v37  ;;  %v494_v41 = vmax.f32 %v10538_v49, %v10585_v47  ;;  %v495_v22 = vmax.f32 %v366_v44, %v431_v18  ;;  %v10807_v54 = vld [vmem:[#allocation2 + $0xf8] sm:$0x3]  ;;  %v10809_v49 = vld [vmem:[#allocation2 + $0x100] sm:$0xff] }
  0x69   : > { %v1452_v48 = vmax.f32 %v1259_v2, %v1332_v43  ;;  %v13494_v38 = vrot.slane %v10751_v1, 4  ;;  %v1509_v28 = vsel %vm1489_vm6, %v1506_v16, %v1508_v12  ;;  %v620_v30 = vmax.f32 %v492_v15, %v10665_v55  ;;  %v10811_v37 = vld [vmem:[#allocation2 + $0xb8] sm:$0x3]  ;;  %v280_v15 = vld [vmem:[%s10465_s19 + $0xf0] sm:$0xff] }
  0x6a   : > { %v1450_v44 = vmax.f32 %v1257_v58, %v1328_v57  ;;  %v1451_v18 = vmax.f32 %v10796_v27, %v10782_v29  ;;  %v621_v2 = vmax.f32 %v493_v59, %v10667_v25  ;;  %v10817_v56 = vmax.f32 %v494_v41, %v10669_v42  ;;  %v10819_v12 = vld [vmem:[#allocation2 + $0xd8] sm:$0x3]  ;;  %v10824_v58 = vld [vmem:[#allocation2 + $0x108] sm:$0xff]  ;;  %345 = vst.msk [vmem:[#allocation2 + $0x228] sm:$0xff] %vm145_vm1, %v280_v15 }
  0x6b   : > { %v1507_v31 = vsel %vm1489_vm6, %v13494_v38, %v1506_v16  ;;  %v281_v16 = vld [vmem:[%s10465_s19 + $0xf8] sm:$0xff]  ;;  %v1629_v29 = vmax.f32 %v1452_v48, %v1509_v28  ;;  %v623_v43 = vmax.f32 %v495_v22, %v559_v24  ;;  %v749_v59 = vmax.f32 %v620_v30, %v10727_v39 }
  0x6c   : > { %v1772_v57 = vld [vmem:[#allocation3 + $0x68] sm:$0xff]  ;;  %v1773_v40 = vld [vmem:[#allocation3 + $0x70] sm:$0xff]  ;;  %v496_v27 = vmax.f32 %v10548_v62, %v10665_v55  ;;  %346 = vst.msk [vmem:[#allocation2 + $0x230] sm:$0xff] %vm145_vm1, %v281_v16  ;;  %282 = vst.msk [vmem:[%s10794_s22] sm:$0xff] %vm145_vm1, %v10468_v5 }
  0x6d   : > { %283 = vst.msk [vmem:[%s10794_s22 + $0x8] sm:$0xff] %vm145_vm1, %v10471_v6  ;;  %284 = vst.msk [vmem:[%s10794_s22 + $0x10] sm:$0xff] %vm145_vm1, %v10474_v7  ;;  %v1801_v5 = vpack.c.bf16 %v1773_v40, %v1772_v57  ;;  %v13495_v6 = vmov %v13494_v38  ;;  %v692_v30 = vld [vmem:[#allocation2 + $0x118] sm:$0x3] }
  0x6e   : > { %285 = vst.msk [vmem:[%s10794_s22 + $0x18] sm:$0xff] %vm145_vm1, %v10477_v8  ;;  %286 = vst.msk [vmem:[%s10794_s22 + $0x20] sm:$0xff] %vm145_vm1, %v10480_v9  ;;  %v1627_v7 = vmax.f32 %v1450_v44, %v13495_v6  ;;  %v1628_v8 = vmax.f32 %v1451_v18, %v1507_v31  ;;  %v750_v9 = vmax.f32 %v621_v2, %v10735_v53 }
  0x6f   : > { %287 = vst.msk [vmem:[%s10794_s22 + $0x28] sm:$0xff] %vm145_vm1, %v10483_v10  ;;  %288 = vst.msk [vmem:[%s10794_s22 + $0x30] sm:$0xff] %vm145_vm1, %v10498_v13  ;;  %v10925_v10 = vld [vmem:[#allocation2 + $0x110] sm:$0xff]  ;;  %v817_v13 = vld [vmem:[#allocation2 + $0x118] sm:$0x3]  ;;  %9152 = vmatmul.mubr.msk.bf16.gmra.mrb[4].mxu0 %vm145_vm1, %v1801_v5 }
  0x70   : > { %289 = vst.msk [vmem:[%s10794_s22 + $0x38] sm:$0xff] %vm145_vm1, %v10516_v36  ;;  %290 = vst.msk [vmem:[%s10794_s22 + $0x40] sm:$0xff] %vm145_vm1, %v10556_v4  ;;  %v13496_v36 = vld [vmem:[#allocation4_spill] sm:$0xff]  ;;  %v752_v4 = vmax.f32 %v623_v43, %v10807_v54  ;;  %v10959_v43 = vld [vmem:[#allocation2 + $0x130] sm:$0xff] }
  0x71   : > { %291 = vst.msk [vmem:[%s10794_s22 + $0x48] sm:$0xff] %vm145_vm1, %v10559_v11  ;;  %292 = vst.msk [vmem:[%s10794_s22 + $0x50] sm:$0xff] %vm145_vm1, %v10574_v26  ;;  %v751_v62 = vmax.f32 %v10817_v56, %v13496_v36  ;;  %v878_v11 = vmax.f32 %v749_v59, %v10809_v49  ;;  %v497_v26 = vmax.f32 %v10583_v45, %v10667_v25  ;;  %v10952_v54 = vld [vmem:[#allocation2 + $0x120] sm:$0xff]  ;;  %v821_v59 = vld [vmem:[#allocation2 + $0x138] sm:$0x3] }
  0x72   : > { %293 = vst.msk [vmem:[%s10794_s22 + $0x58] sm:$0xff] %vm145_vm1, %v10588_v50  ;;  %294 = vst.msk [vmem:[%s10794_s22 + $0x60] sm:$0xff] %vm145_vm1, %v10598_v63  ;;  %v879_v50 = vmax.f32 %v750_v9, %v10824_v58  ;;  %v498_v63 = vmax.f32 %v10585_v47, %v10669_v42 }
  0x73   : > { %295 = vst.msk [vmem:[%s10794_s22 + $0x68] sm:$0xff] %vm145_vm1, %v10601_v0  ;;  %296 = vst.msk [vmem:[%s10794_s22 + $0x70] sm:$0xff] %vm145_vm1, %v10618_v32  ;;  %v499_v0 = vmax.f32 %v10811_v37, %v10819_v12  ;;  %v624_v32 = vmax.f32 %v496_v27, %v10727_v39  ;;  %v995_v45 = vrot.slane %v878_v11, 1 }
  0x74   : > { %297 = vst.msk [vmem:[%s10794_s22 + $0x78] sm:$0xff] %vm145_vm1, %v10621_v34  ;;  %298 = vst.msk [vmem:[%s10794_s22 + $0x80] sm:$0xff] %vm145_vm1, %v10637_v17  ;;  %v880_v34 = vmax.f32 %v751_v62, %v10925_v10  ;;  %v881_v17 = vmax.f32 %v752_v4, %v817_v13  ;;  %v500_v62 = vmax.f32 %v10665_v55, %v10727_v39  ;;  %v8563_v55 = vld [vmem:[%s13459_s1 + $0x4] sm:$0x3] }
  0x75   : > { %299 = vst.msk [vmem:[%s10794_s22 + $0x88] sm:$0xff] %vm145_vm1, %v10643_v20  ;;  %300 = vst.msk [vmem:[%s10794_s22 + $0x90] sm:$0xff] %vm145_vm1, %v10660_v51  ;;  %v625_v20 = vmax.f32 %v497_v26, %v10735_v53  ;;  %v996_v51 = vrot.slane %v879_v50, 1  ;;  %v753_v40 = vmax.f32 %v624_v32, %v10809_v49  ;;  %10271 = vmatprep.subr.msk.bf16.mxu0 %vm1864_vm0, %v8563_v55 }
  0x76   : > { %301 = vst.msk [vmem:[%s10794_s22 + $0x98] sm:$0xff] %vm145_vm1, %v10663_v52  ;;  %302 = vst.msk [vmem:[%s10794_s22 + $0xa0] sm:$0xff] %vm145_vm1, %v10698_v14  ;;  %v1164_v52 = vrot.slane %v879_v50, 2  ;;  %v1333_v14 = vrot.slane %v879_v50, 3  ;;  %v1511_v1 = vrot.slane %v880_v34, 4 }
  0x77   : > { %303 = vst.msk [vmem:[%s10794_s22 + $0xa8] sm:$0xff] %vm145_vm1, %v10701_v46  ;;  %304 = vst.msk [vmem:[%s10794_s22 + $0xb0] sm:$0xff] %vm145_vm1, %v10721_v61  ;;  %v1510_v46 = vrot.slane %v879_v50, 4  ;;  %v998_v61 = vrot.slane %v880_v34, 1  ;;  %v997_v47 = vsel %vm974_vm3, %v995_v45, %v996_v51  ;;  %v882_v9 = vmax.f32 %v753_v40, %v10952_v54  ;;  %v825_v40 = vld [vmem:[#allocation2 + $0x158] sm:$0x3] }
  0x78   : > { %305 = vst.msk [vmem:[%s10794_s22 + $0xb8] sm:$0xff] %vm145_vm1, %v10724_v3  ;;  %306 = vst.msk [vmem:[%s10794_s22 + $0xc0] sm:$0xff] %vm145_vm1, %v10745_v21  ;;  %v1165_v3 = vrot.slane %v880_v34, 2  ;;  %v1334_v21 = vrot.slane %v880_v34, 3  ;;  %v1115_v41 = vmax.f32 %v878_v11, %v997_v47 }
  0x79   : > { %307 = vst.msk [vmem:[%s10794_s22 + $0xc8] sm:$0xff] %vm145_vm1, %v10748_v60  ;;  %308 = vst.msk [vmem:[%s10794_s22 + $0xd0] sm:$0xff] %vm145_vm1, %v10764_v23  ;;  %v1336_v60 = vrot.slane %v881_v17, 3  ;;  %v1513_v23 = vrot.slane %v881_v17, 4  ;;  %v1117_v22 = vmax.f32 %v880_v34, %v998_v61  ;;  %v1512_v28 = vsel %vm1489_vm6, %v1510_v46, %v1511_v1 }
  0x7a   : > { %309 = vst.msk [vmem:[%s10794_s22 + $0xd8] sm:$0xff] %vm145_vm1, %v10767_v33  ;;  %310 = vst.msk [vmem:[%s10794_s22 + $0xe0] sm:$0xff] %vm145_vm1, %v278_v35  ;;  %v563_v33 = vld [vmem:[#allocation2 + $0xf8] sm:$0x3]  ;;  %v626_v35 = vmax.f32 %v498_v63, %v13496_v36  ;;  %v1166_v24 = vsel %vm1151_vm4, %v1164_v52, %v1165_v3  ;;  %v1335_v38 = vsel %vm1312_vm5, %v1333_v14, %v1334_v21 }
  0x7b   : > { %311 = vst.msk [vmem:[%s10794_s22 + $0xe8] sm:$0xff] %vm145_vm1, %v279_v19  ;;  %312 = vst.msk [vmem:[%s10794_s22 + $0xf0] sm:$0xff] %vm145_vm1, %v280_v15  ;;  %v999_v19 = vsel %vm974_vm3, %v996_v51, %v998_v61  ;;  %v1337_v31 = vsel %vm1312_vm5, %v1334_v21, %v1336_v60  ;;  %v1260_v18 = vmax.f32 %v1115_v41, %v1164_v52  ;;  %v10955_v15 = vld [vmem:[#allocation2 + $0x128] sm:$0xff] }
  0x7c   : > { %313 = vst.msk [vmem:[%s10794_s22 + $0xf8] sm:$0xff] %vm145_vm1, %v281_v16  ;;  %1679 = vst.msk [vmem:[#allocation3 + $0x8a] sm:$0xff] %vm145_vm1, %v1628_v8  ;;  %v1116_v48 = vmax.f32 %v879_v50, %v999_v19  ;;  %v1262_v2 = vmax.f32 %v1117_v22, %v1165_v3  ;;  %v1514_v56 = vsel %vm1489_vm6, %v1511_v1, %v1513_v23  ;;  %v374_v1 = vld [vmem:[#allocation2 + $0xd8] sm:$0x3] }
  0x7d   : > { %1680 = vst.msk [vmem:[#allocation3 + $0x92] sm:$0x3f] %vm1670_vm7, %v1629_v29  ;;  %v627_v12 = vmax.f32 %v499_v0, %v563_v33  ;;  %v754_v29 = vmax.f32 %v625_v20, %v10824_v58  ;;  %v1453_v27 = vmax.f32 %v1260_v18, %v1333_v14  ;;  %v755_v6 = vmax.f32 %v626_v35, %v10925_v10  ;;  %v439_v23 = vld [vmem:[#allocation2 + $0xf8] sm:$0x3] }
  0x7e   : > { %1678 = vst.msk [vmem:[#allocation3 + $0x82] sm:$0xc0] %vm1667_vm8, %v1627_v7  ;;  %v1261_v57 = vmax.f32 %v1116_v48, %v1166_v24  ;;  %v1455_v5 = vmax.f32 %v1262_v2, %v1337_v31  ;;  %v1000_v0 = vrot.slane %v882_v9, 1  ;;  %v567_v31 = vld [vmem:[#allocation2 + $0x118] sm:$0x3] }
  0x7f   : > { %v756_v7 = vmax.f32 %v627_v12, %v692_v30  ;;  %v883_v13 = vmax.f32 %v754_v29, %v10955_v15  ;;  %v1630_v4 = vmax.f32 %v1453_v27, %v1510_v46  ;;  %v884_v26 = vmax.f32 %v755_v6, %v10959_v43  ;;  %v443_v6 = vld [vmem:[#allocation2 + $0x118] sm:$0x3] }
  0x80   : > { %v1454_v8 = vmax.f32 %v1261_v57, %v1335_v38  ;;  %v1632_v11 = vmax.f32 %v1455_v5, %v1514_v56  ;;  %v501_v38 = vmax.f32 %v10667_v25, %v10735_v53  ;;  %v502_v30 = vmax.f32 %v10669_v42, %v13496_v36  ;;  %v10988_v57 = vld [vmem:[#allocation2 + $0x140] sm:$0xff]  ;;  %v10992_v42 = vld [vmem:[#allocation2 + $0x148] sm:$0xff]  ;;  %v378_v5 = vld [vmem:[#allocation2 + $0xf8] sm:$0x3] }
  0x81   : > { %v885_v50 = vmax.f32 %v756_v7, %v821_v59  ;;  %v1001_v32 = vrot.slane %v883_v13, 1  ;;  %v1167_v34 = vrot.slane %v883_v13, 2  ;;  %1681 = vst.msk [vmem:[#allocation3 + $0xa2] sm:$0xc0] %vm1667_vm8, %v1630_v4  ;;  %v1003_v17 = vrot.slane %v884_v26, 1  ;;  %v10995_v4 = vld [vmem:[#allocation2 + $0x150] sm:$0xff] }
  0x82   : > { %v1631_v63 = vmax.f32 %v1454_v8, %v1512_v28  ;;  %1683 = vst.msk [vmem:[#allocation3 + $0xb2] sm:$0x3f] %vm1670_vm7, %v1632_v11  ;;  %v1168_v45 = vrot.slane %v884_v26, 2  ;;  %v1338_v20 = vrot.slane %v883_v13, 3  ;;  %v1339_v51 = vrot.slane %v884_v26, 3 }
  0x83   : > { %v1002_v52 = vsel %vm974_vm3, %v1000_v0, %v1001_v32  ;;  %v1341_v14 = vrot.slane %v885_v50, 3  ;;  %v1515_v46 = vrot.slane %v883_v13, 4  ;;  %v1516_v61 = vrot.slane %v884_v26, 4 }
  0x84   : > { %v1775_v44 = vld [vmem:[#allocation3 + $0x90] sm:$0xff]  ;;  %1682 = vst.msk [vmem:[#allocation3 + $0xaa] sm:$0xff] %vm145_vm1, %v1631_v63  ;;  %v1004_v3 = vsel %vm974_vm3, %v1001_v32, %v1003_v17  ;;  %v1118_v21 = vmax.f32 %v882_v9, %v1002_v52  ;;  %v1120_v60 = vmax.f32 %v884_v26, %v1003_v17  ;;  %v1169_v47 = vsel %vm1151_vm4, %v1167_v34, %v1168_v45 }
  0x85   : > { %v1774_v37 = vld [vmem:[#allocation3 + $0x88] sm:$0xff]  ;;  %v1119_v33 = vmax.f32 %v883_v13, %v1004_v3  ;;  %v1340_v35 = vsel %vm1312_vm5, %v1338_v20, %v1339_v51  ;;  %v1342_v19 = vsel %vm1312_vm5, %v1339_v51, %v1341_v14  ;;  %v1517_v41 = vsel %vm1489_vm6, %v1515_v46, %v1516_v61 }
  0x86   : > { %v1802_v16 = vpack.c.bf16 %v1775_v44, %v1774_v37  ;;  %v1263_v22 = vmax.f32 %v1118_v21, %v1167_v34  ;;  %v1265_v24 = vmax.f32 %v1120_v60, %v1168_v45  ;;  %v1518_v48 = vrot.slane %v885_v50, 4 }
  0x87   : > { %v1264_v28 = vmax.f32 %v1119_v33, %v1169_v47  ;;  %v503_v37 = vmax.f32 %v374_v1, %v439_v23  ;;  %v628_v44 = vmax.f32 %v500_v62, %v10809_v49  ;;  %v629_v12 = vmax.f32 %v501_v38, %v10824_v58 }
  0x88   : > { %9155 = vmatprep.mubr.msk.bf16.mxu0 %vm145_vm1, %v1802_v16  ;;  %v1456_v18 = vmax.f32 %v1263_v22, %v1338_v20  ;;  %v1458_v2 = vmax.f32 %v1265_v24, %v1342_v19  ;;  %v1519_v56 = vsel %vm1489_vm6, %v1516_v61, %v1518_v48  ;;  %v696_v16 = vld [vmem:[#allocation2 + $0x138] sm:$0x3]  ;;  %v630_v25 = vmax.f32 %v502_v30, %v10925_v10 }
  0x89   : > { %v1457_v29 = vmax.f32 %v1264_v28, %v1340_v35  ;;  %v631_v59 = vmax.f32 %v503_v37, %v567_v31  ;;  %v757_v27 = vmax.f32 %v628_v44, %v10952_v54  ;;  %v758_v62 = vmax.f32 %v629_v12, %v10955_v15  ;;  %v571_v22 = vld [vmem:[#allocation2 + $0x138] sm:$0x3] }
  0x8a   : > { %v1633_v9 = vmax.f32 %v1456_v18, %v1515_v46  ;;  %v1635_v13 = vmax.f32 %v1458_v2, %v1519_v56  ;;  %v504_v11 = vmax.f32 %v10727_v39, %v10809_v49  ;;  %v759_v63 = vmax.f32 %v630_v25, %v10959_v43  ;;  %v700_v18 = vld [vmem:[#allocation2 + $0x158] sm:$0x3]  ;;  %v11020_v2 = vld [vmem:[#allocation2 + $0x160] sm:$0xff] }
  0x8b   : > { %v1776_v7 = vld [vmem:[#allocation3 + $0xa8] sm:$0xff]  ;;  %v1777_v8 = vld [vmem:[#allocation3 + $0xb0] sm:$0xff]  ;;  %v1634_v50 = vmax.f32 %v1457_v29, %v1517_v41  ;;  %v760_v0 = vmax.f32 %v631_v59, %v696_v16  ;;  %v886_v32 = vmax.f32 %v757_v27, %v10988_v57  ;;  %v887_v34 = vmax.f32 %v758_v62, %v10992_v42 }
  0x8c   : > { %v1803_v26 = vpack.c.bf16 %v1777_v8, %v1776_v7  ;;  %1684 = vst.msk [vmem:[#allocation3 + $0xc2] sm:$0xc0] %vm1667_vm8, %v1633_v9  ;;  %v505_v17 = vmax.f32 %v10735_v53, %v10824_v58  ;;  %v506_v45 = vmax.f32 %v13496_v36, %v10925_v10  ;;  %v888_v39 = vmax.f32 %v759_v63, %v10995_v4  ;;  %v11024_v59 = vld [vmem:[#allocation2 + $0x168] sm:$0xff]  ;;  %v11027_v8 = vld [vmem:[#allocation2 + $0x170] sm:$0xff]  ;;  %v829_v9 = vld [vmem:[#allocation2 + $0x178] sm:$0x3] }
  0x8d   : > { %1686 = vst.msk [vmem:[#allocation3 + $0xd2] sm:$0x3f] %vm1670_vm7, %v1635_v13  ;;  %v889_v20 = vmax.f32 %v760_v0, %v825_v40  ;;  %v507_v51 = vmax.f32 %v378_v5, %v443_v6  ;;  %v632_v55 = vmax.f32 %v504_v11, %v10952_v54  ;;  %v1005_v52 = vrot.slane %v886_v32, 1 }
  0x8e   : > { %9156 = vmatmul.mubr.msk.bf16.gmra.mrb[8].mxu0 %vm145_vm1, %v1803_v26  ;;  %1685 = vst.msk [vmem:[#allocation3 + $0xca] sm:$0xff] %vm145_vm1, %v1634_v50  ;;  %v1006_v14 = vrot.slane %v887_v34, 1  ;;  %v1170_v46 = vrot.slane %v887_v34, 2  ;;  %v1343_v61 = vrot.slane %v887_v34, 3  ;;  %v1008_v3 = vrot.slane %v888_v39, 1 }
  0x8f   : > { %v1171_v21 = vrot.slane %v888_v39, 2  ;;  %v1344_v53 = vrot.slane %v888_v39, 3  ;;  %v1346_v60 = vrot.slane %v889_v20, 3  ;;  %v1520_v47 = vrot.slane %v887_v34, 4 }
  0x90   : > { %v1007_v36 = vsel %vm974_vm3, %v1005_v52, %v1006_v14  ;;  %v1521_v1 = vrot.slane %v888_v39, 4  ;;  %v1523_v23 = vrot.slane %v889_v20, 4  ;;  %v1009_v33 = vsel %vm974_vm3, %v1006_v14, %v1008_v3 }
  0x91   : > { %v1121_v35 = vmax.f32 %v886_v32, %v1007_v36  ;;  %v1123_v19 = vmax.f32 %v888_v39, %v1008_v3  ;;  %v1172_v41 = vsel %vm1151_vm4, %v1170_v46, %v1171_v21  ;;  %v1122_v24 = vmax.f32 %v887_v34, %v1009_v33  ;;  %v382_v33 = vld [vmem:[#allocation2 + $0x118] sm:$0x3] }
  0x92   : > { %v1345_v48 = vsel %vm1312_vm5, %v1343_v61, %v1344_v53  ;;  %v1347_v38 = vsel %vm1312_vm5, %v1344_v53, %v1346_v60  ;;  %v1522_v31 = vsel %vm1489_vm6, %v1520_v47, %v1521_v1  ;;  %v1524_v37 = vsel %vm1489_vm6, %v1521_v1, %v1523_v23 }
  0x93   : > { %v1266_v28 = vmax.f32 %v1121_v35, %v1170_v46  ;;  %v1268_v30 = vmax.f32 %v1123_v19, %v1171_v21  ;;  %v633_v44 = vmax.f32 %v505_v17, %v10955_v15  ;;  %v1267_v16 = vmax.f32 %v1122_v24, %v1172_v41  ;;  %v447_v35 = vld [vmem:[#allocation2 + $0x138] sm:$0x3] }
  0x94   : > { %v634_v40 = vmax.f32 %v506_v45, %v10959_v43  ;;  %v635_v29 = vmax.f32 %v507_v51, %v571_v22  ;;  %v761_v25 = vmax.f32 %v632_v55, %v10988_v57  ;;  %v508_v32 = vmax.f32 %v10809_v49, %v10952_v54 }
  0x95   : > { %v1778_v56 = vld [vmem:[#allocation3 + $0xc8] sm:$0xff]  ;;  %v1779_v12 = vld [vmem:[#allocation3 + $0xd0] sm:$0xff]  ;;  %v1459_v5 = vmax.f32 %v1266_v28, %v1343_v61  ;;  %v1461_v6 = vmax.f32 %v1268_v30, %v1347_v38  ;;  %v762_v7 = vmax.f32 %v633_v44, %v10992_v42  ;;  %v1460_v13 = vmax.f32 %v1267_v16, %v1345_v48  ;;  %v575_v28 = vld [vmem:[#allocation2 + $0x158] sm:$0x3] }
  0x96   : > { %v1804_v27 = vpack.c.bf16 %v1779_v12, %v1778_v56  ;;  %v763_v62 = vmax.f32 %v634_v40, %v10995_v4  ;;  %v764_v11 = vmax.f32 %v635_v29, %v700_v18  ;;  %v890_v26 = vmax.f32 %v761_v25, %v11020_v2  ;;  %v704_v56 = vld [vmem:[#allocation2 + $0x178] sm:$0x3]  ;;  %v11052_v12 = vld [vmem:[#allocation2 + $0x180] sm:$0xff]  ;;  %v11055_v25 = vld [vmem:[#allocation2 + $0x188] sm:$0xff] }
  0x97   : > { %v1636_v50 = vmax.f32 %v1459_v5, %v1520_v47  ;;  %v1638_v63 = vmax.f32 %v1461_v6, %v1524_v37  ;;  %v891_v0 = vmax.f32 %v762_v7, %v11024_v59  ;;  %v1637_v34 = vmax.f32 %v1460_v13, %v1522_v31  ;;  %v451_v5 = vld [vmem:[#allocation2 + $0x158] sm:$0x3] }
  0x98   : > { %9159 = vmatprep.mubr.msk.bf16.mxu0 %vm145_vm1, %v1804_v27  ;;  %v892_v17 = vmax.f32 %v763_v62, %v11027_v8  ;;  %v893_v45 = vmax.f32 %v764_v11, %v829_v9  ;;  %v1010_v39 = vrot.slane %v890_v26, 1  ;;  %v509_v60 = vmax.f32 %v10824_v58, %v10955_v15  ;;  %v386_v27 = vld [vmem:[#allocation2 + $0x138] sm:$0x3] }
  0x99   : > { %1687 = vst.msk [vmem:[#allocation3 + $0xe2] sm:$0xc0] %vm1667_vm8, %v1636_v50  ;;  %v1011_v20 = vrot.slane %v891_v0, 1  ;;  %v1173_v51 = vrot.slane %v891_v0, 2  ;;  %v1348_v55 = vrot.slane %v891_v0, 3  ;;  %v1525_v52 = vrot.slane %v891_v0, 4 }
  0x9a   : > { %1689 = vst.msk [vmem:[#allocation3 + $0xf2] sm:$0x3f] %vm1670_vm7, %v1638_v63  ;;  %v1013_v14 = vrot.slane %v892_v17, 1  ;;  %v1174_v46 = vrot.slane %v892_v17, 2  ;;  %v1349_v61 = vrot.slane %v892_v17, 3  ;;  %v1351_v3 = vrot.slane %v893_v45, 3 }
  0x9b   : > { %1688 = vst.msk [vmem:[#allocation3 + $0xea] sm:$0xff] %vm145_vm1, %v1637_v34  ;;  %v1012_v49 = vsel %vm974_vm3, %v1010_v39, %v1011_v20  ;;  %v1526_v21 = vrot.slane %v892_v17, 4  ;;  %v1528_v53 = vrot.slane %v893_v45, 4  ;;  %v510_v58 = vmax.f32 %v10925_v10, %v10959_v43  ;;  %v833_v34 = vld [vmem:[#allocation2 + $0x198] sm:$0x3] }
  0x9c   : > { %v1014_v36 = vsel %vm974_vm3, %v1011_v20, %v1013_v14  ;;  %v1124_v47 = vmax.f32 %v890_v26, %v1012_v49  ;;  %v1126_v1 = vmax.f32 %v892_v17, %v1013_v14  ;;  %v1175_v23 = vsel %vm1151_vm4, %v1173_v51, %v1174_v46  ;;  %v11061_v26 = vld [vmem:[#allocation2 + $0x190] sm:$0xff] }
  0x9d   : > { %v1125_v19 = vmax.f32 %v891_v0, %v1014_v36  ;;  %v1350_v41 = vsel %vm1312_vm5, %v1348_v55, %v1349_v61  ;;  %v1352_v22 = vsel %vm1312_vm5, %v1349_v61, %v1351_v3  ;;  %v1527_v24 = vsel %vm1489_vm6, %v1525_v52, %v1526_v21 }
  0x9e   : > { %v1269_v48 = vmax.f32 %v1124_v47, %v1173_v51  ;;  %v1271_v38 = vmax.f32 %v1126_v1, %v1174_v46  ;;  %v1529_v31 = vsel %vm1489_vm6, %v1526_v21, %v1528_v53  ;;  %v511_v37 = vmax.f32 %v382_v33, %v447_v35 }
  0x9f   : > { %v1270_v30 = vmax.f32 %v1125_v19, %v1175_v23  ;;  %v636_v44 = vmax.f32 %v508_v32, %v10988_v57  ;;  %v637_v18 = vmax.f32 %v509_v60, %v10992_v42  ;;  %v638_v29 = vmax.f32 %v510_v58, %v10995_v4  ;;  %v579_v19 = vld [vmem:[#allocation2 + $0x178] sm:$0x3] }
  0xa0   : > { %v1462_v16 = vmax.f32 %v1269_v48, %v1348_v55  ;;  %v1464_v40 = vmax.f32 %v1271_v38, %v1352_v22  ;;  %v512_v10 = vmax.f32 %v10952_v54, %v10988_v57  ;;  %v639_v13 = vmax.f32 %v511_v37, %v575_v28 }
  0xa1   : > { %v1463_v9 = vmax.f32 %v1270_v30, %v1350_v41  ;;  %v765_v62 = vmax.f32 %v636_v44, %v11020_v2  ;;  %v766_v11 = vmax.f32 %v637_v18, %v11024_v59  ;;  %v767_v32 = vmax.f32 %v638_v29, %v11027_v8 }
  0xa2   : > { %v1780_v6 = vld [vmem:[#allocation3 + $0xe8] sm:$0xff]  ;;  %v1781_v7 = vld [vmem:[#allocation3 + $0xf0] sm:$0xff]  ;;  %v1639_v63 = vmax.f32 %v1462_v16, %v1525_v52  ;;  %v1641_v0 = vmax.f32 %v1464_v40, %v1529_v31  ;;  %v768_v45 = vmax.f32 %v639_v13, %v704_v56  ;;  %v513_v51 = vmax.f32 %v10955_v15, %v10992_v42  ;;  %v708_v56 = vld [vmem:[#allocation2 + $0x198] sm:$0x3] }
  0xa3   : > { %v1805_v50 = vpack.c.bf16 %v1781_v7, %v1780_v6  ;;  %v1640_v17 = vmax.f32 %v1463_v9, %v1527_v24  ;;  %v894_v54 = vmax.f32 %v765_v62, %v11052_v12  ;;  %v895_v39 = vmax.f32 %v766_v11, %v11055_v25  ;;  %v11084_v16 = vld [vmem:[#allocation2 + $0x1a0] sm:$0xff]  ;;  %v11086_v40 = vld [vmem:[#allocation2 + $0x1a8] sm:$0xff] }
  0xa4   : > { %1690 = vst.msk [vmem:[#allocation3 + $0x102] sm:$0xc0] %vm1667_vm8, %v1639_v63  ;;  %v896_v20 = vmax.f32 %v767_v32, %v11061_v26  ;;  %v514_v55 = vmax.f32 %v10959_v43, %v10995_v4  ;;  %v515_v52 = vmax.f32 %v386_v27, %v451_v5  ;;  %v897_v14 = vmax.f32 %v768_v45, %v833_v34  ;;  %v837_v63 = vld [vmem:[#allocation2 + $0x1b8] sm:$0x3] }
  0xa5   : > { %9160 = vmatmul.mubr.msk.bf16.gmra.mrb[12].mxu0 %vm145_vm1, %v1805_v50  ;;  %1692 = vst.msk [vmem:[#allocation3 + $0x112] sm:$0x3f] %vm1670_vm7, %v1641_v0  ;;  %v1015_v46 = vrot.slane %v894_v54, 1  ;;  %v1016_v61 = vrot.slane %v895_v39, 1  ;;  %v1176_v3 = vrot.slane %v895_v39, 2  ;;  %v1353_v53 = vrot.slane %v895_v39, 3 }
  0xa6   : > { %1691 = vst.msk [vmem:[#allocation3 + $0x10a] sm:$0xff] %vm145_vm1, %v1640_v17  ;;  %v1018_v49 = vrot.slane %v896_v20, 1  ;;  %v1177_v21 = vrot.slane %v896_v20, 2  ;;  %v1354_v60 = vrot.slane %v896_v20, 3  ;;  %v1356_v47 = vrot.slane %v897_v14, 3 }
  0xa7   : > { %v1017_v36 = vsel %vm974_vm3, %v1015_v46, %v1016_v61  ;;  %v1530_v1 = vrot.slane %v895_v39, 4  ;;  %v1531_v23 = vrot.slane %v896_v20, 4  ;;  %v1533_v58 = vrot.slane %v897_v14, 4 }
  0xa8   : > { %v1019_v15 = vsel %vm974_vm3, %v1016_v61, %v1018_v49  ;;  %v1127_v33 = vmax.f32 %v894_v54, %v1017_v36  ;;  %v1129_v43 = vmax.f32 %v896_v20, %v1018_v49  ;;  %v1178_v35 = vsel %vm1151_vm4, %v1176_v3, %v1177_v21 }
  0xa9   : > { %v1128_v41 = vmax.f32 %v895_v39, %v1019_v15  ;;  %v1355_v22 = vsel %vm1312_vm5, %v1353_v53, %v1354_v60  ;;  %v1357_v24 = vsel %vm1312_vm5, %v1354_v60, %v1356_v47  ;;  %v1532_v48 = vsel %vm1489_vm6, %v1530_v1, %v1531_v23  ;;  %v455_v47 = vld [vmem:[#allocation2 + $0x178] sm:$0x3] }
  0xaa   : > { %v1272_v38 = vmax.f32 %v1127_v33, %v1176_v3  ;;  %v1274_v31 = vmax.f32 %v1129_v43, %v1177_v21  ;;  %v640_v28 = vmax.f32 %v512_v10, %v11020_v2  ;;  %v641_v37 = vmax.f32 %v513_v51, %v11024_v59  ;;  %v11090_v10 = vld [vmem:[#allocation2 + $0x1b0] sm:$0xff]  ;;  %v390_v21 = vld [vmem:[#allocation2 + $0x158] sm:$0x3] }
  0xab   : > { %v1273_v30 = vmax.f32 %v1128_v41, %v1178_v35  ;;  %v642_v44 = vmax.f32 %v514_v55, %v11027_v8  ;;  %v643_v18 = vmax.f32 %v515_v52, %v579_v19  ;;  %v1534_v7 = vsel %vm1489_vm6, %v1531_v23, %v1533_v58 }
  0xac   : > { %v1465_v5 = vmax.f32 %v1272_v38, %v1353_v53  ;;  %v1467_v6 = vmax.f32 %v1274_v31, %v1357_v24  ;;  %v769_v9 = vmax.f32 %v640_v28, %v11052_v12  ;;  %v770_v11 = vmax.f32 %v641_v37, %v11055_v25 }
  0xad   : > { %v1782_v29 = vld [vmem:[#allocation3 + $0x108] sm:$0xff]  ;;  %v1783_v27 = vld [vmem:[#allocation3 + $0x110] sm:$0xff]  ;;  %v1466_v62 = vmax.f32 %v1273_v30, %v1355_v22  ;;  %v771_v50 = vmax.f32 %v642_v44, %v11061_v26  ;;  %v772_v34 = vmax.f32 %v643_v18, %v708_v56  ;;  %v516_v20 = vmax.f32 %v10988_v57, %v11020_v2  ;;  %v712_v56 = vld [vmem:[#allocation2 + $0x1b8] sm:$0x3] }
  0xae   : > { %v1806_v13 = vpack.c.bf16 %v1783_v27, %v1782_v29  ;;  %v1642_v0 = vmax.f32 %v1465_v5, %v1530_v1  ;;  %v1644_v32 = vmax.f32 %v1467_v6, %v1534_v7  ;;  %v898_v17 = vmax.f32 %v769_v9, %v11084_v16  ;;  %v11117_v29 = vld [vmem:[#allocation2 + $0x1c0] sm:$0xff]  ;;  %v11119_v27 = vld [vmem:[#allocation2 + $0x1c8] sm:$0xff] }
  0xaf   : > { %v1643_v45 = vmax.f32 %v1466_v62, %v1532_v48  ;;  %v899_v54 = vmax.f32 %v770_v11, %v11086_v40  ;;  %v900_v39 = vmax.f32 %v771_v50, %v11090_v10  ;;  %v901_v51 = vmax.f32 %v772_v34, %v837_v63  ;;  %v583_v48 = vld [vmem:[#allocation2 + $0x198] sm:$0x3]  ;;  %v11122_v11 = vld [vmem:[#allocation2 + $0x1d0] sm:$0xff] }
  0xb0   : > { %9163 = vmatprep.mubr.msk.bf16.mxu0 %vm145_vm1, %v1806_v13  ;;  %1693 = vst.msk [vmem:[#allocation3 + $0x122] sm:$0xc0] %vm1667_vm8, %v1642_v0  ;;  %v1020_v55 = vrot.slane %v898_v17, 1  ;;  %v517_v52 = vmax.f32 %v10992_v42, %v11024_v59  ;;  %v518_v14 = vmax.f32 %v10995_v4, %v11027_v8  ;;  %v519_v24 = vmax.f32 %v390_v21, %v455_v47  ;;  %v841_v34 = vld [vmem:[#allocation2 + $0x1d8] sm:$0x3] }
  0xb1   : > { %1695 = vst.msk [vmem:[#allocation3 + $0x132] sm:$0x3f] %vm1670_vm7, %v1644_v32  ;;  %v1021_v46 = vrot.slane %v899_v54, 1  ;;  %v1023_v61 = vrot.slane %v900_v39, 1  ;;  %v1179_v3 = vrot.slane %v899_v54, 2  ;;  %v1180_v49 = vrot.slane %v900_v39, 2 }
  0xb2   : > { %1694 = vst.msk [vmem:[#allocation3 + $0x12a] sm:$0xff] %vm145_vm1, %v1643_v45  ;;  %v1358_v57 = vrot.slane %v899_v54, 3  ;;  %v1359_v53 = vrot.slane %v900_v39, 3  ;;  %v1361_v60 = vrot.slane %v901_v51, 3  ;;  %v1535_v36 = vrot.slane %v899_v54, 4 }
  0xb3   : > { %v1022_v1 = vsel %vm974_vm3, %v1020_v55, %v1021_v46  ;;  %v1024_v23 = vsel %vm974_vm3, %v1021_v46, %v1023_v61  ;;  %v1132_v42 = vmax.f32 %v900_v39, %v1023_v61  ;;  %v1181_v15 = vsel %vm1151_vm4, %v1179_v3, %v1180_v49  ;;  %v459_v45 = vld [vmem:[#allocation2 + $0x198] sm:$0x3] }
  0xb4   : > { %v1130_v4 = vmax.f32 %v898_v17, %v1022_v1  ;;  %v1131_v33 = vmax.f32 %v899_v54, %v1024_v23  ;;  %v1360_v43 = vsel %vm1312_vm5, %v1358_v57, %v1359_v53  ;;  %v1362_v35 = vsel %vm1312_vm5, %v1359_v53, %v1361_v60  ;;  %v394_v17 = vld [vmem:[#allocation2 + $0x178] sm:$0x3] }
  0xb5   : > { %v1277_v19 = vmax.f32 %v1132_v42, %v1180_v49  ;;  %v1536_v41 = vrot.slane %v900_v39, 4  ;;  %v1538_v22 = vrot.slane %v901_v51, 4  ;;  %v644_v58 = vmax.f32 %v516_v20, %v11052_v12 }
  0xb6   : > { %v1275_v38 = vmax.f32 %v1130_v4, %v1179_v3  ;;  %v1276_v31 = vmax.f32 %v1131_v33, %v1181_v15  ;;  %v645_v28 = vmax.f32 %v517_v52, %v11055_v25  ;;  %v646_v18 = vmax.f32 %v518_v14, %v11061_v26 }
  0xb7   : > { %v1470_v30 = vmax.f32 %v1277_v19, %v1362_v35  ;;  %v1537_v37 = vsel %vm1489_vm6, %v1535_v36, %v1536_v41  ;;  %v1539_v44 = vsel %vm1489_vm6, %v1536_v41, %v1538_v22  ;;  %v647_v13 = vmax.f32 %v519_v24, %v583_v48  ;;  %v587_v19 = vld [vmem:[#allocation2 + $0x1b8] sm:$0x3] }
  0xb8   : > { %v1468_v7 = vmax.f32 %v1275_v38, %v1358_v57  ;;  %v1469_v9 = vmax.f32 %v1276_v31, %v1360_v43  ;;  %v773_v62 = vmax.f32 %v644_v58, %v11084_v16  ;;  %v774_v0 = vmax.f32 %v645_v28, %v11086_v40 }
  0xb9   : > { %v1784_v5 = vld [vmem:[#allocation3 + $0x128] sm:$0xff]  ;;  %v1785_v6 = vld [vmem:[#allocation3 + $0x130] sm:$0xff]  ;;  %v1647_v63 = vmax.f32 %v1470_v30, %v1539_v44  ;;  %v775_v32 = vmax.f32 %v646_v18, %v11090_v10  ;;  %v776_v20 = vmax.f32 %v647_v13, %v712_v56  ;;  %v520_v14 = vmax.f32 %v11020_v2, %v11052_v12  ;;  %v716_v30 = vld [vmem:[#allocation2 + $0x1d8] sm:$0x3] }
  0xba   : > { %v1807_v50 = vpack.c.bf16 %v1785_v6, %v1784_v5  ;;  %v1645_v54 = vmax.f32 %v1468_v7, %v1535_v36  ;;  %v1646_v39 = vmax.f32 %v1469_v9, %v1537_v37  ;;  %v902_v51 = vmax.f32 %v773_v62, %v11117_v29  ;;  %v11149_v7 = vld [vmem:[#allocation2 + $0x1e0] sm:$0xff] }
  0xbb   : > { %1698 = vst.msk [vmem:[#allocation3 + $0x152] sm:$0x3f] %vm1670_vm7, %v1647_v63  ;;  %v903_v55 = vmax.f32 %v774_v0, %v11119_v27  ;;  %v904_v52 = vmax.f32 %v775_v32, %v11122_v11  ;;  %v521_v46 = vmax.f32 %v11024_v59, %v11055_v25  ;;  %v905_v61 = vmax.f32 %v776_v20, %v841_v34  ;;  %v11152_v63 = vld [vmem:[#allocation2 + $0x1e8] sm:$0xff]  ;;  %v11154_v0 = vld [vmem:[#allocation2 + $0x1f0] sm:$0xff]  ;;  %v845_v32 = vld [vmem:[#allocation2 + $0x1f8] sm:$0x3] }
  0xbc   : > { %9164 = vmatmul.mubr.msk.bf16.gmra.mrb[16].mxu0 %vm145_vm1, %v1807_v50  ;;  %1696 = vst.msk [vmem:[#allocation3 + $0x142] sm:$0xc0] %vm1667_vm8, %v1645_v54  ;;  %v1025_v3 = vrot.slane %v902_v51, 1  ;;  %v522_v49 = vmax.f32 %v11027_v8, %v11061_v26  ;;  %v523_v21 = vmax.f32 %v394_v17, %v459_v45  ;;  %v648_v48 = vmax.f32 %v520_v14, %v11084_v16  ;;  %v463_v20 = vld [vmem:[#allocation2 + $0x1b8] sm:$0x3] }
  0xbd   : > { %1697 = vst.msk [vmem:[#allocation3 + $0x14a] sm:$0xff] %vm145_vm1, %v1646_v39  ;;  %v1026_v57 = vrot.slane %v903_v55, 1  ;;  %v1028_v53 = vrot.slane %v904_v52, 1  ;;  %v1182_v60 = vrot.slane %v903_v55, 2  ;;  %v1183_v36 = vrot.slane %v904_v52, 2 }
  0xbe   : > { %v1363_v47 = vrot.slane %v903_v55, 3  ;;  %v1364_v1 = vrot.slane %v904_v52, 3  ;;  %v1366_v2 = vrot.slane %v905_v61, 3  ;;  %v1540_v23 = vrot.slane %v903_v55, 4  ;;  %v398_v39 = vld [vmem:[#allocation2 + $0x198] sm:$0x3] }
  0xbf   : > { %v1027_v59 = vsel %vm974_vm3, %v1025_v3, %v1026_v57  ;;  %v1029_v42 = vsel %vm974_vm3, %v1026_v57, %v1028_v53  ;;  %v1135_v15 = vmax.f32 %v904_v52, %v1028_v53  ;;  %v1184_v4 = vsel %vm1151_vm4, %v1182_v60, %v1183_v36 }
  0xc0   : > { %v1133_v33 = vmax.f32 %v902_v51, %v1027_v59  ;;  %v1134_v43 = vmax.f32 %v903_v55, %v1029_v42  ;;  %v1365_v8 = vsel %vm1312_vm5, %v1363_v47, %v1364_v1  ;;  %v1367_v35 = vsel %vm1312_vm5, %v1364_v1, %v1366_v2 }
  0xc1   : > { %v1280_v41 = vmax.f32 %v1135_v15, %v1183_v36  ;;  %v1541_v22 = vrot.slane %v904_v52, 4  ;;  %v1543_v24 = vrot.slane %v905_v61, 4  ;;  %v649_v58 = vmax.f32 %v521_v46, %v11086_v40 }
  0xc2   : > { %v1278_v38 = vmax.f32 %v1133_v33, %v1182_v60  ;;  %v1279_v31 = vmax.f32 %v1134_v43, %v1184_v4  ;;  %v650_v28 = vmax.f32 %v522_v49, %v11090_v10  ;;  %v651_v6 = vmax.f32 %v523_v21, %v587_v19  ;;  %v591_v43 = vld [vmem:[#allocation2 + $0x1d8] sm:$0x3] }
  0xc3   : > { %v1473_v18 = vmax.f32 %v1280_v41, %v1367_v35  ;;  %v1542_v56 = vsel %vm1489_vm6, %v1540_v23, %v1541_v22  ;;  %v1544_v5 = vsel %vm1489_vm6, %v1541_v22, %v1543_v24  ;;  %v777_v50 = vmax.f32 %v648_v48, %v11117_v29 }
  0xc4   : > { %v1786_v37 = vld [vmem:[#allocation3 + $0x148] sm:$0xff]  ;;  %v1787_v44 = vld [vmem:[#allocation3 + $0x150] sm:$0xff]  ;;  %v1471_v13 = vmax.f32 %v1278_v38, %v1363_v47  ;;  %v1472_v62 = vmax.f32 %v1279_v31, %v1365_v8  ;;  %v778_v17 = vmax.f32 %v649_v58, %v11119_v27  ;;  %v779_v45 = vmax.f32 %v650_v28, %v11122_v11 }
  0xc5   : > { %v1808_v9 = vpack.c.bf16 %v1787_v44, %v1786_v37  ;;  %v1650_v34 = vmax.f32 %v1473_v18, %v1544_v5  ;;  %v780_v54 = vmax.f32 %v651_v6, %v716_v30  ;;  %v906_v52 = vmax.f32 %v777_v50, %v11149_v7  ;;  %v720_v30 = vld [vmem:[#allocation2 + $0x1f8] sm:$0x3]  ;;  %v11179_v37 = vld [vmem:[#allocation2 + $0x200] sm:$0xff] }
  0xc6   : > { %v1648_v51 = vmax.f32 %v1471_v13, %v1540_v23  ;;  %v1649_v55 = vmax.f32 %v1472_v62, %v1542_v56  ;;  %v524_v14 = vmax.f32 %v11052_v12, %v11084_v16  ;;  %v907_v46 = vmax.f32 %v778_v17, %v11152_v63  ;;  %v11184_v13 = vld [vmem:[#allocation2 + $0x208] sm:$0xff]  ;;  %v11187_v17 = vld [vmem:[#allocation2 + $0x210] sm:$0xff] }
  0xc7   : > { %9167 = vmatprep.mubr.msk.bf16.mxu0 %vm145_vm1, %v1808_v9  ;;  %1701 = vst.msk [vmem:[#allocation3 + $0x172] sm:$0x3f] %vm1670_vm7, %v1650_v34  ;;  %v908_v61 = vmax.f32 %v779_v45, %v11154_v0  ;;  %v909_v3 = vmax.f32 %v780_v54, %v845_v32  ;;  %v525_v49 = vmax.f32 %v11055_v25, %v11086_v40  ;;  %v1030_v21 = vrot.slane %v906_v52, 1  ;;  %v849_v45 = vld [vmem:[#allocation2 + $0x218] sm:$0x3] }
  0xc8   : > { %1699 = vst.msk [vmem:[#allocation3 + $0x162] sm:$0xc0] %vm1667_vm8, %v1648_v51  ;;  %v526_v57 = vmax.f32 %v11061_v26, %v11090_v10  ;;  %v527_v53 = vmax.f32 %v398_v39, %v463_v20  ;;  %v652_v12 = vmax.f32 %v524_v14, %v11117_v29  ;;  %v1031_v60 = vrot.slane %v907_v46, 1 }
  0xc9   : > { %1700 = vst.msk [vmem:[#allocation3 + $0x16a] sm:$0xff] %vm145_vm1, %v1649_v55  ;;  %v1033_v36 = vrot.slane %v908_v61, 1  ;;  %v1185_v47 = vrot.slane %v907_v46, 2  ;;  %v1186_v1 = vrot.slane %v908_v61, 2  ;;  %v1368_v2 = vrot.slane %v907_v46, 3 }
  0xca   : > { %v1369_v23 = vrot.slane %v908_v61, 3  ;;  %v1371_v59 = vrot.slane %v909_v3, 3  ;;  %v1545_v42 = vrot.slane %v907_v46, 4  ;;  %v1032_v25 = vsel %vm974_vm3, %v1030_v21, %v1031_v60 }
  0xcb   : > { %v1034_v15 = vsel %vm974_vm3, %v1031_v60, %v1033_v36  ;;  %v1138_v4 = vmax.f32 %v908_v61, %v1033_v36  ;;  %v1187_v33 = vsel %vm1151_vm4, %v1185_v47, %v1186_v1  ;;  %v1136_v26 = vmax.f32 %v906_v52, %v1032_v25  ;;  %v467_v25 = vld [vmem:[#allocation2 + $0x1d8] sm:$0x3] }
  0xcc   : > { %v1137_v8 = vmax.f32 %v907_v46, %v1034_v15  ;;  %v1370_v35 = vsel %vm1312_vm5, %v1368_v2, %v1369_v23  ;;  %v1372_v19 = vsel %vm1312_vm5, %v1369_v23, %v1371_v59  ;;  %v1546_v22 = vrot.slane %v908_v61, 4 }
  0xcd   : > { %v1283_v41 = vmax.f32 %v1138_v4, %v1186_v1  ;;  %v1548_v24 = vrot.slane %v909_v3, 4  ;;  %v653_v48 = vmax.f32 %v525_v49, %v11119_v27  ;;  %v1281_v38 = vmax.f32 %v1136_v26, %v1185_v47 }
  0xce   : > { %v1282_v31 = vmax.f32 %v1137_v8, %v1187_v33  ;;  %v654_v58 = vmax.f32 %v526_v57, %v11122_v11  ;;  %v655_v28 = vmax.f32 %v527_v53, %v591_v43  ;;  %v1547_v5 = vsel %vm1489_vm6, %v1545_v42, %v1546_v22 }
  0xcf   : > { %v1476_v56 = vmax.f32 %v1283_v41, %v1372_v19  ;;  %v1549_v6 = vsel %vm1489_vm6, %v1546_v22, %v1548_v24  ;;  %v781_v9 = vmax.f32 %v652_v12, %v11149_v7  ;;  %v1474_v50 = vmax.f32 %v1281_v38, %v1368_v2  ;;  %v595_v41 = vld [vmem:[#allocation2 + $0x1f8] sm:$0x3] }
  0xd0   : > { %v1788_v44 = vld [vmem:[#allocation3 + $0x168] sm:$0xff]  ;;  %v1789_v18 = vld [vmem:[#allocation3 + $0x170] sm:$0xff]  ;;  %v1475_v32 = vmax.f32 %v1282_v31, %v1370_v35  ;;  %v782_v34 = vmax.f32 %v653_v48, %v11152_v63  ;;  %v783_v39 = vmax.f32 %v654_v58, %v11154_v0  ;;  %v784_v20 = vmax.f32 %v655_v28, %v720_v30  ;;  %v724_v30 = vld [vmem:[#allocation2 + $0x218] sm:$0x3] }
  0xd1   : > { %v1809_v62 = vpack.c.bf16 %v1789_v18, %v1788_v44  ;;  %v1653_v54 = vmax.f32 %v1476_v56, %v1549_v6  ;;  %v910_v51 = vmax.f32 %v781_v9, %v11179_v37  ;;  %v1651_v55 = vmax.f32 %v1474_v50, %v1545_v42  ;;  %v402_v42 = vld [vmem:[#allocation2 + $0x1b8] sm:$0x3]  ;;  %v11213_v44 = vld [vmem:[#allocation2 + $0x220] sm:$0xff]  ;;  %v11215_v50 = vld [vmem:[#allocation2 + $0x228] sm:$0xff] }
  0xd2   : > { %v1652_v52 = vmax.f32 %v1475_v32, %v1547_v5  ;;  %v911_v14 = vmax.f32 %v782_v34, %v11184_v13  ;;  %v528_v46 = vmax.f32 %v11084_v16, %v11117_v29  ;;  %v912_v61 = vmax.f32 %v783_v39, %v11187_v17  ;;  %v853_v18 = vld [vmem:[#allocation2 + $0x238] sm:$0x3] }
  0xd3   : > { %9168 = vmatmul.mubr.msk.bf16.gmra.mrb[20].mxu0 %vm145_vm1, %v1809_v62  ;;  %1704 = vst.msk [vmem:[#allocation3 + $0x192] sm:$0x3f] %vm1670_vm7, %v1653_v54  ;;  %v913_v3 = vmax.f32 %v784_v20, %v849_v45  ;;  %v1035_v49 = vrot.slane %v910_v51, 1  ;;  %v529_v21 = vmax.f32 %v11086_v40, %v11119_v27  ;;  %v530_v40 = vmax.f32 %v11090_v10, %v11122_v11  ;;  %v11221_v20 = vld [vmem:[#allocation2 + $0x230] sm:$0xff] }
  0xd4   : > { %1702 = vst.msk [vmem:[#allocation3 + $0x182] sm:$0xc0] %vm1667_vm8, %v1651_v55  ;;  %v1036_v57 = vrot.slane %v911_v14, 1  ;;  %v1188_v53 = vrot.slane %v911_v14, 2  ;;  %v1373_v12 = vrot.slane %v911_v14, 3  ;;  %v1550_v60 = vrot.slane %v911_v14, 4 }
  0xd5   : > { %1703 = vst.msk [vmem:[#allocation3 + $0x18a] sm:$0xff] %vm145_vm1, %v1652_v52  ;;  %v1038_v36 = vrot.slane %v912_v61, 1  ;;  %v1189_v47 = vrot.slane %v912_v61, 2  ;;  %v1374_v16 = vrot.slane %v912_v61, 3  ;;  %v1376_v1 = vrot.slane %v913_v3, 3 }
  0xd6   : > { %v1037_v2 = vsel %vm974_vm3, %v1035_v49, %v1036_v57  ;;  %v1551_v23 = vrot.slane %v912_v61, 4  ;;  %v1553_v59 = vrot.slane %v913_v3, 4  ;;  %v531_v38 = vmax.f32 %v402_v42, %v467_v25  ;;  %v471_v55 = vld [vmem:[#allocation2 + $0x1f8] sm:$0x3] }
  0xd7   : > { %v1039_v15 = vsel %vm974_vm3, %v1036_v57, %v1038_v36  ;;  %v1139_v4 = vmax.f32 %v910_v51, %v1037_v2  ;;  %v1141_v33 = vmax.f32 %v912_v61, %v1038_v36  ;;  %v1190_v43 = vsel %vm1151_vm4, %v1188_v53, %v1189_v47  ;;  %v406_v51 = vld [vmem:[#allocation2 + $0x1d8] sm:$0x3] }
  0xd8   : > { %v1140_v26 = vmax.f32 %v911_v14, %v1039_v15  ;;  %v1375_v8 = vsel %vm1312_vm5, %v1373_v12, %v1374_v16  ;;  %v1377_v35 = vsel %vm1312_vm5, %v1374_v16, %v1376_v1  ;;  %v1552_v19 = vsel %vm1489_vm6, %v1550_v60, %v1551_v23 }
  0xd9   : > { %v1284_v22 = vmax.f32 %v1139_v4, %v1188_v53  ;;  %v1286_v24 = vmax.f32 %v1141_v33, %v1189_v47  ;;  %v1554_v48 = vsel %vm1489_vm6, %v1551_v23, %v1553_v59  ;;  %v656_v31 = vmax.f32 %v528_v46, %v11149_v7  ;;  %v599_v4 = vld [vmem:[#allocation2 + $0x218] sm:$0x3] }
  0xda   : > { %v1285_v10 = vmax.f32 %v1140_v26, %v1190_v43  ;;  %v657_v58 = vmax.f32 %v529_v21, %v11152_v63  ;;  %v658_v28 = vmax.f32 %v530_v40, %v11154_v0  ;;  %v659_v62 = vmax.f32 %v531_v38, %v595_v41 }
  0xdb   : > { %v1477_v6 = vmax.f32 %v1284_v22, %v1373_v12  ;;  %v1479_v9 = vmax.f32 %v1286_v24, %v1377_v35  ;;  %v532_v32 = vmax.f32 %v11117_v29, %v11149_v7  ;;  %v785_v54 = vmax.f32 %v656_v31, %v11179_v37  ;;  %v11244_v31 = vld [vmem:[#allocation2 + $0x240] sm:$0xff] }
  0xdc   : > { %v1790_v56 = vld [vmem:[#allocation3 + $0x188] sm:$0xff]  ;;  %v1791_v5 = vld [vmem:[#allocation3 + $0x190] sm:$0xff]  ;;  %v1478_v45 = vmax.f32 %v1285_v10, %v1375_v8  ;;  %v786_v39 = vmax.f32 %v657_v58, %v11184_v13  ;;  %v787_v46 = vmax.f32 %v658_v28, %v11187_v17  ;;  %v788_v61 = vmax.f32 %v659_v62, %v724_v30  ;;  %v728_v10 = vld [vmem:[#allocation2 + $0x238] sm:$0x3] }
  0xdd   : > { %v1810_v34 = vpack.c.bf16 %v1791_v5, %v1790_v56  ;;  %v1654_v52 = vmax.f32 %v1477_v6, %v1550_v60  ;;  %v1656_v14 = vmax.f32 %v1479_v9, %v1554_v48  ;;  %v914_v29 = vmax.f32 %v785_v54, %v11213_v44  ;;  %v11246_v58 = vld [vmem:[#allocation2 + $0x248] sm:$0xff]  ;;  %v11250_v9 = vld [vmem:[#allocation2 + $0x250] sm:$0xff]  ;;  %v857_v54 = vld [vmem:[#allocation2 + $0x258] sm:$0x3] }
  0xde   : > { %v1655_v3 = vmax.f32 %v1478_v45, %v1552_v19  ;;  %v915_v7 = vmax.f32 %v786_v39, %v11215_v50  ;;  %v533_v49 = vmax.f32 %v11119_v27, %v11152_v63  ;;  %v916_v21 = vmax.f32 %v787_v46, %v11221_v20 }
  0xdf   : > { %9171 = vmatprep.mubr.msk.bf16.mxu0 %vm145_vm1, %v1810_v34  ;;  %1705 = vst.msk [vmem:[#allocation3 + $0x1a2] sm:$0xc0] %vm1667_vm8, %v1654_v52  ;;  %v917_v57 = vmax.f32 %v788_v61, %v853_v18  ;;  %v534_v53 = vmax.f32 %v11122_v11, %v11154_v0  ;;  %v535_v12 = vmax.f32 %v406_v51, %v471_v55  ;;  %v1040_v60 = vrot.slane %v914_v29, 1 }
  0xe0   : > { %1707 = vst.msk [vmem:[#allocation3 + $0x1b2] sm:$0x3f] %vm1670_vm7, %v1656_v14  ;;  %v1041_v36 = vrot.slane %v915_v7, 1  ;;  %v1191_v47 = vrot.slane %v915_v7, 2  ;;  %v1378_v16 = vrot.slane %v915_v7, 3  ;;  %v1043_v1 = vrot.slane %v916_v21, 1 }
  0xe1   : > { %1706 = vst.msk [vmem:[#allocation3 + $0x1aa] sm:$0xff] %vm145_vm1, %v1655_v3  ;;  %v1192_v2 = vrot.slane %v916_v21, 2  ;;  %v1379_v27 = vrot.slane %v916_v21, 3  ;;  %v1381_v63 = vrot.slane %v917_v57, 3  ;;  %v1555_v59 = vrot.slane %v915_v7, 4 }
  0xe2   : > { %v1042_v23 = vsel %vm974_vm3, %v1040_v60, %v1041_v36  ;;  %v1556_v42 = vrot.slane %v916_v21, 4  ;;  %v1558_v25 = vrot.slane %v917_v57, 4  ;;  %v1044_v40 = vsel %vm974_vm3, %v1041_v36, %v1043_v1 }
  0xe3   : > { %v1142_v15 = vmax.f32 %v914_v29, %v1042_v23  ;;  %v1144_v11 = vmax.f32 %v916_v21, %v1043_v1  ;;  %v1193_v0 = vsel %vm1151_vm4, %v1191_v47, %v1192_v2  ;;  %v1143_v33 = vmax.f32 %v915_v7, %v1044_v40 }
  0xe4   : > { %v1380_v43 = vsel %vm1312_vm5, %v1378_v16, %v1379_v27  ;;  %v1382_v26 = vsel %vm1312_vm5, %v1379_v27, %v1381_v63  ;;  %v1559_v19 = vsel %vm1489_vm6, %v1556_v42, %v1558_v25  ;;  %v660_v41 = vmax.f32 %v532_v32, %v11179_v37 }
  0xe5   : > { %v1287_v8 = vmax.f32 %v1142_v15, %v1191_v47  ;;  %v1289_v35 = vmax.f32 %v1144_v11, %v1192_v2  ;;  %v1288_v22 = vmax.f32 %v1143_v33, %v1193_v0  ;;  %v661_v24 = vmax.f32 %v533_v49, %v11184_v13 }
  0xe6   : > { %v662_v48 = vmax.f32 %v534_v53, %v11187_v17  ;;  %v663_v38 = vmax.f32 %v535_v12, %v599_v4  ;;  %v1557_v5 = vsel %vm1489_vm6, %v1555_v59, %v1556_v42  ;;  %v789_v6 = vmax.f32 %v660_v41, %v11213_v44 }
  0xe7   : > { %v1480_v18 = vmax.f32 %v1287_v8, %v1378_v16  ;;  %v1482_v56 = vmax.f32 %v1289_v35, %v1382_v26  ;;  %v1481_v32 = vmax.f32 %v1288_v22, %v1380_v43  ;;  %v790_v34 = vmax.f32 %v661_v24, %v11215_v50 }
  0xe8   : > { %v1792_v28 = vld [vmem:[#allocation3 + $0x1a8] sm:$0xff]  ;;  %v1793_v30 = vld [vmem:[#allocation3 + $0x1b0] sm:$0xff]  ;;  %v791_v45 = vmax.f32 %v662_v48, %v11221_v20  ;;  %v792_v55 = vmax.f32 %v663_v38, %v728_v10  ;;  %v918_v52 = vmax.f32 %v789_v6, %v11244_v31  ;;  %v13497_v48 = vmov 0.0  }
  0xe9   : > { %v1811_v62 = vpack.c.bf16 %v1793_v30, %v1792_v28  ;;  %v1657_v39 = vmax.f32 %v1480_v18, %v1555_v59  ;;  %v1659_v51 = vmax.f32 %v1482_v56, %v1559_v19  ;;  %v1658_v14 = vmax.f32 %v1481_v32, %v1557_v5  ;;  %208 = vst.msk [vmem:[#allocation3 + $0x18] sm:$0x1] %vm207_vm9, %v13497_v48  ;;  %v1717_v38 = vld [vmem:[#allocation3 + $0x7] sm:$0xff]  ;;  %v1718_v10 = vld [vmem:[#allocation3 + $0xf] sm:$0xff] }
  0xea   : > { %v919_v46 = vmax.f32 %v790_v34, %v11246_v58  ;;  %v920_v61 = vmax.f32 %v791_v45, %v11250_v9  ;;  %v921_v3 = vmax.f32 %v792_v55, %v857_v54  ;;  %v1045_v29 = vrot.slane %v918_v52, 1  ;;  %213 = vst.msk [vmem:[#allocation3 + $0x238] sm:$0x1] %vm207_vm9, %v13497_v48  ;;  %233 = vst.msk [vmem:[#allocation3 + $0x38] sm:$0x1] %vm207_vm9, %v13497_v48  ;;  %v1719_v5 = vld [vmem:[#allocation3 + $0x27] sm:$0xff] }
  0xeb   : > { %9172 = vmatmul.mubr.msk.bf16.gmra.mrb[24].mxu0 %vm145_vm1, %v1811_v62  ;;  %1708 = vst.msk [vmem:[#allocation3 + $0x1c2] sm:$0xc0] %vm1667_vm8, %v1657_v39  ;;  %v1749_v18 = vpack.c.bf16 %v1718_v10, %v1717_v38  ;;  %v1720_v6 = vld [vmem:[#allocation3 + $0x2f] sm:$0xff]  ;;  %v1721_v62 = vld [vmem:[#allocation3 + $0x47] sm:$0xff]  ;;  %v10297_v54 = vld [vmem:[%s13459_s1 + $0x4] sm:$0x3] }
  0xec   : > { %1710 = vst.msk [vmem:[#allocation3 + $0x1d2] sm:$0x3f] %vm1670_vm7, %v1659_v51  ;;  %v1046_v7 = vrot.slane %v919_v46, 1  ;;  %v1048_v49 = vrot.slane %v920_v61, 1  ;;  %v1194_v21 = vrot.slane %v919_v46, 2  ;;  %v1195_v57 = vrot.slane %v920_v61, 2 }
  0xed   : > { %1709 = vst.msk [vmem:[#allocation3 + $0x1ca] sm:$0xff] %vm145_vm1, %v1658_v14  ;;  %v1383_v53 = vrot.slane %v919_v46, 3  ;;  %v1384_v12 = vrot.slane %v920_v61, 3  ;;  %v1386_v60 = vrot.slane %v921_v3, 3  ;;  %v1560_v36 = vrot.slane %v919_v46, 4  ;;  %v1722_v32 = vld [vmem:[#allocation3 + $0x4f] sm:$0xff] }
  0xee   : > { %v1047_v47 = vsel %vm974_vm3, %v1045_v29, %v1046_v7  ;;  %v1049_v16 = vsel %vm974_vm3, %v1046_v7, %v1048_v49  ;;  %v1147_v1 = vmax.f32 %v920_v61, %v1048_v49  ;;  %v1196_v2 = vsel %vm1151_vm4, %v1194_v21, %v1195_v57  ;;  %234 = vst.msk [vmem:[#allocation3 + $0x58] sm:$0x1] %vm207_vm9, %v13497_v48  ;;  %v11331_v51 = vld [vmem:[%s13459_s1 + $0x6] sm:$0x3]  ;;  %v1728_v7 = vld [vmem:[#allocation3 + $0xaf] sm:$0xff] }
  0xef   : > { %v1145_v27 = vmax.f32 %v918_v52, %v1047_v47  ;;  %v1146_v63 = vmax.f32 %v919_v46, %v1049_v16  ;;  %v1387_v23 = vsel %vm1312_vm5, %v1384_v12, %v1386_v60  ;;  %v1385_v42 = vsel %vm1312_vm5, %v1383_v53, %v1384_v12  ;;  %235 = vst.msk [vmem:[#allocation3 + $0x78] sm:$0x1] %vm207_vm9, %v13497_v48  ;;  %v1723_v55 = vld [vmem:[#allocation3 + $0x67] sm:$0xff]  ;;  %v1724_v52 = vld [vmem:[#allocation3 + $0x6f] sm:$0xff] }
  0xf0   : > { %v1292_v59 = vmax.f32 %v1147_v1, %v1195_v57  ;;  %v1561_v25 = vrot.slane %v920_v61, 4  ;;  %v1563_v40 = vrot.slane %v921_v3, 4  ;;  %236 = vst.msk [vmem:[#allocation3 + $0x98] sm:$0x1] %vm207_vm9, %v13497_v48  ;;  %237 = vst.msk [vmem:[#allocation3 + $0xb8] sm:$0x1] %vm207_vm9, %v13497_v48  ;;  %v11320_v34 = vpack.c.bf16 %v1720_v6, %v1719_v5 }
  0xf1   : > { %v1290_v15 = vmax.f32 %v1145_v27, %v1194_v21  ;;  %v1291_v11 = vmax.f32 %v1146_v63, %v1196_v2  ;;  %238 = vst.msk [vmem:[#allocation3 + $0xd8] sm:$0x1] %vm207_vm9, %v13497_v48  ;;  %239 = vst.msk [vmem:[#allocation3 + $0xf8] sm:$0x1] %vm207_vm9, %v13497_v48  ;;  %v11322_v45 = vpack.c.bf16 %v1722_v32, %v1721_v62  ;;  %v2340_v39 = vsel %vm1864_vm0, %v10297_v54, 0  ;;  %v1725_v14 = vld [vmem:[#allocation3 + $0x87] sm:$0xff] }
  0xf2   : > { %v1485_v0 = vmax.f32 %v1292_v59, %v1387_v23  ;;  %v1562_v4 = vsel %vm1489_vm6, %v1560_v36, %v1561_v25  ;;  %v1564_v33 = vsel %vm1489_vm6, %v1561_v25, %v1563_v40  ;;  %240 = vst.msk [vmem:[#allocation3 + $0x118] sm:$0x1] %vm207_vm9, %v13497_v48  ;;  %241 = vst.msk [vmem:[#allocation3 + $0x138] sm:$0x1] %vm207_vm9, %v13497_v48  ;;  %v1726_v46 = vld [vmem:[#allocation3 + $0x8f] sm:$0xff]  ;;  %v1727_v29 = vld [vmem:[#allocation3 + $0xa7] sm:$0xff] }
  0xf3   : > { %v1483_v8 = vmax.f32 %v1290_v15, %v1383_v53  ;;  %v1484_v35 = vmax.f32 %v1291_v11, %v1385_v42  ;;  %242 = vst.msk [vmem:[#allocation3 + $0x158] sm:$0x1] %vm207_vm9, %v13497_v48  ;;  %243 = vst.msk [vmem:[#allocation3 + $0x178] sm:$0x1] %vm207_vm9, %v13497_v48  ;;  %v11339_v61 = vpack.c.bf16 %v1724_v52, %v1723_v55  ;;  %v1729_v49 = vld [vmem:[#allocation3 + $0xc7] sm:$0xff]  ;;  %v1730_v21 = vld [vmem:[#allocation3 + $0xcf] sm:$0xff] }
  0xf4   : > { %v1794_v43 = vld [vmem:[#allocation3 + $0x1c8] sm:$0xff]  ;;  %v1795_v26 = vld [vmem:[#allocation3 + $0x1d0] sm:$0xff]  ;;  %v1662_v41 = vmax.f32 %v1485_v0, %v1564_v33  ;;  %244 = vst.msk [vmem:[#allocation3 + $0x198] sm:$0x1] %vm207_vm9, %v13497_v48  ;;  %245 = vst.msk [vmem:[#allocation3 + $0x1b8] sm:$0x1] %vm207_vm9, %v13497_v48  ;;  %v11341_v3 = vpack.c.bf16 %v1726_v46, %v1725_v14  ;;  %v11347_v57 = vpack.c.bf16 %v1728_v7, %v1727_v29 }
  0xf5   : > { %v11268_v19 = vpack.c.bf16 %v1795_v26, %v1794_v43  ;;  %v1660_v22 = vmax.f32 %v1483_v8, %v1560_v36  ;;  %v1661_v24 = vmax.f32 %v1484_v35, %v1562_v4  ;;  %246 = vst.msk [vmem:[#allocation3 + $0x1d8] sm:$0x1] %vm207_vm9, %v13497_v48  ;;  %247 = vst.msk [vmem:[#allocation3 + $0x1f8] sm:$0x1] %vm207_vm9, %v13497_v48  ;;  %v1731_v12 = vld [vmem:[#allocation3 + $0xe7] sm:$0xff]  ;;  %v1732_v60 = vld [vmem:[#allocation3 + $0xef] sm:$0xff] }
  0xf6   : > { %1713 = vst.msk [vmem:[#allocation3 + $0x1f2] sm:$0x3f] %vm1670_vm7, %v1662_v41  ;;  %v11349_v53 = vpack.c.bf16 %v1730_v21, %v1729_v49  ;;  %v1733_v36 = vld [vmem:[#allocation3 + $0x107] sm:$0xff]  ;;  %v1734_v47 = vld [vmem:[#allocation3 + $0x10f] sm:$0xff]  ;;  %v11355_v16 = vpack.c.bf16 %v1732_v60, %v1731_v12  ;;  %v410_v8 = vld [vmem:[#allocation2 + $0x1f8] sm:$0x3] }
  0xf7   : > { %9175 = vmatprep.mubr.msk.bf16.mxu0 %vm145_vm1, %v11268_v19  ;;  %1711 = vst.msk [vmem:[#allocation3 + $0x1e2] sm:$0xc0] %vm1667_vm8, %v1660_v22  ;;  %v11357_v1 = vpack.c.bf16 %v1734_v47, %v1733_v36  ;;  %v1735_v2 = vld [vmem:[#allocation3 + $0x127] sm:$0xff]  ;;  %v1736_v27 = vld [vmem:[#allocation3 + $0x12f] sm:$0xff]  ;;  %v475_v35 = vld [vmem:[#allocation2 + $0x218] sm:$0x3] }
  0xf8   : > { %1712 = vst.msk [vmem:[#allocation3 + $0x1ea] sm:$0xff] %vm145_vm1, %v1661_v24  ;;  %v1737_v63 = vld [vmem:[#allocation3 + $0x147] sm:$0xff]  ;;  %v1738_v23 = vld [vmem:[#allocation3 + $0x14f] sm:$0xff]  ;;  %v11366_v0 = vpack.c.bf16 %v1736_v27, %v1735_v2  ;;  %v539_v24 = vmax.f32 %v410_v8, %v475_v35  ;;  %v861_v54 = vld [vmem:[#allocation2 + $0x278] sm:$0x3] }
  0xf9   : > { %248 = vst.msk [vmem:[#allocation3 + $0x218] sm:$0x1] %vm207_vm9, %v13497_v48  ;;  %232 = vst.msk [vmem:[#allocation3 + $0x18] sm:$0x1] %vm207_vm9, %v13497_v48  ;;  %v407_v59 = vld [vmem:[#allocation2 + $0x1e0] sm:$0xff]  ;;  %v408_v42 = vld [vmem:[#allocation2 + $0x1e8] sm:$0xff]  ;;  %v11368_v4 = vpack.c.bf16 %v1738_v23, %v1737_v63 }
  0xfa   : > { %249 = vst.msk [vmem:[#allocation3 + $0x238] sm:$0x1] %vm207_vm9, %v13497_v48  ;;  %v409_v25 = vld [vmem:[#allocation2 + $0x1f0] sm:$0xff]  ;;  %v536_v40 = vmax.f32 %v407_v59, %v11179_v37  ;;  %v537_v15 = vmax.f32 %v408_v42, %v11184_v13  ;;  %v1739_v41 = vld [vmem:[#allocation3 + $0x167] sm:$0xff]  ;;  %v603_v48 = vld [vmem:[#allocation2 + $0x238] sm:$0x3] }
  0xfb   : > { %v538_v11 = vmax.f32 %v409_v25, %v11187_v17  ;;  %v1740_v22 = vld [vmem:[#allocation3 + $0x16f] sm:$0xff]  ;;  %v667_v10 = vmax.f32 %v539_v24, %v603_v48  ;;  %v1743_v63 = vld [vmem:[#allocation3 + $0x1a7] sm:$0xff] }
  0xfc   : > { %v664_v33 = vmax.f32 %v536_v40, %v11213_v44  ;;  %v665_v43 = vmax.f32 %v537_v15, %v11215_v50  ;;  %v858_v44 = vld [vmem:[#allocation2 + $0x260] sm:$0xff]  ;;  %v859_v38 = vld [vmem:[#allocation2 + $0x268] sm:$0xff]  ;;  %v11380_v62 = vpack.c.bf16 %v1740_v22, %v1739_v41 }
  0xfd   : > { %v666_v26 = vmax.f32 %v538_v11, %v11221_v20  ;;  %v1741_v50 = vld [vmem:[#allocation3 + $0x187] sm:$0xff]  ;;  %v1742_v20 = vld [vmem:[#allocation3 + $0x18f] sm:$0xff] }
  0xfe   : > { %v793_v37 = vmax.f32 %v664_v33, %v11244_v31  ;;  %v794_v13 = vmax.f32 %v665_v43, %v11246_v58  ;;  %v732_v31 = vld [vmem:[#allocation2 + $0x258] sm:$0x3]  ;;  %v11382_v32 = vpack.c.bf16 %v1742_v20, %v1741_v50  ;;  %v1744_v23 = vld [vmem:[#allocation3 + $0x1af] sm:$0xff]  ;;  %v1745_v15 = vld [vmem:[#allocation3 + $0x1c7] sm:$0xff] }
  0xff   : > { %v1796_v28 = vld [vmem:[#allocation3 + $0x1e8] sm:$0xff]  ;;  %v1797_v30 = vld [vmem:[#allocation3 + $0x1f0] sm:$0xff]  ;;  %v795_v17 = vmax.f32 %v666_v26, %v11250_v9  ;;  %v796_v58 = vmax.f32 %v667_v10, %v732_v31  ;;  %v11394_v22 = vpack.c.bf16 %v1744_v23, %v1743_v63 }
 0x100   : > { %v11315_v56 = vpack.c.bf16 %v1797_v30, %v1796_v28  ;;  %v860_v28 = vld [vmem:[#allocation2 + $0x270] sm:$0xff]  ;;  %v922_v30 = vmax.f32 %v793_v37, %v858_v44  ;;  %v1747_v44 = vld [vmem:[#allocation3 + $0x1e7] sm:$0xff] }
 0x101   : > { %v924_v5 = vmax.f32 %v795_v17, %v860_v28  ;;  %v925_v55 = vmax.f32 %v796_v58, %v861_v54  ;;  %v1746_v11 = vld [vmem:[#allocation3 + $0x1cf] sm:$0xff]  ;;  %v8597_v54 = vld [vmem:[%s13459_s1 + $0x8] sm:$0x3] }
 0x102   : > { %9176 = vmatmul.mubr.msk.bf16.gmra.mrb[28].mxu0 %vm145_vm1, %v11315_v56  ;;  %v1050_v6 = vrot.slane %v922_v30, 1  ;;  %v2241_v50 = vld [vmem:[#allocation3 + $0x9] sm:$0xff]  ;;  %v2242_v20 = vld [vmem:[#allocation3 + $0x11] sm:$0xff] }
 0x103   : > { %9181 = vmatprep.mubr.msk.bf16.mxu0 %vm145_vm1, %v1749_v18  ;;  %v923_v18 = vmax.f32 %v794_v13, %v859_v38  ;;  %v1198_v46 = vrot.slane %v924_v5, 2  ;;  %v1389_v36 = vrot.slane %v924_v5, 3  ;;  %v1391_v27 = vrot.slane %v925_v55, 3  ;;  %v1748_v38 = vld [vmem:[#allocation3 + $0x1ef] sm:$0xff] }
 0x104   : > { %v1566_v40 = vrot.slane %v924_v5, 4  ;;  %v1568_v26 = vrot.slane %v925_v55, 4  ;;  %v11397_v13 = vpack.c.bf16 %v1746_v11, %v1745_v15  ;;  %v11406_v10 = vpack.c.bf16 %v1748_v38, %v1747_v44  ;;  %v2245_v31 = vld [vmem:[#allocation3 + $0x49] sm:$0xff]  ;;  %v2248_v55 = vld [vmem:[#allocation3 + $0x71] sm:$0xff] }
 0x105   : > { %v1051_v9 = vrot.slane %v923_v18, 1  ;;  %v1197_v14 = vrot.slane %v923_v18, 2  ;;  %v1388_v60 = vrot.slane %v923_v18, 3  ;;  %v1565_v25 = vrot.slane %v923_v18, 4 }
 0x106   : > { %v1392_v33 = vsel %vm1312_vm5, %v1389_v36, %v1391_v27  ;;  %v1569_v24 = vsel %vm1489_vm6, %v1566_v40, %v1568_v26  ;;  %v2273_v28 = vpack.c.bf16 %v2242_v20, %v2241_v50  ;;  %v2258_v27 = vld [vmem:[#allocation3 + $0x111] sm:$0xff]  ;;  %v2265_v26 = vld [vmem:[#allocation3 + $0x189] sm:$0xff] }
 0x107   : > { %v1052_v52 = vsel %vm974_vm3, %v1050_v6, %v1051_v9  ;;  %v1199_v12 = vsel %vm1151_vm4, %v1197_v14, %v1198_v46  ;;  %v1390_v42 = vsel %vm1312_vm5, %v1388_v60, %v1389_v36  ;;  %v1567_v41 = vsel %vm1489_vm6, %v1565_v25, %v1566_v40  ;;  %v2255_v36 = vld [vmem:[#allocation3 + $0xe9] sm:$0xff]  ;;  %v2262_v40 = vld [vmem:[#allocation3 + $0x151] sm:$0xff] }
 0x108   : > { %v1148_v7 = vmax.f32 %v922_v30, %v1052_v52  ;;  %v2243_v30 = vld [vmem:[#allocation3 + $0x29] sm:$0xff]  ;;  %v2272_v20 = vld [vmem:[#allocation3 + $0x1f1] sm:$0xff] }
 0x109   : > { %v2249_v52 = vld [vmem:[#allocation3 + $0x89] sm:$0xff] }
 0x10a   : > { %9182 = vmatmul.mubr.msk.bf16.vlgmr.msra.gmra.mrb[0].mxu0 %vm145_vm1, %v11320_v34  ;;  %v1293_v47 = vmax.f32 %v1148_v7, %v1197_v14  ;;  %v2250_v14 = vld [vmem:[#allocation3 + $0x91] sm:$0xff]  ;;  %v2271_v50 = vld [vmem:[#allocation3 + $0x1e9] sm:$0xff] }
 0x10b   : > { %9214 = vmatpush3.bf16.msra.mxu0 %v2340_v39  ;;  %9185 = vmatprep.mubr.msk.bf16.mxu0 %vm145_vm1, %v11322_v45  ;;  %v1053_v39 = vrot.slane %v924_v5, 1  ;;  %v2252_v7 = vld [vmem:[#allocation3 + $0xb1] sm:$0xff] }
 0x10c   : > { %10272 = vmatprep.subr.msk.bf16.mxu0 %vm1864_vm0, %v11331_v51  ;;  %v1486_v43 = vmax.f32 %v1293_v47, %v1388_v60  ;;  %v2256_v47 = vld [vmem:[#allocation3 + $0xf1] sm:$0xff] }
 0x10d   : > { %v1054_v29 = vsel %vm974_vm3, %v1051_v9, %v1053_v39  ;;  %v1150_v49 = vmax.f32 %v924_v5, %v1053_v39  ;;  %v2246_v5 = vld [vmem:[#allocation3 + $0x51] sm:$0xff]  ;;  %v2634_v9 = vsel %vm1864_vm0, %v11331_v51, 0  ;;  %v2247_v39 = vld [vmem:[#allocation3 + $0x69] sm:$0xff]  ;;  %v11427_v51 = vpack.c.bf16 %v2250_v14, %v2249_v52 }
 0x10e   : > { %v1149_v21 = vmax.f32 %v923_v18, %v1054_v29  ;;  %v1663_v37 = vmax.f32 %v1486_v43, %v1565_v25  ;;  %v2244_v18 = vld [vmem:[#allocation3 + $0x31] sm:$0xff]  ;;  %v11413_v6 = vpack.c.bf16 %v2246_v5, %v2245_v31  ;;  %v2251_v29 = vld [vmem:[#allocation3 + $0xa9] sm:$0xff]  ;;  %v11441_v63 = vpack.c.bf16 %v2256_v47, %v2255_v36 }
 0x10f   : > { %v1295_v2 = vmax.f32 %v1150_v49, %v1198_v46  ;;  %v11411_v58 = vpack.c.bf16 %v2244_v18, %v2243_v30  ;;  %v11425_v46 = vpack.c.bf16 %v2248_v55, %v2247_v39  ;;  %v2253_v49 = vld [vmem:[#allocation3 + $0xc9] sm:$0xff]  ;;  %v2264_v43 = vld [vmem:[#allocation3 + $0x171] sm:$0xff]  ;;  %v2928_v30 = vsel %vm1864_vm0, %v8597_v54, 0 }
 0x110   : > { %v1294_v59 = vmax.f32 %v1149_v21, %v1199_v12  ;;  %1714 = vst.msk [vmem:[#allocation3 + $0x202] sm:$0xc0] %vm1667_vm8, %v1663_v37  ;;  %v2254_v21 = vld [vmem:[#allocation3 + $0xd1] sm:$0xff]  ;;  %v11433_v12 = vpack.c.bf16 %v2252_v7, %v2251_v29  ;;  %v2261_v25 = vld [vmem:[#allocation3 + $0x149] sm:$0xff] }
 0x111   : > { %v1488_v35 = vmax.f32 %v1295_v2, %v1392_v33  ;;  %v11435_v60 = vpack.c.bf16 %v2254_v21, %v2253_v49  ;;  %v2257_v2 = vld [vmem:[#allocation3 + $0x109] sm:$0xff]  ;;  %v11451_v11 = vpack.c.bf16 %v2262_v40, %v2261_v25  ;;  %v2268_v37 = vld [vmem:[#allocation3 + $0x1b1] sm:$0xff] }
 0x112   : > { %9186 = vmatmul.mubr.msk.bf16.gmra.mrb[4].mxu0 %vm145_vm1, %v11339_v61  ;;  %v1487_v8 = vmax.f32 %v1294_v59, %v1390_v42  ;;  %v11443_v23 = vpack.c.bf16 %v2258_v27, %v2257_v2  ;;  %v2259_v59 = vld [vmem:[#allocation3 + $0x129] sm:$0xff]  ;;  %v2260_v42 = vld [vmem:[#allocation3 + $0x131] sm:$0xff] }
 0x113   : > { %9189 = vmatprep.mubr.msk.bf16.mxu0 %vm145_vm1, %v11341_v3  ;;  %v1665_v48 = vmax.f32 %v1488_v35, %v1569_v24  ;;  %v11449_v15 = vpack.c.bf16 %v2260_v42, %v2259_v59  ;;  %v2263_v33 = vld [vmem:[#allocation3 + $0x169] sm:$0xff] }
 0x114   : > { %v1664_v17 = vmax.f32 %v1487_v8, %v1567_v41  ;;  %v2266_v8 = vld [vmem:[#allocation3 + $0x191] sm:$0xff]  ;;  %v11457_v35 = vpack.c.bf16 %v2264_v43, %v2263_v33  ;;  %v2267_v24 = vld [vmem:[#allocation3 + $0x1a9] sm:$0xff] }
 0x115   : > { %1716 = vst.msk [vmem:[#allocation3 + $0x212] sm:$0x3f] %vm1670_vm7, %v1665_v48  ;;  %v11459_v41 = vpack.c.bf16 %v2266_v8, %v2265_v26  ;;  %v2270_v48 = vld [vmem:[#allocation3 + $0x1d1] sm:$0xff]  ;;  %v11465_v44 = vpack.c.bf16 %v2268_v37, %v2267_v24  ;;  %v8614_v18 = vld [vmem:[%s13459_s1 + $0xa] sm:$0x3] }
 0x116   : > { %1715 = vst.msk [vmem:[#allocation3 + $0x20a] sm:$0xff] %vm145_vm1, %v1664_v17  ;;  %v2269_v17 = vld [vmem:[#allocation3 + $0x1c9] sm:$0xff]  ;;  %v3222_v21 = vsel %vm1864_vm0, %v8614_v18, 0 }
 0x117   : > { %v11467_v38 = vpack.c.bf16 %v2270_v48, %v2269_v17  ;;  %v2829_v5 = vld [vmem:[#allocation3 + $0x28] sm:$0xff]  ;;  %v2832_v52 = vld [vmem:[#allocation3 + $0x50] sm:$0xff] }
 0x118   : > { %v2831_v55 = vld [vmem:[#allocation3 + $0x48] sm:$0xff]  ;;  %v2834_v29 = vld [vmem:[#allocation3 + $0x70] sm:$0xff] }
 0x119   : > { %v2833_v14 = vld [vmem:[#allocation3 + $0x68] sm:$0xff]  ;;  %v11517_v7 = vpack.c.bf16 %v2832_v52, %v2831_v55  ;;  %v2836_v2 = vld [vmem:[#allocation3 + $0x90] sm:$0xff] }
 0x11a   : > { %9190 = vmatmul.mubr.msk.bf16.gmra.mrb[8].mxu0 %vm145_vm1, %v11347_v57  ;;  %v11519_v49 = vpack.c.bf16 %v2834_v29, %v2833_v14  ;;  %v8631_v36 = vld [vmem:[%s13459_s1 + $0xc] sm:$0x3]  ;;  %v2838_v59 = vld [vmem:[#allocation3 + $0xb0] sm:$0xff] }
 0x11b   : > { %9193 = vmatprep.mubr.msk.bf16.mxu0 %vm145_vm1, %v11349_v53  ;;  %v2835_v47 = vld [vmem:[#allocation3 + $0x88] sm:$0xff]  ;;  %v2840_v33 = vld [vmem:[#allocation3 + $0xd0] sm:$0xff] }
 0x11c   : > { %v2837_v27 = vld [vmem:[#allocation3 + $0xa8] sm:$0xff]  ;;  %v11530_v42 = vpack.c.bf16 %v2836_v2, %v2835_v47  ;;  %v2842_v26 = vld [vmem:[#allocation3 + $0xf0] sm:$0xff] }
 0x11d   : > { %v2566_v31 = vld [vmem:[#allocation3 + $0x20f] sm:$0xff]  ;;  %v11532_v25 = vpack.c.bf16 %v2838_v59, %v2837_v27 }
 0x11e   : > { %v2839_v40 = vld [vmem:[#allocation3 + $0xc8] sm:$0xff]  ;;  %v2844_v17 = vld [vmem:[#allocation3 + $0x110] sm:$0xff] }
 0x11f   : > { %v2841_v43 = vld [vmem:[#allocation3 + $0xe8] sm:$0xff]  ;;  %v11538_v8 = vpack.c.bf16 %v2840_v33, %v2839_v40  ;;  %v2852_v52 = vld [vmem:[#allocation3 + $0x190] sm:$0xff]  ;;  %v3517_v40 = vsel %vm1864_vm0, %v8631_v36, 0 }
 0x120   : > { %v11540_v24 = vpack.c.bf16 %v2842_v26, %v2841_v43  ;;  %v2843_v37 = vld [vmem:[#allocation3 + $0x108] sm:$0xff]  ;;  %v2854_v29 = vld [vmem:[#allocation3 + $0x1b0] sm:$0xff] }
 0x121   : > { %v2845_v48 = vld [vmem:[#allocation3 + $0x128] sm:$0xff]  ;;  %v2860_v27 = vld [vmem:[#allocation3 + $0x210] sm:$0xff] }
 0x122   : > { %9194 = vmatmul.mubr.msk.bf16.gmra.mrb[12].mxu0 %vm145_vm1, %v11355_v16  ;;  %v2851_v55 = vld [vmem:[#allocation3 + $0x188] sm:$0xff]  ;;  %v8665_v43 = vld [vmem:[%s13459_s1 + $0x10] sm:$0x3] }
 0x123   : > { %9197 = vmatprep.mubr.msk.bf16.mxu0 %vm145_vm1, %v11357_v1  ;;  %v2853_v14 = vld [vmem:[#allocation3 + $0x1a8] sm:$0xff] }
 0x124   : > { %v11564_v47 = vpack.c.bf16 %v2854_v29, %v2853_v14  ;;  %v2859_v2 = vld [vmem:[#allocation3 + $0x208] sm:$0xff]  ;;  %v4880_v14 = vld [vmem:[#allocation2 + $0xa0] sm:$0xff]  ;;  %v4755_v29 = vld [vmem:[#allocation2 + $0x98] sm:$0x3] }
 0x125   : > { %v11574_v59 = vpack.c.bf16 %v2860_v27, %v2859_v2  ;;  %v8648_v33 = vld [vmem:[%s13459_s1 + $0xe] sm:$0x3]  ;;  %v4635_v27 = vld [vmem:[#allocation2 + $0xb8] sm:$0x3] }
 0x12a   : > { %9198 = vmatmul.mubr.msk.bf16.gmra.mrb[16].mxu0 %vm145_vm1, %v11366_v0 }
 0x12b   : > { %9201 = vmatprep.mubr.msk.bf16.mxu0 %vm145_vm1, %v11368_v4 }
 0x132   : > { %9202 = vmatmul.mubr.msk.bf16.gmra.mrb[20].mxu0 %vm145_vm1, %v11380_v62 }
 0x133   : > { %9205 = vmatprep.mubr.msk.bf16.mxu0 %vm145_vm1, %v11382_v32 }
 0x13a   : > { %9206 = vmatmul.mubr.msk.bf16.gmra.mrb[24].mxu0 %vm145_vm1, %v11394_v22 }
 0x13b   : > { %9209 = vmatprep.mubr.msk.bf16.mxu0 %vm145_vm1, %v11397_v13 }
 0x142   : > { %9210 = vmatmul.mubr.msk.bf16.gmra.mrb[28].mxu0 %vm145_vm1, %v11406_v10 }
 0x143   : > { %9215 = vmatprep.mubr.msk.bf16.mxu0 %vm145_vm1, %v2273_v28  ;;  %v11473_v28 = vpack.c.bf16 %v2272_v20, %v2271_v50  ;;  %v2846_v50 = vld [vmem:[#allocation3 + $0x130] sm:$0xff]  ;;  %v11546_v20 = vpack.c.bf16 %v2844_v17, %v2843_v37  ;;  %v4623_v37 = vld [vmem:[#allocation2 + $0x58] sm:$0x3] }
 0x144   : > { %v4627_v17 = vld [vmem:[#allocation2 + $0x78] sm:$0x3] }
 0x14a   : > { %9216 = vmatmul.mubr.msk.bf16.vlgmr.msra.gmra.mrb[0].mxu0 %vm145_vm1, %v11411_v58 }
 0x14b   : > { %9248 = vmatpush3.bf16.msra.mxu0 %v2634_v9  ;;  %9219 = vmatprep.mubr.msk.bf16.mxu0 %vm145_vm1, %v11413_v6  ;;  %v2830_v9 = vld [vmem:[#allocation3 + $0x30] sm:$0xff] }
 0x14c   : > { %10273 = vmatprep.subr.msk.bf16.mxu0 %vm1864_vm0, %v8597_v54  ;;  %v2861_v39 = vpack.c.bf16 %v2830_v9, %v2829_v5  ;;  %v2850_v5 = vld [vmem:[#allocation3 + $0x170] sm:$0xff] }
 0x152   : > { %9220 = vmatmul.mubr.msk.bf16.gmra.mrb[4].mxu0 %vm145_vm1, %v11425_v46 }
 0x153   : > { %9223 = vmatprep.mubr.msk.bf16.mxu0 %vm145_vm1, %v11427_v51 }
 0x15a   : > { %9224 = vmatmul.mubr.msk.bf16.gmra.mrb[8].mxu0 %vm145_vm1, %v11433_v12 }
 0x15b   : > { %9227 = vmatprep.mubr.msk.bf16.mxu0 %vm145_vm1, %v11435_v60 }
 0x162   : > { %9228 = vmatmul.mubr.msk.bf16.gmra.mrb[12].mxu0 %vm145_vm1, %v11441_v63 }
 0x163   : > { %9231 = vmatprep.mubr.msk.bf16.mxu0 %vm145_vm1, %v11443_v23 }
 0x16a   : > { %9232 = vmatmul.mubr.msk.bf16.gmra.mrb[16].mxu0 %vm145_vm1, %v11449_v15 }
 0x16b   : > { %9235 = vmatprep.mubr.msk.bf16.mxu0 %vm145_vm1, %v11451_v11 }
 0x172   : > { %9236 = vmatmul.mubr.msk.bf16.gmra.mrb[20].mxu0 %vm145_vm1, %v11457_v35 }
 0x173   : > { %9239 = vmatprep.mubr.msk.bf16.mxu0 %vm145_vm1, %v11459_v41 }
 0x17a   : > { %9240 = vmatmul.mubr.msk.bf16.gmra.mrb[24].mxu0 %vm145_vm1, %v11465_v44 }
 0x17b   : > { %9243 = vmatprep.mubr.msk.bf16.mxu0 %vm145_vm1, %v11467_v38 }
 0x182   : > { %9244 = vmatmul.mubr.msk.bf16.gmra.mrb[28].mxu0 %vm145_vm1, %v11473_v28 }
 0x183   : > { %9249 = vmatprep.mubr.msk.bf16.mxu0 %vm145_vm1, %v11320_v34  ;;  %v2565_v34 = vld [vmem:[#allocation3 + $0x207] sm:$0xff] }
 0x184   : > { %v11512_v54 = vpack.c.bf16 %v2566_v31, %v2565_v34  ;;  %v2848_v34 = vld [vmem:[#allocation3 + $0x150] sm:$0xff]  ;;  %v2849_v31 = vld [vmem:[#allocation3 + $0x168] sm:$0xff] }
 0x18a   : > { %9250 = vmatmul.mubr.msk.bf16.vlgmr.msra.gmra.mrb[0].mxu0 %vm145_vm1, %v11322_v45 }
 0x18b   : > { %9282 = vmatpush3.bf16.msra.mxu0 %v2928_v30  ;;  %9253 = vmatprep.mubr.msk.bf16.mxu0 %vm145_vm1, %v11339_v61  ;;  %v11548_v30 = vpack.c.bf16 %v2846_v50, %v2845_v48  ;;  %v4439_v48 = vld [vmem:[#allocation2 + $0x58] sm:$0x3] }
 0x18c   : > { %10274 = vmatprep.subr.msk.bf16.mxu0 %vm1864_vm0, %v8614_v18  ;;  %v2847_v18 = vld [vmem:[#allocation3 + $0x148] sm:$0xff]  ;;  %v4503_v50 = vld [vmem:[#allocation2 + $0x78] sm:$0x3] }
 0x18d   : > { %v11554_v9 = vpack.c.bf16 %v2848_v34, %v2847_v18  ;;  %v4507_v18 = vld [vmem:[#allocation2 + $0x98] sm:$0x3] }
 0x192   : > { %9254 = vmatmul.mubr.msk.bf16.gmra.mrb[4].mxu0 %vm145_vm1, %v11341_v3 }
 0x193   : > { %9257 = vmatprep.mubr.msk.bf16.mxu0 %vm145_vm1, %v11347_v57 }
 0x19a   : > { %9258 = vmatmul.mubr.msk.bf16.gmra.mrb[8].mxu0 %vm145_vm1, %v11349_v53 }
 0x19b   : > { %9261 = vmatprep.mubr.msk.bf16.mxu0 %vm145_vm1, %v11355_v16 }
 0x1a2   : > { %9262 = vmatmul.mubr.msk.bf16.gmra.mrb[12].mxu0 %vm145_vm1, %v11357_v1 }
 0x1a3   : > { %9265 = vmatprep.mubr.msk.bf16.mxu0 %vm145_vm1, %v11366_v0 }
 0x1aa   : > { %9266 = vmatmul.mubr.msk.bf16.gmra.mrb[16].mxu0 %vm145_vm1, %v11368_v4 }
 0x1ab   : > { %9269 = vmatprep.mubr.msk.bf16.mxu0 %vm145_vm1, %v11380_v62 }
 0x1b2   : > { %9270 = vmatmul.mubr.msk.bf16.gmra.mrb[20].mxu0 %vm145_vm1, %v11382_v32 }
 0x1b3   : > { %9273 = vmatprep.mubr.msk.bf16.mxu0 %vm145_vm1, %v11394_v22 }
 0x1ba   : > { %9274 = vmatmul.mubr.msk.bf16.gmra.mrb[24].mxu0 %vm145_vm1, %v11397_v13 }
 0x1bb   : > { %9277 = vmatprep.mubr.msk.bf16.mxu0 %vm145_vm1, %v11406_v10 }
 0x1c2   : > { %9278 = vmatmul.mubr.msk.bf16.gmra.mrb[28].mxu0 %vm145_vm1, %v11512_v54 }
 0x1c3   : > { %9283 = vmatprep.mubr.msk.bf16.mxu0 %vm145_vm1, %v2861_v39  ;;  %v11556_v39 = vpack.c.bf16 %v2850_v5, %v2849_v31 }
 0x1ca   : > { %9284 = vmatmul.mubr.msk.bf16.vlgmr.msra.gmra.mrb[0].mxu0 %vm145_vm1, %v11517_v7 }
 0x1cb   : > { %9316 = vmatpush3.bf16.msra.mxu0 %v3222_v21  ;;  %9287 = vmatprep.mubr.msk.bf16.mxu0 %vm145_vm1, %v11519_v49  ;;  %v11562_v21 = vpack.c.bf16 %v2852_v52, %v2851_v55  ;;  %v4751_v55 = vld [vmem:[#allocation2 + $0x78] sm:$0x3]  ;;  %v4567_v52 = vmax.f32 %v4439_v48, %v4503_v50  ;;  %v4768_v48 = vld [vmem:[#allocation2 + $0x100] sm:$0xff] }
 0x1cc   : > { %10275 = vmatprep.subr.msk.bf16.mxu0 %vm1864_vm0, %v8631_v36  ;;  %v3811_v36 = vsel %vm1864_vm0, %v8648_v33, 0 }
 0x1d2   : > { %9288 = vmatmul.mubr.msk.bf16.gmra.mrb[4].mxu0 %vm145_vm1, %v11530_v42 }
 0x1d3   : > { %9291 = vmatprep.mubr.msk.bf16.mxu0 %vm145_vm1, %v11532_v25 }
 0x1da   : > { %9292 = vmatmul.mubr.msk.bf16.gmra.mrb[8].mxu0 %vm145_vm1, %v11538_v8 }
 0x1db   : > { %9295 = vmatprep.mubr.msk.bf16.mxu0 %vm145_vm1, %v11540_v24 }
 0x1e2   : > { %9296 = vmatmul.mubr.msk.bf16.gmra.mrb[12].mxu0 %vm145_vm1, %v11546_v20 }
 0x1e3   : > { %9299 = vmatprep.mubr.msk.bf16.mxu0 %vm145_vm1, %v11548_v30 }
 0x1ea   : > { %9300 = vmatmul.mubr.msk.bf16.gmra.mrb[16].mxu0 %vm145_vm1, %v11554_v9 }
 0x1eb   : > { %9303 = vmatprep.mubr.msk.bf16.mxu0 %vm145_vm1, %v11556_v39 }
 0x1f2   : > { %9304 = vmatmul.mubr.msk.bf16.gmra.mrb[20].mxu0 %vm145_vm1, %v11562_v21 }
 0x1f3   : > { %9307 = vmatprep.mubr.msk.bf16.mxu0 %vm145_vm1, %v11564_v47 }
 0x1fa   : > { %9308 = vmatmul.mubr.msk.bf16.gmra.mrb[24].mxu0 %vm145_vm1, %v11268_v19  ;;  %v3153_v19 = vld [vmem:[#allocation3 + $0x209] sm:$0xff] }
 0x1fb   : > { %9311 = vmatprep.mubr.msk.bf16.mxu0 %vm145_vm1, %v11315_v56  ;;  %v3154_v56 = vld [vmem:[#allocation3 + $0x211] sm:$0xff] }
 0x202   : > { %9312 = vmatmul.mubr.msk.bf16.gmra.mrb[28].mxu0 %vm145_vm1, %v11574_v59 }
 0x203   : > { %9317 = vmatprep.mubr.msk.bf16.mxu0 %vm145_vm1, %v11411_v58  ;;  %v11613_v58 = vpack.c.bf16 %v3154_v56, %v3153_v19 }
 0x20a   : > { %9318 = vmatmul.mubr.msk.bf16.vlgmr.msra.gmra.mrb[0].mxu0 %vm145_vm1, %v11413_v6 }
 0x20b   : > { %9350 = vmatpush3.bf16.msra.mxu0 %v3517_v40  ;;  %9321 = vmatprep.mubr.msk.bf16.mxu0 %vm145_vm1, %v11425_v46 }
 0x20c   : > { %10276 = vmatprep.subr.msk.bf16.mxu0 %vm1864_vm0, %v8648_v33 }
 0x212   : > { %9322 = vmatmul.mubr.msk.bf16.gmra.mrb[4].mxu0 %vm145_vm1, %v11427_v51 }
 0x213   : > { %9325 = vmatprep.mubr.msk.bf16.mxu0 %vm145_vm1, %v11433_v12 }
 0x21a   : > { %9326 = vmatmul.mubr.msk.bf16.gmra.mrb[8].mxu0 %vm145_vm1, %v11435_v60 }
 0x21b   : > { %9329 = vmatprep.mubr.msk.bf16.mxu0 %vm145_vm1, %v11441_v63 }
 0x222   : > { %9330 = vmatmul.mubr.msk.bf16.gmra.mrb[12].mxu0 %vm145_vm1, %v11443_v23 }
 0x223   : > { %9333 = vmatprep.mubr.msk.bf16.mxu0 %vm145_vm1, %v11449_v15 }
 0x22a   : > { %9334 = vmatmul.mubr.msk.bf16.gmra.mrb[16].mxu0 %vm145_vm1, %v11451_v11 }
 0x22b   : > { %9337 = vmatprep.mubr.msk.bf16.mxu0 %vm145_vm1, %v11457_v35 }
 0x232   : > { %9338 = vmatmul.mubr.msk.bf16.gmra.mrb[20].mxu0 %vm145_vm1, %v11459_v41 }
 0x233   : > { %9341 = vmatprep.mubr.msk.bf16.mxu0 %vm145_vm1, %v11465_v44 }
 0x23a   : > { %9342 = vmatmul.mubr.msk.bf16.gmra.mrb[24].mxu0 %vm145_vm1, %v11467_v38 }
 0x23b   : > { %9345 = vmatprep.mubr.msk.bf16.mxu0 %vm145_vm1, %v11473_v28 }
 0x242   : > { %9346 = vmatmul.mubr.msk.bf16.gmra.mrb[28].mxu0 %vm145_vm1, %v11613_v58 }
 0x243   : > { %9351 = vmatprep.mubr.msk.bf16.mxu0 %vm145_vm1, %v11322_v45  ;;  %v3448_v45 = vld [vmem:[#allocation3 + $0x227] sm:$0xff] }
 0x24a   : > { %9352 = vmatmul.mubr.msk.bf16.vlgmr.msra.gmra.mrb[0].mxu0 %vm145_vm1, %v11339_v61  ;;  %v3449_v61 = vld [vmem:[#allocation3 + $0x22f] sm:$0xff] }
 0x24b   : > { %9384 = vmatpush3.bf16.msra.mxu0 %v3811_v36  ;;  %9355 = vmatprep.mubr.msk.bf16.mxu0 %vm145_vm1, %v11341_v3  ;;  %v3465_v3 = vpack.c.bf16 %v3449_v61, %v3448_v45  ;;  %v11724_v36 = vld [vmem:[#allocation2 + $0xc0] sm:$0xff]  ;;  %v4883_v45 = vld [vmem:[#allocation2 + $0xb8] sm:$0x3] }
 0x24c   : > { %10277 = vmatprep.subr.msk.bf16.mxu0 %vm1864_vm0, %v8665_v43 }
 0x252   : > { %9356 = vmatmul.mubr.msk.bf16.gmra.mrb[4].mxu0 %vm145_vm1, %v11347_v57  ;;  %v4105_v57 = vsel %vm1864_vm0, %v8665_v43, 0 }
 0x253   : > { %9359 = vmatprep.mubr.msk.bf16.mxu0 %vm145_vm1, %v11349_v53  ;;  %v3736_v53 = vld [vmem:[#allocation3 + $0x1c8] sm:$0xff] }
 0x25a   : > { %9360 = vmatmul.mubr.msk.bf16.gmra.mrb[8].mxu0 %vm145_vm1, %v11355_v16  ;;  %v3737_v16 = vld [vmem:[#allocation3 + $0x1d0] sm:$0xff] }
 0x25b   : > { %9363 = vmatprep.mubr.msk.bf16.mxu0 %vm145_vm1, %v11357_v1  ;;  %v3756_v1 = vpack.c.bf16 %v3737_v16, %v3736_v53  ;;  %v4763_v53 = vld [vmem:[#allocation2 + $0xd8] sm:$0x3] }
 0x262   : > { %9364 = vmatmul.mubr.msk.bf16.gmra.mrb[12].mxu0 %vm145_vm1, %v11366_v0  ;;  %v3738_v0 = vld [vmem:[#allocation3 + $0x1e8] sm:$0xff] }
 0x263   : > { %9367 = vmatprep.mubr.msk.bf16.mxu0 %vm145_vm1, %v11368_v4  ;;  %v3739_v4 = vld [vmem:[#allocation3 + $0x1f0] sm:$0xff] }
 0x26a   : > { %9368 = vmatmul.mubr.msk.bf16.gmra.mrb[16].mxu0 %vm145_vm1, %v11380_v62  ;;  %v3757_v62 = vpack.c.bf16 %v3739_v4, %v3738_v0 }
 0x26b   : > { %9371 = vmatprep.mubr.msk.bf16.mxu0 %vm145_vm1, %v11382_v32  ;;  %v3742_v32 = vld [vmem:[#allocation3 + $0x228] sm:$0xff] }
 0x272   : > { %9372 = vmatmul.mubr.msk.bf16.gmra.mrb[20].mxu0 %vm145_vm1, %v11394_v22  ;;  %v3743_v22 = vld [vmem:[#allocation3 + $0x230] sm:$0xff] }
 0x273   : > { %9375 = vmatprep.mubr.msk.bf16.mxu0 %vm145_vm1, %v11397_v13  ;;  %v3759_v13 = vpack.c.bf16 %v3743_v22, %v3742_v32  ;;  %v4888_v22 = vld [vmem:[#allocation2 + $0xe0] sm:$0xff] }
 0x27a   : > { %9376 = vmatmul.mubr.msk.bf16.gmra.mrb[24].mxu0 %vm145_vm1, %v11406_v10  ;;  %v4036_v10 = vld [vmem:[#allocation3 + $0x229] sm:$0xff] }
 0x27b   : > { %9379 = vmatprep.mubr.msk.bf16.mxu0 %vm145_vm1, %v11512_v54  ;;  %v5838_v54 = vld [vmem:[#allocation3 + $0x8] sm:$0xff] }
 0x282   : > { %9380 = vmatmul.mubr.msk.bf16.gmra.mrb[28].mxu0 %vm145_vm1, %v3465_v3  ;;  %v4759_v3 = vld [vmem:[#allocation2 + $0xb8] sm:$0x3] }
 0x283   : > { %9385 = vmatprep.mubr.msk.bf16.mxu0 %vm145_vm1, %v11517_v7  ;;  %v5839_v7 = vld [vmem:[#allocation3 + $0x10] sm:$0xff] }
 0x28a   : > { %9386 = vmatmul.mubr.msk.bf16.vlgmr.msra.gmra.mrb[0].mxu0 %vm145_vm1, %v11519_v49  ;;  %v5870_v49 = vpack.c.bf16 %v5839_v7, %v5838_v54  ;;  %v4455_v7 = vld [vmem:[#allocation2 + $0xd8] sm:$0x3] }
 0x28b   : > { %9418 = vmatpush3.bf16.msra.mxu0 %v4105_v57  ;;  %9389 = vmatprep.mubr.msk.bf16.mxu0 %vm145_vm1, %v11530_v42 }
 0x28c   : > { %9453 = vmatprep.mubr.msk.bf16.mxu1 %vm145_vm1, %v5870_v49  ;;  %v4519_v49 = vld [vmem:[#allocation2 + $0xf8] sm:$0x3] }
 0x292   : > { %9390 = vmatmul.mubr.msk.bf16.gmra.mrb[4].mxu0 %vm145_vm1, %v11532_v25 }
 0x293   : > { %9393 = vmatprep.mubr.msk.bf16.mxu0 %vm145_vm1, %v11538_v8  ;;  %v4752_v8 = vld [vmem:[#allocation2 + $0x80] sm:$0xff] }
 0x294   : > { %v4572_v16 = vmax.f32 %v4752_v8, %v4880_v14 }
 0x29a   : > { %9394 = vmatmul.mubr.msk.bf16.gmra.mrb[8].mxu0 %vm145_vm1, %v11540_v24 }
 0x29b   : > { %9397 = vmatprep.mubr.msk.bf16.mxu0 %vm145_vm1, %v11546_v20 }
 0x2a2   : > { %9398 = vmatmul.mubr.msk.bf16.gmra.mrb[12].mxu0 %vm145_vm1, %v11548_v30  ;;  %v4443_v30 = vld [vmem:[#allocation2 + $0x78] sm:$0x3] }
 0x2a3   : > { %9401 = vmatprep.mubr.msk.bf16.mxu0 %vm145_vm1, %v11554_v9 }
 0x2aa   : > { %9402 = vmatmul.mubr.msk.bf16.gmra.mrb[16].mxu0 %vm145_vm1, %v11556_v39 }
 0x2ab   : > { %9405 = vmatprep.mubr.msk.bf16.mxu0 %vm145_vm1, %v11562_v21  ;;  %v4571_v21 = vmax.f32 %v4443_v30, %v4507_v18  ;;  %v4643_v30 = vld [vmem:[#allocation2 + $0xf8] sm:$0x3] }
 0x2ad   : > { %v4699_v61 = vmax.f32 %v4571_v21, %v4635_v27  ;;  %v4467_v21 = vld [vmem:[#allocation2 + $0x138] sm:$0x3] }
 0x2b2   : > { %9406 = vmatmul.mubr.msk.bf16.gmra.mrb[20].mxu0 %vm145_vm1, %v11564_v47  ;;  %v4631_v47 = vld [vmem:[#allocation2 + $0x98] sm:$0x3] }
 0x2b3   : > { %9409 = vmatprep.mubr.msk.bf16.mxu0 %vm145_vm1, %v3756_v1  ;;  %v4695_v43 = vmax.f32 %v4567_v52, %v4631_v47  ;;  %v11759_v52 = vld [vmem:[#allocation2 + $0x120] sm:$0xff]  ;;  %v4531_v47 = vld [vmem:[#allocation2 + $0x158] sm:$0x3] }
 0x2ba   : > { %9410 = vmatmul.mubr.msk.bf16.gmra.mrb[24].mxu0 %vm145_vm1, %v3757_v62 }
 0x2bb   : > { %9413 = vmatprep.mubr.msk.bf16.mxu0 %vm145_vm1, %v11574_v59 }
 0x2c2   : > { %9414 = vmatmul.mubr.msk.bf16.gmra.mrb[28].mxu0 %vm145_vm1, %v3759_v13  ;;  %v4823_v13 = vmax.f32 %v4695_v43, %v4759_v3  ;;  %v4771_v3 = vld [vmem:[#allocation2 + $0x118] sm:$0x3] }
 0x2c3   : > { %9419 = vmatprep.mubr.msk.bf16.mxu0 %vm145_vm1, %v11413_v6  ;;  %v4037_v6 = vld [vmem:[#allocation3 + $0x231] sm:$0xff] }
 0x2ca   : > { %9420 = vmatmul.mubr.msk.bf16.vlgmr.msra.gmra.mrb[0].mxu0 %vm145_vm1, %v11425_v46  ;;  %v4053_v46 = vpack.c.bf16 %v4037_v6, %v4036_v10  ;;  %v4827_v10 = vmax.f32 %v4699_v61, %v4763_v53  ;;  %v4887_v6 = vld [vmem:[#allocation2 + $0xd8] sm:$0x3] }
 0x2cb   : > { %9423 = vmatprep.mubr.msk.bf16.mxu0 %vm145_vm1, %v11427_v51  ;;  %v8683_v51 = vld [vmem:[%s13459_s1 + $0x14] sm:$0x3]  ;;  %v11744_v54 = vmax.f32 %v4823_v13, %v4887_v6  ;;  %v4767_v61 = vld [vmem:[#allocation2 + $0xf8] sm:$0x3]  ;;  %v4595_v13 = vmax.f32 %v4467_v21, %v4531_v47  ;;  %v4305_v6 = vld [vmem:[%s10794_s22 + $0x28] sm:$0xff] }
 0x2cc   : > { %10278 = vmatprep.subr.msk.bf16.mxu1 %vm1864_vm0, %v8683_v51  ;;  %v4539_v21 = vld [vmem:[#allocation2 + $0x198] sm:$0x3] }
 0x2d2   : > { %9424 = vmatmul.mubr.msk.bf16.gmra.mrb[4].mxu0 %vm145_vm1, %v11433_v12  ;;  %v4428_v12 = vld [vmem:[#allocation2] sm:$0xff] }
 0x2d3   : > { %9427 = vmatprep.mubr.msk.bf16.mxu0 %vm145_vm1, %v11435_v60  ;;  %v4432_v60 = vld [vmem:[#allocation2 + $0x20] sm:$0xff] }
 0x2da   : > { %9428 = vmatmul.mubr.msk.bf16.gmra.mrb[8].mxu0 %vm145_vm1, %v11441_v63  ;;  %v4496_v63 = vld [vmem:[#allocation2 + $0x40] sm:$0xff] }
 0x2db   : > { %9431 = vmatprep.mubr.msk.bf16.mxu0 %vm145_vm1, %v11443_v23  ;;  %v5937_v23 = vsel %vm1864_vm0, %v8683_v51, 0  ;;  %v4447_v51 = vld [vmem:[#allocation2 + $0x98] sm:$0x3] }
 0x2dc   : > { %9452 = vmatpush3.bf16.msra.mxu1 %v5937_v23  ;;  %v4511_v23 = vld [vmem:[#allocation2 + $0xb8] sm:$0x3] }
 0x2e2   : > { %9432 = vmatmul.mubr.msk.bf16.gmra.mrb[12].mxu0 %vm145_vm1, %v11449_v15  ;;  %v4431_v15 = vld [vmem:[#allocation2 + $0x18] sm:$0x3] }
 0x2e3   : > { %9435 = vmatprep.mubr.msk.bf16.mxu0 %vm145_vm1, %v11451_v11  ;;  %v4556_v11 = vmax.f32 %v4428_v12, %v4432_v60 }
 0x2e5   : > { %v4684_v25 = vmax.f32 %v4556_v11, %v4496_v63 }
 0x2ea   : > { %9436 = vmatmul.mubr.msk.bf16.gmra.mrb[16].mxu0 %vm145_vm1, %v11457_v35  ;;  %v4560_v35 = vmax.f32 %v4432_v60, %v4496_v63  ;;  %v4700_v60 = vmax.f32 %v4572_v16, %v11724_v36 }
 0x2eb   : > { %9439 = vmatprep.mubr.msk.bf16.mxu0 %vm145_vm1, %v11459_v41  ;;  %v4624_v41 = vld [vmem:[#allocation2 + $0x60] sm:$0xff] }
 0x2ec   : > { %v4688_v26 = vmax.f32 %v4560_v35, %v4624_v41  ;;  %v4564_v20 = vmax.f32 %v4496_v63, %v4624_v41  ;;  %v4568_v31 = vmax.f32 %v4624_v41, %v4752_v8  ;;  %v4812_v5 = vmax.f32 %v4684_v25, %v4624_v41  ;;  %v4451_v63 = vld [vmem:[#allocation2 + $0xb8] sm:$0x3] }
 0x2ed   : > { %v4575_v25 = vmax.f32 %v4447_v51, %v4511_v23  ;;  %v4828_v50 = vmax.f32 %v4700_v60, %v4888_v22  ;;  %v4659_v23 = vld [vmem:[#allocation2 + $0x178] sm:$0x3] }
 0x2ee   : > { %v4816_v9 = vmax.f32 %v4688_v26, %v4752_v8  ;;  %v4692_v2 = vmax.f32 %v4564_v20, %v4752_v8  ;;  %v4696_v40 = vmax.f32 %v4568_v31, %v4880_v14  ;;  %v11720_v33 = vmax.f32 %v4812_v5, %v4752_v8  ;;  %v4459_v8 = vld [vmem:[#allocation2 + $0xf8] sm:$0x3] }
 0x2ef   : > { %v4639_v20 = vld [vmem:[#allocation2 + $0xd8] sm:$0x3]  ;;  %v4580_v31 = vmax.f32 %v11724_v36, %v4888_v22  ;;  %v4584_v5 = vmax.f32 %v4888_v22, %v4768_v48 }
 0x2f0   : > { %v11722_v19 = vmax.f32 %v4816_v9, %v4880_v14  ;;  %v4820_v57 = vmax.f32 %v4692_v2, %v4880_v14  ;;  %v4824_v0 = vmax.f32 %v4696_v40, %v11724_v36  ;;  %v5052_v4 = vrot.slane %v11720_v33, 1  ;;  %v4463_v9 = vld [vmem:[#allocation2 + $0x118] sm:$0x3]  ;;  %v4776_v40 = vld [vmem:[#allocation2 + $0x140] sm:$0xff] }
 0x2f1   : > { %v4703_v27 = vmax.f32 %v4575_v25, %v4639_v20  ;;  %v4471_v25 = vld [vmem:[#allocation2 + $0x158] sm:$0x3]  ;;  %v11770_v20 = vld [vmem:[#allocation2 + $0x180] sm:$0xff] }
 0x2f2   : > { %9440 = vmatmul.mubr.msk.bf16.gmra.mrb[20].mxu0 %vm145_vm1, %v11465_v44  ;;  %v4435_v44 = vld [vmem:[#allocation2 + $0x38] sm:$0x3]  ;;  %v5057_v62 = vrot.slane %v11722_v19, 1  ;;  %v11734_v12 = vmax.f32 %v4820_v57, %v11724_v36  ;;  %v11739_v41 = vmax.f32 %v4824_v0, %v4888_v22  ;;  %v4592_v57 = vmax.f32 %v11759_v52, %v4776_v40 }
 0x2f3   : > { %9443 = vmatprep.mubr.msk.bf16.mxu0 %vm145_vm1, %v11467_v38  ;;  %v4495_v38 = vld [vmem:[#allocation2 + $0x38] sm:$0x3]  ;;  %v4708_v0 = vmax.f32 %v4580_v31, %v4768_v48 }
 0x2f4   : > { %v4559_v42 = vmax.f32 %v4431_v15, %v4495_v38  ;;  %v4515_v15 = vld [vmem:[#allocation2 + $0xd8] sm:$0x3] }
 0x2f5   : > { %v4579_v26 = vmax.f32 %v4451_v63, %v4515_v15  ;;  %v4775_v63 = vld [vmem:[#allocation2 + $0x138] sm:$0x3]  ;;  %v4831_v15 = vmax.f32 %v4703_v27, %v4767_v61 }
 0x2f6   : > { %v4687_v34 = vmax.f32 %v4559_v42, %v4623_v37  ;;  %v11751_v37 = vld [vmem:[%s13459_s1 + $0x12] sm:$0x3] }
 0x2f7   : > { %10279 = vmatprep.subr.msk.bf16.mxu1 %vm1864_vm0, %v11751_v37 }
 0x2f8   : > { %v4815_v59 = vmax.f32 %v4687_v34, %v4751_v55 }
 0x2fa   : > { %9444 = vmatmul.mubr.msk.bf16.gmra.mrb[24].mxu0 %vm145_vm1, %v11473_v28  ;;  %v4499_v28 = vld [vmem:[#allocation2 + $0x58] sm:$0x3] }
 0x2fb   : > { %9447 = vmatprep.mubr.msk.bf16.mxu0 %vm145_vm1, %v11613_v58  ;;  %v4563_v24 = vmax.f32 %v4435_v44, %v4499_v28  ;;  %v4879_v58 = vld [vmem:[#allocation2 + $0x98] sm:$0x3]  ;;  %v4576_v44 = vmax.f32 %v4880_v14, %v11724_v36  ;;  %v4583_v14 = vmax.f32 %v4455_v7, %v4519_v49  ;;  %v4588_v36 = vmax.f32 %v4768_v48, %v11759_v52 }
 0x2fc   : > { %v11726_v1 = vmax.f32 %v4815_v59, %v4879_v58  ;;  %v4707_v59 = vmax.f32 %v4579_v26, %v4643_v30  ;;  %v4651_v58 = vld [vmem:[#allocation2 + $0x138] sm:$0x3] }
 0x2fd   : > { %v4691_v39 = vmax.f32 %v4563_v24, %v4627_v17  ;;  %v4523_v24 = vld [vmem:[#allocation2 + $0x118] sm:$0x3]  ;;  %v4704_v34 = vmax.f32 %v4576_v44, %v4888_v22  ;;  %v4712_v22 = vmax.f32 %v4584_v5, %v11759_v52  ;;  %v4716_v49 = vmax.f32 %v4588_v36, %v4776_v40 }
 0x2fe   : > { %v4835_v44 = vmax.f32 %v4707_v59, %v4771_v3  ;;  %v4779_v7 = vld [vmem:[#allocation2 + $0x158] sm:$0x3]  ;;  %v4836_v5 = vmax.f32 %v4708_v0, %v11759_v52 }
 0x2ff   : > { %v4819_v56 = vmax.f32 %v4691_v39, %v4755_v29  ;;  %v4527_v39 = vld [vmem:[#allocation2 + $0x138] sm:$0x3]  ;;  %v4587_v29 = vmax.f32 %v4459_v8, %v4523_v24  ;;  %v4832_v16 = vmax.f32 %v4704_v34, %v4768_v48 }
 0x300   : > { %v4591_v53 = vmax.f32 %v4463_v9, %v4527_v39  ;;  %v4535_v26 = vld [vmem:[#allocation2 + $0x178] sm:$0x3]  ;;  %v4840_v9 = vmax.f32 %v4712_v22, %v4776_v40  ;;  %v4723_v39 = vmax.f32 %v4595_v13, %v4659_v23 }
 0x301   : > { %v11731_v32 = vmax.f32 %v4819_v56, %v4883_v45  ;;  %v4647_v56 = vld [vmem:[#allocation2 + $0x118] sm:$0x3]  ;;  %v11764_v45 = vmax.f32 %v4828_v50, %v4768_v48  ;;  %v4715_v60 = vmax.f32 %v4587_v29, %v4651_v58  ;;  %v11773_v31 = vmax.f32 %v4832_v16, %v11759_v52 }
 0x302   : > { %9448 = vmatmul.mubr.msk.bf16.gmra.mrb[28].mxu0 %vm145_vm1, %v4053_v46  ;;  %v4891_v46 = vld [vmem:[#allocation2 + $0xf8] sm:$0x3]  ;;  %v4711_v51 = vmax.f32 %v4583_v14, %v4647_v56  ;;  %v4599_v58 = vmax.f32 %v4471_v25, %v4535_v26 }
 0x303   : > { %v11746_v42 = vmax.f32 %v4827_v10, %v4891_v46  ;;  %v4655_v10 = vld [vmem:[#allocation2 + $0x158] sm:$0x3]  ;;  %v4904_v46 = vld [vmem:[#allocation2 + $0x160] sm:$0xff]  ;;  %v4843_v27 = vmax.f32 %v4715_v60, %v4779_v7 }
 0x304   : > { %v4895_v24 = vld [vmem:[#allocation2 + $0x118] sm:$0x3]  ;;  %v4720_v50 = vmax.f32 %v4592_v57, %v4904_v46  ;;  %v4719_v30 = vmax.f32 %v4591_v53, %v4655_v10  ;;  %v4596_v34 = vmax.f32 %v4776_v40, %v4904_v46  ;;  %v4839_v47 = vmax.f32 %v4711_v51, %v4775_v63  ;;  %v4912_v63 = vld [vmem:[#allocation2 + $0x1a0] sm:$0xff] }
 0x305   : > { %v4899_v48 = vld [vmem:[#allocation2 + $0x138] sm:$0x3]  ;;  %v4600_v56 = vmax.f32 %v4904_v46, %v11770_v20  ;;  %v11777_v36 = vmax.f32 %v4831_v15, %v4895_v24  ;;  %v4844_v53 = vmax.f32 %v4716_v49, %v4904_v46  ;;  %v11784_v51 = vmax.f32 %v4836_v5, %v4776_v40 }
 0x306   : > { %v4783_v14 = vld [vmem:[#allocation2 + $0x178] sm:$0x3]  ;;  %v11779_v61 = vmax.f32 %v4835_v44, %v4899_v48  ;;  %v4848_v52 = vmax.f32 %v4720_v50, %v11770_v20  ;;  %v4724_v22 = vmax.f32 %v4596_v34, %v11770_v20  ;;  %v11786_v60 = vmax.f32 %v4840_v9, %v4904_v46  ;;  %v4936_v50 = vld [vmem:[#allocation2 + $0x260] sm:$0xff] }
 0x307   : > { %v4475_v29 = vld [vmem:[#allocation2 + $0x178] sm:$0x3]  ;;  %v4847_v0 = vmax.f32 %v4719_v30, %v4783_v14  ;;  %v4728_v26 = vmax.f32 %v4600_v56, %v4912_v63  ;;  %v11796_v46 = vmax.f32 %v4844_v53, %v11770_v20  ;;  %v11798_v30 = vld [vmem:[#allocation2 + $0x1c0] sm:$0xff]  ;;  %v4302_v56 = vld [vmem:[%s10794_s22 + $0x10] sm:$0xff] }
 0x308   : > { %v4787_v59 = vld [vmem:[#allocation2 + $0x198] sm:$0x3]  ;;  %v4603_v13 = vmax.f32 %v4475_v29, %v4539_v21  ;;  %v11800_v5 = vmax.f32 %v4848_v52, %v4912_v63 }
 0x309   : > { %v4903_v3 = vld [vmem:[#allocation2 + $0x158] sm:$0x3]  ;;  %v4851_v23 = vmax.f32 %v4723_v39, %v4787_v59  ;;  %v4852_v39 = vmax.f32 %v4724_v22, %v4912_v63  ;;  %v4920_v22 = vld [vmem:[#allocation2 + $0x1e0] sm:$0xff] }
 0x30a   : > { %v4907_v57 = vld [vmem:[#allocation2 + $0x178] sm:$0x3]  ;;  %v11788_v7 = vmax.f32 %v4839_v47, %v4903_v3 }
 0x30b   : > { %v4663_v16 = vld [vmem:[#allocation2 + $0x198] sm:$0x3]  ;;  %v11790_v49 = vmax.f32 %v4843_v27, %v4907_v57  ;;  %v4856_v57 = vmax.f32 %v4728_v26, %v11798_v30  ;;  %v11821_v3 = vmax.f32 %v4852_v39, %v11798_v30 }
 0x30c   : > { %v4911_v15 = vld [vmem:[#allocation2 + $0x198] sm:$0x3]  ;;  %v4727_v24 = vmax.f32 %v4599_v58, %v4663_v16 }
 0x30d   : > { %v4667_v44 = vld [vmem:[#allocation2 + $0x1b8] sm:$0x3]  ;;  %v11802_v9 = vmax.f32 %v4847_v0, %v4911_v15  ;;  %v4300_v15 = vld [vmem:[%s10794_s22] sm:$0xff]  ;;  %13499 = vst [vmem:[#allocation5_spill] sm:$0xff] %v11821_v3 }
 0x30e   : > { %v4915_v25 = vld [vmem:[#allocation2 + $0x1b8] sm:$0x3]  ;;  %v4731_v14 = vmax.f32 %v4603_v13, %v4667_v44  ;;  %v4301_v44 = vld [vmem:[%s10794_s22 + $0x8] sm:$0xff] }
 0x30f   : > { %v4791_v34 = vld [vmem:[#allocation2 + $0x1b8] sm:$0x3]  ;;  %v11807_v27 = vmax.f32 %v4851_v23, %v4915_v25  ;;  %v4604_v23 = vmax.f32 %v11770_v20, %v4912_v63  ;;  %v4608_v20 = vmax.f32 %v4912_v63, %v11798_v30  ;;  %v4612_v63 = vmax.f32 %v11798_v30, %v4920_v22 }
 0x310   : > { %v4795_v59 = vld [vmem:[#allocation2 + $0x1d8] sm:$0x3]  ;;  %v4855_v53 = vmax.f32 %v4727_v24, %v4791_v34 }
 0x311   : > { %13498 = vst [vmem:[#allocation4_spill] sm:$0xff] %v11807_v27  ;;  %v4919_v13 = vld [vmem:[#allocation2 + $0x1d8] sm:$0x3]  ;;  %v4859_v26 = vmax.f32 %v4731_v14, %v4795_v59  ;;  %v4732_v58 = vmax.f32 %v4604_v23, %v11798_v30  ;;  %v11831_v14 = vmax.f32 %v4856_v57, %v4920_v22  ;;  %v4736_v21 = vmax.f32 %v4608_v20, %v4920_v22  ;;  %v4680_v30 = vld [vmem:[#allocation2 + $0x220] sm:$0xff] }
 0x312   : > { %v4303_v34 = vld [vmem:[%s10794_s22 + $0x18] sm:$0xff]  ;;  %v11833_v59 = vmax.f32 %v4855_v53, %v4919_v13  ;;  %v11842_v53 = vsel %vm1864_vm0, %v11751_v37, 0  ;;  %v11854_v37 = vld [vmem:[#allocation2 + $0x30] sm:$0xff]  ;;  %v4808_v13 = vld [vmem:[#allocation2 + $0x240] sm:$0xff] }
 0x313   : > { %v4923_v16 = vld [vmem:[#allocation2 + $0x1f8] sm:$0x3]  ;;  %13500 = vst [vmem:[#allocation6_spill] sm:$0xff] %v11831_v14  ;;  %v4860_v23 = vmax.f32 %v4732_v58, %v4920_v22  ;;  %v11847_v58 = vld [vmem:[#allocation2 + $0x28] sm:$0xff] }
 0x314   : > { %13501 = vst [vmem:[#allocation7_spill] sm:$0xff] %v11833_v59  ;;  %v4479_v39 = vld [vmem:[#allocation2 + $0x198] sm:$0x3] }
 0x315   : > { %v4543_v29 = vld [vmem:[#allocation2 + $0x1b8] sm:$0x3] }
 0x316   : > { %v4483_v10 = vld [vmem:[#allocation2 + $0x1b8] sm:$0x3] }
 0x317   : > { %v4547_v8 = vld [vmem:[#allocation2 + $0x1d8] sm:$0x3] }
 0x318   : > { %v11914_v17 = vld [vmem:[#allocation2 + $0x1f8] sm:$0x3] }
 0x319   : > { %13508 = vst [vmem:[#allocation14_spill] sm:$0xff] %v11914_v17 }
 0x39d   : > { %v9421_v24 = vpop.f32.mrb[0].mxu0 }
 0x39e   : > { %v4334_v47 = vadd.f32 %v9421_v24, %v4302_v56  ;;  %4398 = vst.msk [vmem:[#allocation2 + $0x68] sm:$0xff] %vm145_vm1, %v9421_v24  ;;  %v4141_v25 = vpop.f32.mrb[1].mxu0  ;;  %v4429_v56 = vld [vmem:[#allocation2 + $0x8] sm:$0xff] }
 0x39f   : > { %v4332_v52 = vadd.f32 %v4300_v15, %v4141_v25  ;;  %4396 = vst.msk [vmem:[#allocation2 + $0x48] sm:$0xff] %vm145_vm1, %v4141_v25  ;;  %v9422_v0 = vpop.f32.mrb[2].mxu0  ;;  %v11845_v15 = vmax.f32 %v4859_v26, %v4923_v16  ;;  %v4552_v25 = vld [vmem:[#allocation2 + $0x200] sm:$0xff] }
 0x3a0   : > { %4366 = vst.msk [vmem:[%s10794_s22 + $0x10] sm:$0xff] %vm145_vm1, %v4334_v47  ;;  %v4335_v24 = vadd.f32 %v9422_v0, %v4303_v34  ;;  %4399 = vst.msk [vmem:[#allocation2 + $0x70] sm:$0xff] %vm145_vm1, %v9422_v0  ;;  %v4144_v57 = vpop.f32.mrb[3].mxu0  ;;  %v11852_v0 = vld [vmem:[#allocation2 + $0x10] sm:$0xff]  ;;  %v4616_v34 = vmax.f32 %v4920_v22, %v4552_v25  ;;  %v4740_v16 = vmax.f32 %v4612_v63, %v4552_v25 }
 0x3a1   : > { %13502 = vst [vmem:[#allocation8_spill] sm:$0xff] %v11845_v15  ;;  %4364 = vst.msk [vmem:[%s10794_s22] sm:$0xff] %vm145_vm1, %v4332_v52  ;;  %v4333_v47 = vadd.f32 %v4301_v44, %v4144_v57  ;;  %v4864_v26 = vmax.f32 %v4736_v21, %v4552_v25  ;;  %v4306_v52 = vld [vmem:[%s10794_s22 + $0x30] sm:$0xff]  ;;  %v4304_v44 = vld [vmem:[%s10794_s22 + $0x20] sm:$0xff]  ;;  %v11865_v22 = vmax.f32 %v4860_v23, %v4552_v25 }
 0x3a2   : > { %4397 = vst.msk [vmem:[#allocation2 + $0x50] sm:$0xff] %vm145_vm1, %v4144_v57  ;;  %4367 = vst.msk [vmem:[%s10794_s22 + $0x18] sm:$0xff] %vm145_vm1, %v4335_v24  ;;  %v4307_v57 = vld [vmem:[%s10794_s22 + $0x38] sm:$0xff]  ;;  %v4744_v40 = vmax.f32 %v4616_v34, %v4680_v30  ;;  %v4868_v48 = vmax.f32 %v4740_v16, %v4680_v30  ;;  %v4557_v21 = vmax.f32 %v4429_v56, %v11847_v58 }
 0x3a3   : > { %4365 = vst.msk [vmem:[%s10794_s22 + $0x8] sm:$0xff] %vm145_vm1, %v4333_v47  ;;  %13503 = vst [vmem:[#allocation9_spill] sm:$0xff] %v11865_v22  ;;  %v11870_v20 = vmax.f32 %v4864_v26, %v4680_v30  ;;  %v4607_v23 = vmax.f32 %v4479_v39, %v4543_v29  ;;  %v4671_v25 = vld [vmem:[#allocation2 + $0x1d8] sm:$0x3]  ;;  %v4558_v56 = vmax.f32 %v11852_v0, %v11854_v37 }
 0x3a4   : > { %v4872_v2 = vmax.f32 %v4744_v40, %v4808_v13  ;;  %v11874_v34 = vmax.f32 %v4868_v48, %v4808_v13  ;;  %v4487_v26 = vld [vmem:[#allocation2 + $0x1d8] sm:$0x3]  ;;  %v4611_v13 = vmax.f32 %v4483_v10, %v4547_v8 }
 0x3a5   : > { %13504 = vst [vmem:[#allocation10_spill] sm:$0xff] %v11870_v20  ;;  %v9425_v47 = vpop.f32.mrb[4].mxu0  ;;  %v4551_v24 = vld [vmem:[#allocation2 + $0x1f8] sm:$0x3]  ;;  %v11883_v43 = vld [vmem:[#allocation2 + $0x68] sm:$0xff] }
 0x3a6   : > { %13505 = vst [vmem:[#allocation11_spill] sm:$0xff] %v11874_v34  ;;  %v11876_v16 = vld [vmem:[#allocation2 + $0x48] sm:$0xff]  ;;  %v4338_v63 = vadd.f32 %v9425_v47, %v4306_v52  ;;  %4402 = vst.msk [vmem:[#allocation2 + $0xa8] sm:$0xff] %vm145_vm1, %v9425_v47  ;;  %v4157_v30 = vpop.f32.mrb[5].mxu0  ;;  %v4491_v29 = vld [vmem:[#allocation2 + $0x1f8] sm:$0x3]  ;;  %v4615_v18 = vmax.f32 %v4487_v26, %v4551_v24 }
 0x3a7   : > { %v4336_v55 = vadd.f32 %v4304_v44, %v4157_v30  ;;  %4400 = vst.msk [vmem:[#allocation2 + $0x88] sm:$0xff] %vm145_vm1, %v4157_v30  ;;  %v9426_v40 = vpop.f32.mrb[6].mxu0  ;;  %v4555_v39 = vld [vmem:[#allocation2 + $0x218] sm:$0x3]  ;;  %v4561_v0 = vmax.f32 %v11847_v58, %v11876_v16  ;;  %v4685_v52 = vmax.f32 %v4557_v21, %v11876_v16  ;;  %v11894_v8 = vld [vmem:[#allocation2 + $0x70] sm:$0xff]  ;;  %v11901_v58 = vmax.f32 %v4872_v2, %v4936_v50 }
 0x3a8   : > { %4370 = vst.msk [vmem:[%s10794_s22 + $0x30] sm:$0xff] %vm145_vm1, %v4338_v63  ;;  %v4339_v44 = vadd.f32 %v9426_v40, %v4307_v57  ;;  %4403 = vst.msk [vmem:[#allocation2 + $0xb0] sm:$0xff] %vm145_vm1, %v9426_v40  ;;  %v4160_v30 = vpop.f32.mrb[7].mxu0  ;;  %v4675_v57 = vld [vmem:[#allocation2 + $0x1f8] sm:$0x3]  ;;  %v11904_v63 = vmax.f32 %v4607_v23, %v4671_v25  ;;  %v4565_v2 = vmax.f32 %v11876_v16, %v11883_v43 }
 0x3a9   : > { %v11888_v47 = vld [vmem:[#allocation2 + $0x50] sm:$0xff]  ;;  %4368 = vst.msk [vmem:[%s10794_s22 + $0x20] sm:$0xff] %vm145_vm1, %v4336_v55  ;;  %4401 = vst.msk [vmem:[#allocation2 + $0x90] sm:$0xff] %vm145_vm1, %v4160_v30  ;;  %v4337_v48 = vadd.f32 %v4305_v6, %v4160_v30  ;;  %v4619_v55 = vmax.f32 %v4491_v29, %v4555_v39  ;;  %v4679_v50 = vld [vmem:[#allocation2 + $0x218] sm:$0x3]  ;;  %v4689_v23 = vmax.f32 %v4561_v0, %v11883_v43 }
 0x3aa   : > { %v4562_v10 = vmax.f32 %v11854_v37, %v11888_v47  ;;  %13506 = vst [vmem:[#allocation12_spill] sm:$0xff] %v11901_v58  ;;  %13507 = vst [vmem:[#allocation13_spill] sm:$0xff] %v11904_v63  ;;  %v11907_v40 = vmax.f32 %v4558_v56, %v11888_v47  ;;  %v4310_v37 = vld [vmem:[%s10794_s22 + $0x50] sm:$0xff]  ;;  %v4683_v21 = vld [vmem:[#allocation2 + $0x238] sm:$0x3]  ;;  %v4813_v25 = vmax.f32 %v4685_v52, %v11883_v43 }
 0x3ab   : > { %4371 = vst.msk [vmem:[%s10794_s22 + $0x38] sm:$0xff] %vm145_vm1, %v4339_v44  ;;  %v4566_v56 = vmax.f32 %v11888_v47, %v11894_v8  ;;  %4369 = vst.msk [vmem:[%s10794_s22 + $0x28] sm:$0xff] %vm145_vm1, %v4337_v48  ;;  %v4308_v6 = vld [vmem:[%s10794_s22 + $0x40] sm:$0xff]  ;;  %v11923_v24 = vmax.f32 %v4611_v13, %v4675_v57  ;;  %v4311_v44 = vld [vmem:[%s10794_s22 + $0x58] sm:$0xff]  ;;  %v11941_v57 = vmax.f32 %v4619_v55, %v4683_v21 }
 0x3ac   : > { %v4690_v26 = vmax.f32 %v4562_v10, %v11894_v8  ;;  %v4814_v16 = vmax.f32 %v11907_v40, %v11894_v8  ;;  %v11932_v52 = vld [vmem:[#allocation2 + $0x218] sm:$0x3]  ;;  %v11939_v10 = vmax.f32 %v4615_v18, %v4679_v50 }
 0x3ad   : > { %13509 = vst [vmem:[#allocation15_spill] sm:$0xff] %v11923_v24  ;;  %v11928_v29 = vld [vmem:[#allocation2 + $0xa8] sm:$0xff]  ;;  %v9429_v39 = vpop.f32.mrb[8].mxu0  ;;  %13510 = vst [vmem:[#allocation16_spill] sm:$0xff] %v11932_v52  ;;  %v11943_v40 = vld [vmem:[#allocation2 + $0x238] sm:$0x3] }
 0x3ae   : > { %v11936_v48 = vld [vmem:[#allocation2 + $0x88] sm:$0xff]  ;;  %v4342_v13 = vadd.f32 %v9429_v39, %v4310_v37  ;;  %4406 = vst.msk [vmem:[#allocation2 + $0xe8] sm:$0xff] %vm145_vm1, %v9429_v39  ;;  %v4173_v30 = vpop.f32.mrb[9].mxu0  ;;  %13511 = vst [vmem:[#allocation17_spill] sm:$0xff] %v11939_v10 }
 0x3af   : > { %13512 = vst [vmem:[#allocation18_spill] sm:$0xff] %v11941_v57  ;;  %13513 = vst [vmem:[#allocation19_spill] sm:$0xff] %v11943_v40  ;;  %v4569_v28 = vmax.f32 %v11883_v43, %v11936_v48  ;;  %v11952_v37 = vmax.f32 %v4565_v2, %v11936_v48  ;;  %v4817_v39 = vmax.f32 %v4689_v23, %v11936_v48  ;;  %v11955_v18 = vld [vmem:[#allocation2 + $0xb0] sm:$0xff]  ;;  %v9430_v21 = vpop.f32.mrb[10].mxu0 }
 0x3b0   : > { %4404 = vst.msk [vmem:[#allocation2 + $0xc8] sm:$0xff] %vm145_vm1, %v4173_v30  ;;  %v11959_v55 = vmax.f32 %v4813_v25, %v11936_v48  ;;  %v11961_v50 = vld [vmem:[#allocation2 + $0x90] sm:$0xff]  ;;  %4374 = vst.msk [vmem:[%s10794_s22 + $0x50] sm:$0xff] %vm145_vm1, %v4342_v13  ;;  %v4340_v43 = vadd.f32 %v4308_v6, %v4173_v30  ;;  %v4343_v2 = vadd.f32 %v9430_v21, %v4311_v44  ;;  %v4176_v23 = vpop.f32.mrb[11].mxu0 }
 0x3b1   : > { %4407 = vst.msk [vmem:[#allocation2 + $0xf0] sm:$0xff] %vm145_vm1, %v9430_v21  ;;  %v11969_v47 = vmax.f32 %v4817_v39, %v11928_v29  ;;  %v11976_v13 = vmax.f32 %v4566_v56, %v11961_v50  ;;  %4405 = vst.msk [vmem:[#allocation2 + $0xd0] sm:$0xff] %vm145_vm1, %v4176_v23  ;;  %v4309_v21 = vld [vmem:[%s10794_s22 + $0x48] sm:$0xff]  ;;  %v4818_v11 = vmax.f32 %v4690_v26, %v11961_v50 }
 0x3b2   : > { %v5053_v6 = vrot.slane %v11959_v55, 1  ;;  %v5228_v44 = vrot.slane %v11959_v55, 2  ;;  %v5388_v30 = vrot.slane %v11959_v55, 3  ;;  %4372 = vst.msk [vmem:[%s10794_s22 + $0x40] sm:$0xff] %vm145_vm1, %v4340_v43  ;;  %4375 = vst.msk [vmem:[%s10794_s22 + $0x58] sm:$0xff] %vm145_vm1, %v4343_v2  ;;  %v4942_v39 = vmax.f32 %v4814_v16, %v11961_v50 }
 0x3b3   : > { %v5058_v0 = vrot.slane %v11969_v47, 1  ;;  %v5231_v56 = vrot.slane %v11969_v47, 2  ;;  %v11998_v43 = vmax.f32 %v4569_v28, %v11928_v29  ;;  %v4341_v40 = vadd.f32 %v4309_v21, %v4176_v23 }
 0x3b4   : > { %v5054_v35 = vsel %vm974_vm3, %v5052_v4, %v5053_v6  ;;  %v12010_v26 = vmax.f32 %v4818_v11, %v11955_v18  ;;  %v5055_v28 = vrot.slane %v4942_v39, 1  ;;  %v5229_v16 = vrot.slane %v4942_v39, 2 }
 0x3b5   : > { %v5059_v2 = vsel %vm974_vm3, %v5057_v62, %v5058_v0  ;;  %v5180_v38 = vmax.f32 %v11720_v33, %v5054_v35  ;;  %v12006_v10 = vpop.f32.mrb[12].mxu0  ;;  %v5389_v35 = vrot.slane %v4942_v39, 3  ;;  %v5565_v25 = vrot.slane %v4942_v39, 4  ;;  %4373 = vst.msk [vmem:[%s10794_s22 + $0x48] sm:$0xff] %vm145_vm1, %v4341_v40  ;;  %v12045_v20 = vld [vmem:[#allocation2 + $0xe8] sm:$0xff] }
 0x3b6   : > { %v5183_v4 = vmax.f32 %v11722_v19, %v5059_v2  ;;  %4410 = vst.msk [vmem:[#allocation2 + $0x128] sm:$0xff] %vm145_vm1, %v12006_v10  ;;  %v12016_v62 = vpop.f32.mrb[13].mxu0  ;;  %v5056_v21 = vsel %vm974_vm3, %v5053_v6, %v5055_v28  ;;  %v5060_v2 = vrot.slane %v12010_v26, 1  ;;  %v5182_v24 = vmax.f32 %v4942_v39, %v5055_v28 }
 0x3b7   : > { %v12012_v52 = vld [vmem:[#allocation2 + $0xc8] sm:$0xff]  ;;  %v5324_v33 = vmax.f32 %v5180_v38, %v5228_v44  ;;  %4408 = vst.msk [vmem:[#allocation2 + $0x108] sm:$0xff] %vm145_vm1, %v12016_v62  ;;  %v12024_v19 = vpop.f32.mrb[14].mxu0  ;;  %v5181_v23 = vmax.f32 %v11959_v55, %v5056_v21  ;;  %v5230_v40 = vsel %vm1151_vm4, %v5228_v44, %v5229_v16  ;;  %v5232_v63 = vrot.slane %v12010_v26, 2 }
 0x3b8   : > { %v5327_v11 = vmax.f32 %v5183_v4, %v5231_v56  ;;  %4411 = vst.msk [vmem:[#allocation2 + $0x130] sm:$0xff] %vm145_vm1, %v12024_v19  ;;  %v12030_v38 = vpop.f32.mrb[15].mxu0  ;;  %v13514_v6 = vrot.slane %v11969_v47, 3  ;;  %v5061_v39 = vsel %vm974_vm3, %v5058_v0, %v5060_v2  ;;  %v5185_v28 = vmax.f32 %v12010_v26, %v5060_v2 }
 0x3b9   : > { %v5516_v17 = vmax.f32 %v5324_v33, %v5388_v30  ;;  %4409 = vst.msk [vmem:[#allocation2 + $0x110] sm:$0xff] %vm145_vm1, %v12030_v38  ;;  %v5326_v57 = vmax.f32 %v5182_v24, %v5229_v16  ;;  %v13515_v58 = vrot.slane %v11959_v55, 4  ;;  %v5184_v21 = vmax.f32 %v11969_v47, %v5061_v39 }
 0x3ba   : > { %v5519_v4 = vmax.f32 %v5327_v11, %v13514_v6  ;;  %v5233_v44 = vsel %vm1151_vm4, %v5231_v56, %v5232_v63  ;;  %v5325_v34 = vmax.f32 %v5181_v23, %v5230_v40  ;;  %v13516_v22 = vrot.slane %v11969_v47, 4  ;;  %v12067_v6 = vld [vmem:[#allocation2 + $0xd0] sm:$0xff] }
 0x3bb   : > { %v5692_v33 = vmax.f32 %v5516_v17, %v13515_v58  ;;  %v5329_v59 = vmax.f32 %v5185_v28, %v5232_v63  ;;  %v5390_v11 = vsel %vm1312_vm5, %v5388_v30, %v5389_v35  ;;  %v13517_v0 = vrot.slane %v11726_v1, 3 }
 0x3bc   : > { %v5695_v15 = vmax.f32 %v5519_v4, %v13516_v22  ;;  %v5328_v17 = vmax.f32 %v5184_v21, %v5233_v44  ;;  %v5394_v58 = vrot.slane %v12010_v26, 3  ;;  %v5517_v16 = vmax.f32 %v5325_v34, %v5390_v11  ;;  %v12079_v4 = vld [vmem:[#allocation2 + $0xf0] sm:$0xff] }
 0x3bd   : > { %v5392_v24 = vsel %vm1312_vm5, %v5389_v35, %v13517_v0  ;;  %5740 = vst.msk [vmem:[#allocation3 + $0x22] sm:$0xc0] %vm1667_vm8, %v5692_v33  ;;  %v12055_v23 = vpop.f32.mrb[16].mxu0  ;;  %v13518_v22 = vrot.slane %v11959_v55, 4  ;;  %v13519_v30 = vrot.slane %v11726_v1, 4  ;;  %v5570_v35 = vrot.slane %v12010_v26, 4 }
 0x3be   : > { %v5518_v56 = vmax.f32 %v5326_v57, %v5392_v24  ;;  %5743 = vst.msk [vmem:[#allocation3 + $0x42] sm:$0xc0] %vm1667_vm8, %v5695_v15  ;;  %v12071_v34 = vpop.f32.mrb[17].mxu0  ;;  %v13520_v15 = vrot.slane %v11969_v47, 3  ;;  %v13521_v1 = vrot.slane %v11731_v32, 3  ;;  %v13522_v21 = vrot.slane %v11969_v47, 4 }
 0x3bf   : > { %v5566_v63 = vsel %vm1489_vm6, %v13518_v22, %v5565_v25  ;;  %v5568_v2 = vsel %vm1489_vm6, %v5565_v25, %v13519_v30  ;;  %4414 = vst.msk [vmem:[#allocation2 + $0x168] sm:$0xff] %vm145_vm1, %v12055_v23  ;;  %4412 = vst.msk [vmem:[#allocation2 + $0x148] sm:$0xff] %vm145_vm1, %v12071_v34  ;;  %v12083_v39 = vpop.f32.mrb[18].mxu0  ;;  %v13523_v11 = vrot.slane %v11731_v32, 4  ;;  %v4825_v32 = vmax.f32 %v11998_v43, %v12012_v52 }
 0x3c0   : > { %v5395_v57 = vsel %vm1312_vm5, %v13520_v15, %v5394_v58  ;;  %v5397_v55 = vsel %vm1312_vm5, %v5394_v58, %v13521_v1  ;;  %v5693_v25 = vmax.f32 %v5517_v16, %v5566_v63  ;;  %v5694_v26 = vmax.f32 %v5518_v56, %v5568_v2  ;;  %4415 = vst.msk [vmem:[#allocation2 + $0x170] sm:$0xff] %vm145_vm1, %v12083_v39  ;;  %v12093_v24 = vpop.f32.mrb[19].mxu0 }
 0x3c1   : > { %v5520_v28 = vmax.f32 %v5328_v17, %v5395_v57  ;;  %v5521_v33 = vmax.f32 %v5329_v59, %v5397_v55  ;;  %v5571_v44 = vsel %vm1489_vm6, %v13522_v21, %v5570_v35  ;;  %v5573_v0 = vsel %vm1489_vm6, %v5570_v35, %v13523_v11  ;;  %4413 = vst.msk [vmem:[#allocation2 + $0x150] sm:$0xff] %vm145_vm1, %v12093_v24 }
 0x3c2   : > { %5741 = vst.msk [vmem:[#allocation3 + $0x2a] sm:$0xff] %vm145_vm1, %v5693_v25  ;;  %v13524_v59 = vmax.f32 %v11936_v48, %v11928_v29  ;;  %v13525_v17 = vmax.f32 %v11952_v37, %v11928_v29  ;;  %v13526_v43 = vmax.f32 %v11894_v8, %v11961_v50  ;;  %v12122_v63 = vmax.f32 %v4825_v32, %v12045_v20  ;;  %v4314_v25 = vld [vmem:[%s10794_s22 + $0x70] sm:$0xff] }
 0x3c3   : > { %5742 = vst.msk [vmem:[#allocation3 + $0x32] sm:$0x3f] %vm1670_vm7, %v5694_v26  ;;  %v5696_v48 = vmax.f32 %v5520_v28, %v5571_v44  ;;  %v5697_v56 = vmax.f32 %v5521_v33, %v5573_v0  ;;  %v13527_v8 = vmax.f32 %v11961_v50, %v11955_v18  ;;  %v4822_v1 = vmax.f32 %v11976_v13, %v11955_v18  ;;  %v4312_v26 = vld [vmem:[%s10794_s22 + $0x60] sm:$0xff]  ;;  %v12141_v28 = vld [vmem:[#allocation2 + $0x108] sm:$0xff] }
 0x3c4   : > { %v12101_v47 = vmax.f32 %v13524_v59, %v12012_v52  ;;  %v12109_v58 = vmax.f32 %v13525_v17, %v12012_v52  ;;  %v4698_v37 = vmax.f32 %v13526_v43, %v11955_v18  ;;  %v13528_v33 = vrot.slane %v11734_v12, 1 }
 0x3c5   : > { %5744 = vst.msk [vmem:[#allocation3 + $0x4a] sm:$0xff] %vm145_vm1, %v5696_v48  ;;  %v12134_v57 = vmax.f32 %v13527_v8, %v12067_v6  ;;  %v5068_v44 = vrot.slane %v12122_v63, 1  ;;  %v5237_v11 = vrot.slane %v12122_v63, 2  ;;  %v5403_v50 = vrot.slane %v12122_v63, 3  ;;  %v12149_v0 = vpop.f32.mrb[20].mxu0 }
 0x3c6   : > { %v5063_v30 = vrot.slane %v12109_v58, 1  ;;  %v5234_v2 = vrot.slane %v12109_v58, 2  ;;  %v5398_v35 = vrot.slane %v12109_v58, 3  ;;  %5745 = vst.msk [vmem:[#allocation3 + $0x52] sm:$0x3f] %vm1670_vm7, %v5697_v56  ;;  %v4826_v55 = vmax.f32 %v4698_v37, %v12067_v6  ;;  %v12161_v48 = vpop.f32.mrb[21].mxu0 }
 0x3c7   : > { %v12154_v32 = vmax.f32 %v4822_v1, %v12067_v6  ;;  %4418 = vst.msk [vmem:[#allocation2 + $0x1a8] sm:$0xff] %vm145_vm1, %v12149_v0  ;;  %v13529_v56 = vrot.slane %v11739_v41, 1  ;;  %v4344_v37 = vadd.f32 %v4312_v26, %v12016_v62  ;;  %4416 = vst.msk [vmem:[#allocation2 + $0x188] sm:$0xff] %vm145_vm1, %v12161_v48  ;;  %v12172_v1 = vpop.f32.mrb[22].mxu0 }
 0x3c8   : > { %v5064_v21 = vsel %vm974_vm3, %v13528_v33, %v5063_v30  ;;  %v12157_v17 = vmax.f32 %v4826_v55, %v12079_v4  ;;  %4419 = vst.msk [vmem:[#allocation2 + $0x1b0] sm:$0xff] %vm145_vm1, %v12172_v1 }
 0x3c9   : > { %v5186_v13 = vmax.f32 %v11734_v12, %v5064_v21  ;;  %v5069_v43 = vsel %vm974_vm3, %v13529_v56, %v5068_v44  ;;  %v4346_v12 = vadd.f32 %v12006_v10, %v4314_v25  ;;  %v5065_v21 = vrot.slane %v12154_v32, 1  ;;  %v12179_v10 = vpop.f32.mrb[23].mxu0  ;;  %4376 = vst.msk [vmem:[%s10794_s22 + $0x60] sm:$0xff] %vm145_vm1, %v4344_v37 }
 0x3ca   : > { %v5189_v55 = vmax.f32 %v11739_v41, %v5069_v43  ;;  %v5070_v56 = vrot.slane %v12157_v17, 1  ;;  %v5235_v62 = vrot.slane %v12154_v32, 2  ;;  %v5238_v25 = vrot.slane %v12157_v17, 2  ;;  %4417 = vst.msk [vmem:[#allocation2 + $0x190] sm:$0xff] %vm145_vm1, %v12179_v10 }
 0x3cb   : > { %v5330_v33 = vmax.f32 %v5186_v13, %v5234_v2  ;;  %v5399_v26 = vrot.slane %v12154_v32, 3  ;;  %v5404_v8 = vrot.slane %v12157_v17, 3  ;;  %4378 = vst.msk [vmem:[%s10794_s22 + $0x70] sm:$0xff] %vm145_vm1, %v4346_v12  ;;  %v5066_v43 = vsel %vm974_vm3, %v5063_v30, %v5065_v21 }
 0x3cc   : > { %v5333_v41 = vmax.f32 %v5189_v55, %v5237_v11  ;;  %v5071_v22 = vsel %vm974_vm3, %v5068_v44, %v5070_v56  ;;  %v5187_v16 = vmax.f32 %v12109_v58, %v5066_v43  ;;  %v5188_v40 = vmax.f32 %v12154_v32, %v5065_v21  ;;  %v12201_v43 = vld [vmem:[#allocation2 + $0x128] sm:$0xff] }
 0x3cd   : > { %v5522_v13 = vmax.f32 %v5330_v33, %v5398_v35  ;;  %v5190_v59 = vmax.f32 %v12122_v63, %v5071_v22  ;;  %v5191_v15 = vmax.f32 %v12157_v17, %v5070_v56  ;;  %v13530_v37 = vrot.slane %v12109_v58, 4  ;;  %v12203_v21 = vpop.f32.mrb[24].mxu0 }
 0x3ce   : > { %v5525_v12 = vmax.f32 %v5333_v41, %v5403_v50  ;;  %v5236_v55 = vsel %vm1151_vm4, %v5234_v2, %v5235_v62  ;;  %v5239_v33 = vsel %vm1151_vm4, %v5237_v11, %v5238_v25  ;;  %v5332_v3 = vmax.f32 %v5188_v40, %v5235_v62  ;;  %v4315_v40 = vld [vmem:[%s10794_s22 + $0x78] sm:$0xff]  ;;  %4422 = vst.msk [vmem:[#allocation2 + $0x1e8] sm:$0xff] %vm145_vm1, %v12203_v21 }
 0x3cf   : > { %v5698_v14 = vmax.f32 %v5522_v13, %v13530_v37  ;;  %v5331_v30 = vmax.f32 %v5187_v16, %v5236_v55  ;;  %v5334_v44 = vmax.f32 %v5190_v59, %v5239_v33  ;;  %v5335_v27 = vmax.f32 %v5191_v15, %v5238_v25  ;;  %v12216_v15 = vpop.f32.mrb[25].mxu0 }
 0x3d0   : > { %v13531_v22 = vrot.slane %v12122_v63, 4  ;;  %v5400_v41 = vsel %vm1312_vm5, %v5398_v35, %v5399_v26  ;;  %v13532_v13 = vrot.slane %v11744_v54, 3  ;;  %v5405_v16 = vsel %vm1312_vm5, %v5403_v50, %v5404_v8  ;;  %4420 = vst.msk [vmem:[#allocation2 + $0x1c8] sm:$0xff] %vm145_vm1, %v12216_v15  ;;  %v12223_v25 = vpop.f32.mrb[26].mxu0 }
 0x3d1   : > { %5746 = vst.msk [vmem:[#allocation3 + $0x62] sm:$0xc0] %vm1667_vm8, %v5698_v14  ;;  %v13533_v11 = vrot.slane %v11746_v42, 3  ;;  %v5523_v62 = vmax.f32 %v5331_v30, %v5400_v41  ;;  %v5526_v35 = vmax.f32 %v5334_v44, %v5405_v16  ;;  %v4347_v33 = vadd.f32 %v12024_v19, %v4315_v40  ;;  %v4313_v30 = vld [vmem:[%s10794_s22 + $0x68] sm:$0xff]  ;;  %v12248_v44 = vld [vmem:[#allocation2 + $0x110] sm:$0xff] }
 0x3d2   : > { %v5701_v56 = vmax.f32 %v5525_v12, %v13531_v22  ;;  %v5402_v2 = vsel %vm1312_vm5, %v5399_v26, %v13532_v13  ;;  %v5575_v26 = vrot.slane %v12154_v32, 4  ;;  %v5580_v12 = vrot.slane %v12157_v17, 4  ;;  %4423 = vst.msk [vmem:[#allocation2 + $0x1f0] sm:$0xff] %vm145_vm1, %v12223_v25 }
 0x3d3   : > { %v5407_v59 = vsel %vm1312_vm5, %v5404_v8, %v13533_v11  ;;  %v5524_v14 = vmax.f32 %v5332_v3, %v5402_v2  ;;  %v12232_v3 = vpop.f32.mrb[27].mxu0  ;;  %v13534_v8 = vmax.f32 %v11928_v29, %v12012_v52  ;;  %v4829_v17 = vmax.f32 %v12101_v47, %v12045_v20  ;;  %v12264_v2 = vld [vmem:[#allocation2 + $0x130] sm:$0xff]  ;;  %4379 = vst.msk [vmem:[%s10794_s22 + $0x78] sm:$0xff] %vm145_vm1, %v4347_v33 }
 0x3d4   : > { %5749 = vst.msk [vmem:[#allocation3 + $0x82] sm:$0xc0] %vm1667_vm8, %v5701_v56  ;;  %v5527_v50 = vmax.f32 %v5335_v27, %v5407_v59  ;;  %v13535_v27 = vmax.f32 %v12012_v52, %v12045_v20  ;;  %v13536_v29 = vmov %v13530_v37  ;;  %v13537_v52 = vrot.slane %v11744_v54, 4 }
 0x3d5   : > { %v4705_v55 = vmax.f32 %v13534_v8, %v12045_v20  ;;  %4421 = vst.msk [vmem:[#allocation2 + $0x1d0] sm:$0xff] %vm145_vm1, %v12232_v3  ;;  %v5576_v22 = vsel %vm1489_vm6, %v13536_v29, %v5575_v26  ;;  %v13538_v41 = vrot.slane %v12122_v63, 4  ;;  %v13539_v19 = vrot.slane %v11746_v42, 4  ;;  %v12294_v8 = vpop.f32.mrb[28].mxu0 }
 0x3d6   : > { %v12242_v32 = vmax.f32 %v13535_v27, %v12141_v28  ;;  %v5578_v56 = vsel %vm1489_vm6, %v5575_v26, %v13537_v52  ;;  %v5699_v16 = vmax.f32 %v5523_v62, %v5576_v22  ;;  %v12270_v59 = vmax.f32 %v4829_v17, %v12141_v28  ;;  %v4318_v26 = vld [vmem:[%s10794_s22 + $0x90] sm:$0xff]  ;;  %4426 = vst.msk [vmem:[#allocation2 + $0x228] sm:$0xff] %vm145_vm1, %v12294_v8 }
 0x3d7   : > { %v5581_v47 = vsel %vm1489_vm6, %v13538_v41, %v5580_v12  ;;  %v5583_v13 = vsel %vm1489_vm6, %v5580_v12, %v13539_v19  ;;  %v5700_v40 = vmax.f32 %v5524_v14, %v5578_v56  ;;  %v4833_v54 = vmax.f32 %v4705_v55, %v12141_v28 }
 0x3d8   : > { %v5702_v11 = vmax.f32 %v5526_v35, %v5581_v47  ;;  %v5703_v58 = vmax.f32 %v5527_v50, %v5583_v13  ;;  %v4345_v63 = vadd.f32 %v4313_v30, %v12030_v38  ;;  %5747 = vst.msk [vmem:[#allocation3 + $0x6a] sm:$0xff] %vm145_vm1, %v5699_v16  ;;  %v13540_v38 = vmax.f32 %v11955_v18, %v12067_v6 }
 0x3d9   : > { %5748 = vst.msk [vmem:[#allocation3 + $0x72] sm:$0x3f] %vm1670_vm7, %v5700_v40  ;;  %v13541_v35 = vmax.f32 %v12067_v6, %v12079_v4  ;;  %v4830_v12 = vmax.f32 %v12134_v57, %v12079_v4  ;;  %v12297_v55 = vmax.f32 %v4833_v54, %v12201_v43  ;;  %v5073_v27 = vrot.slane %v12270_v59, 1  ;;  %v12306_v6 = vpop.f32.mrb[29].mxu0 }
 0x3da   : > { %5750 = vst.msk [vmem:[#allocation3 + $0x8a] sm:$0xff] %vm145_vm1, %v5702_v11  ;;  %v4706_v14 = vmax.f32 %v13540_v38, %v12079_v4  ;;  %v5240_v17 = vrot.slane %v12270_v59, 2  ;;  %v5408_v18 = vrot.slane %v12270_v59, 3  ;;  %4377 = vst.msk [vmem:[%s10794_s22 + $0x68] sm:$0xff] %vm145_vm1, %v4345_v63  ;;  %v5584_v57 = vrot.slane %v12270_v59, 4  ;;  %v12314_v22 = vpop.f32.mrb[30].mxu0 }
 0x3db   : > { %5751 = vst.msk [vmem:[#allocation3 + $0x92] sm:$0x3f] %vm1670_vm7, %v5703_v58  ;;  %v12290_v50 = vmax.f32 %v13541_v35, %v12248_v44  ;;  %13542 = vst [vmem:[#allocation20_spill] sm:$0xff] %v12306_v6  ;;  %v4958_v30 = vmax.f32 %v4830_v12, %v12248_v44  ;;  %v4350_v29 = vadd.f32 %v12055_v23, %v4318_v26  ;;  %v13544_v52 = vrot.slane %v11764_v45, 1  ;;  %v12324_v13 = vpop.f32.mrb[31].mxu0 }
 0x3dc   : > { %v4834_v33 = vmax.f32 %v4706_v14, %v12248_v44  ;;  %4424 = vst.msk [vmem:[#allocation2 + $0x208] sm:$0xff] %vm145_vm1, %v12306_v6  ;;  %13543 = vst [vmem:[#allocation21_spill] sm:$0xff] %v12314_v22  ;;  %v5078_v41 = vrot.slane %v12297_v55, 1  ;;  %v5243_v47 = vrot.slane %v12297_v55, 2  ;;  %v5413_v19 = vrot.slane %v12297_v55, 3 }
 0x3dd   : > { %v5074_v56 = vsel %vm974_vm3, %v13544_v52, %v5073_v27  ;;  %4427 = vst.msk [vmem:[#allocation2 + $0x230] sm:$0xff] %vm145_vm1, %v12314_v22  ;;  %13545 = vst [vmem:[#allocation22_spill] sm:$0xff] %v12324_v13  ;;  %v5589_v16 = vrot.slane %v12297_v55, 4  ;;  %v5075_v11 = vrot.slane %v4958_v30, 1  ;;  %v13546_v58 = vrot.slane %v11773_v31, 1 }
 0x3de   : > { %v5192_v23 = vmax.f32 %v11764_v45, %v5074_v56  ;;  %v4962_v40 = vmax.f32 %v4834_v33, %v12264_v2  ;;  %4382 = vst.msk [vmem:[%s10794_s22 + $0x90] sm:$0xff] %vm145_vm1, %v4350_v29  ;;  %4425 = vst.msk [vmem:[#allocation2 + $0x210] sm:$0xff] %vm145_vm1, %v12324_v13  ;;  %v5241_v63 = vrot.slane %v4958_v30, 2  ;;  %v5409_v26 = vrot.slane %v4958_v30, 3 }
 0x3df   : > { %v5079_v54 = vsel %vm974_vm3, %v13546_v58, %v5078_v41  ;;  %v5585_v38 = vrot.slane %v4958_v30, 4  ;;  %v5076_v35 = vsel %vm974_vm3, %v5073_v27, %v5075_v11  ;;  %v5194_v52 = vmax.f32 %v4958_v30, %v5075_v11 }
 0x3e0   : > { %v5195_v14 = vmax.f32 %v11773_v31, %v5079_v54  ;;  %v5336_v45 = vmax.f32 %v5192_v23, %v5240_v17  ;;  %v5080_v12 = vrot.slane %v4962_v40, 1  ;;  %v5193_v33 = vmax.f32 %v12270_v59, %v5076_v35 }
 0x3e1   : > { %v5242_v29 = vsel %vm1151_vm4, %v5240_v17, %v5241_v63  ;;  %v5244_v56 = vrot.slane %v4962_v40, 2  ;;  %v5338_v54 = vmax.f32 %v5194_v52, %v5241_v63  ;;  %v5410_v59 = vsel %vm1312_vm5, %v5408_v18, %v5409_v26 }
 0x3e2   : > { %v5339_v62 = vmax.f32 %v5195_v14, %v5243_v47  ;;  %v5528_v42 = vmax.f32 %v5336_v45, %v5408_v18  ;;  %v5081_v58 = vsel %vm974_vm3, %v5078_v41, %v5080_v12  ;;  %v5197_v37 = vmax.f32 %v4962_v40, %v5080_v12  ;;  %v4316_v41 = vld [vmem:[%s10794_s22 + $0x80] sm:$0xff]  ;;  %v12353_v18 = vld [vmem:[#allocation2 + $0x168] sm:$0xff] }
 0x3e3   : > { %v5196_v13 = vmax.f32 %v12297_v55, %v5081_v58  ;;  %v5245_v31 = vsel %vm1151_vm4, %v5243_v47, %v5244_v56  ;;  %v5337_v23 = vmax.f32 %v5193_v33, %v5242_v29  ;;  %v13547_v17 = vrot.slane %v11777_v36, 3  ;;  %v12355_v47 = vld [vmem:[#allocation2 + $0x148] sm:$0xff] }
 0x3e4   : > { %v5531_v27 = vmax.f32 %v5339_v62, %v5413_v19  ;;  %v5704_v22 = vmax.f32 %v5528_v42, %v5584_v57  ;;  %v5341_v6 = vmax.f32 %v5197_v37, %v5244_v56  ;;  %v5414_v14 = vrot.slane %v4962_v40, 3  ;;  %v4317_v29 = vld [vmem:[%s10794_s22 + $0x88] sm:$0xff]  ;;  %v12365_v56 = vld [vmem:[#allocation2 + $0x150] sm:$0xff] }
 0x3e5   : > { %v5340_v30 = vmax.f32 %v5196_v13, %v5245_v31  ;;  %v5412_v11 = vsel %vm1312_vm5, %v5409_v26, %v13547_v17  ;;  %v5529_v45 = vmax.f32 %v5337_v23, %v5410_v59  ;;  %v5586_v62 = vsel %vm1489_vm6, %v5584_v57, %v5585_v38  ;;  %v12376_v31 = vld [vmem:[#allocation2 + $0x170] sm:$0xff]  ;;  %v4320_v17 = vld [vmem:[%s10794_s22 + $0xa0] sm:$0xff] }
 0x3e6   : > { %v5707_v35 = vmax.f32 %v5531_v27, %v5589_v16  ;;  %5752 = vst.msk [vmem:[#allocation3 + $0xa2] sm:$0xc0] %vm1667_vm8, %v5704_v22  ;;  %v5530_v55 = vmax.f32 %v5338_v54, %v5412_v11  ;;  %v13548_v37 = vrot.slane %v11777_v36, 4  ;;  %v5415_v13 = vsel %vm1312_vm5, %v5413_v19, %v5414_v14 }
 0x3e7   : > { %v13549_v63 = vrot.slane %v11779_v61, 3  ;;  %v5590_v12 = vrot.slane %v4962_v40, 4  ;;  %v5705_v22 = vmax.f32 %v5529_v45, %v5586_v62  ;;  %v5532_v33 = vmax.f32 %v5340_v30, %v5415_v13  ;;  %v4322_v30 = vld [vmem:[%s10794_s22 + $0xb0] sm:$0xff] }
 0x3e8   : > { %v5588_v42 = vsel %vm1489_vm6, %v5585_v38, %v13548_v37  ;;  %5755 = vst.msk [vmem:[#allocation3 + $0xc2] sm:$0xc0] %vm1667_vm8, %v5707_v35  ;;  %v4348_v36 = vadd.f32 %v4316_v41, %v12071_v34  ;;  %v4319_v38 = vld [vmem:[%s10794_s22 + $0x98] sm:$0xff]  ;;  %v13550_v58 = vrot.slane %v11779_v61, 4  ;;  %v4597_v34 = vmax.f32 %v12355_v47, %v12353_v18  ;;  %v12399_v41 = vld [vmem:[#allocation2 + $0x1a8] sm:$0xff] }
 0x3e9   : > { %v5417_v26 = vsel %vm1312_vm5, %v5414_v14, %v13549_v63  ;;  %v5706_v52 = vmax.f32 %v5530_v55, %v5588_v42  ;;  %v5591_v19 = vsel %vm1489_vm6, %v5589_v16, %v5590_v12  ;;  %5753 = vst.msk [vmem:[#allocation3 + $0xaa] sm:$0xff] %vm145_vm1, %v5705_v22  ;;  %v13551_v61 = vmax.f32 %v12045_v20, %v12141_v28 }
 0x3ea   : > { %v5533_v57 = vmax.f32 %v5341_v6, %v5417_v26  ;;  %v5593_v40 = vsel %vm1489_vm6, %v5590_v12, %v13550_v58  ;;  %v4593_v6 = vmax.f32 %v12201_v43, %v12355_v47  ;;  %v5708_v23 = vmax.f32 %v5532_v33, %v5591_v19  ;;  %4380 = vst.msk [vmem:[%s10794_s22 + $0x80] sm:$0xff] %vm145_vm1, %v4348_v36 }
 0x3eb   : > { %5754 = vst.msk [vmem:[#allocation3 + $0xb2] sm:$0x3f] %vm1670_vm7, %v5706_v52  ;;  %v4713_v16 = vmax.f32 %v13551_v61, %v12201_v43  ;;  %v13552_v27 = vmax.f32 %v12141_v28, %v12201_v43  ;;  %v4837_v11 = vmax.f32 %v12242_v32, %v12201_v43  ;;  %v4351_v14 = vadd.f32 %v12083_v39, %v4319_v38  ;;  %v12401_v28 = vld [vmem:[#allocation2 + $0x188] sm:$0xff] }
 0x3ec   : > { %v5709_v54 = vmax.f32 %v5533_v57, %v5593_v40  ;;  %v4349_v20 = vadd.f32 %v4317_v29, %v12093_v24  ;;  %v4594_v45 = vmax.f32 %v12264_v2, %v12365_v56  ;;  %5756 = vst.msk [vmem:[#allocation3 + $0xca] sm:$0xff] %vm145_vm1, %v5708_v23  ;;  %v4598_v43 = vmax.f32 %v12365_v56, %v12376_v31 }
 0x3ed   : > { %v12387_v59 = vmax.f32 %v13552_v27, %v12355_v47  ;;  %v4841_v35 = vmax.f32 %v4713_v16, %v12355_v47  ;;  %v13553_v39 = vmax.f32 %v12079_v4, %v12248_v44  ;;  %v13554_v32 = vmax.f32 %v12248_v44, %v12264_v2  ;;  %4383 = vst.msk [vmem:[%s10794_s22 + $0x98] sm:$0xff] %vm145_vm1, %v4351_v14 }
 0x3ee   : > { %5757 = vst.msk [vmem:[#allocation3 + $0xd2] sm:$0x3f] %vm1670_vm7, %v5709_v54  ;;  %v12419_v62 = vmax.f32 %v4837_v11, %v12355_v47  ;;  %v4838_v37 = vmax.f32 %v12290_v50, %v12264_v2  ;;  %v4354_v4 = vadd.f32 %v12149_v0, %v4322_v30  ;;  %v4352_v42 = vadd.f32 %v4320_v17, %v12161_v48 }
 0x3ef   : > { %v4714_v24 = vmax.f32 %v13553_v39, %v12264_v2  ;;  %v12416_v55 = vmax.f32 %v13554_v32, %v12365_v56  ;;  %4381 = vst.msk [vmem:[%s10794_s22 + $0x88] sm:$0xff] %vm145_vm1, %v4349_v20  ;;  %v12430_v44 = vmax.f32 %v4841_v35, %v12353_v18  ;;  %v4601_v47 = vmax.f32 %v12353_v18, %v12401_v28 }
 0x3f0   : > { %v4605_v63 = vmax.f32 %v12401_v28, %v12399_v41  ;;  %v5083_v26 = vrot.slane %v12419_v62, 1  ;;  %v5246_v50 = vrot.slane %v12419_v62, 2  ;;  %v5418_v12 = vrot.slane %v12419_v62, 3  ;;  %4386 = vst.msk [vmem:[%s10794_s22 + $0xb0] sm:$0xff] %vm145_vm1, %v4354_v4  ;;  %4384 = vst.msk [vmem:[%s10794_s22 + $0xa0] sm:$0xff] %vm145_vm1, %v4352_v42 }
 0x3f1   : > { %v4842_v13 = vmax.f32 %v4714_v24, %v12365_v56  ;;  %v5594_v0 = vrot.slane %v12419_v62, 4  ;;  %v5088_v48 = vrot.slane %v12430_v44, 1  ;;  %v5249_v22 = vrot.slane %v12430_v44, 2 }
 0x3f2   : > { %v5423_v33 = vrot.slane %v12430_v44, 3  ;;  %v5599_v57 = vrot.slane %v12430_v44, 4  ;;  %v13555_v52 = vrot.slane %v11784_v51, 1  ;;  %v4966_v38 = vmax.f32 %v4838_v37, %v12365_v56 }
 0x3f3   : > { %v4970_v29 = vmax.f32 %v4842_v13, %v12376_v31  ;;  %v4721_v19 = vmax.f32 %v4593_v6, %v12353_v18  ;;  %v13556_v58 = vrot.slane %v11786_v60, 1  ;;  %v12460_v54 = vmax.f32 %v4597_v34, %v12401_v28 }
 0x3f4   : > { %v5084_v36 = vsel %vm974_vm3, %v13555_v52, %v5083_v26  ;;  %v4845_v61 = vmax.f32 %v12387_v59, %v12353_v18  ;;  %v5085_v27 = vrot.slane %v4966_v38, 1  ;;  %v5247_v17 = vrot.slane %v4966_v38, 2 }
 0x3f5   : > { %v5089_v40 = vsel %vm974_vm3, %v13556_v58, %v5088_v48  ;;  %v5198_v23 = vmax.f32 %v11784_v51, %v5084_v36  ;;  %v5090_v30 = vrot.slane %v4970_v29, 1  ;;  %v5250_v14 = vrot.slane %v4970_v29, 2 }
 0x3f6   : > { %v5201_v16 = vmax.f32 %v11786_v60, %v5089_v40  ;;  %v5419_v6 = vrot.slane %v4966_v38, 3  ;;  %v5424_v20 = vrot.slane %v4970_v29, 3  ;;  %v5086_v39 = vsel %vm974_vm3, %v5083_v26, %v5085_v27 }
 0x3f7   : > { %v5342_v11 = vmax.f32 %v5198_v23, %v5246_v50  ;;  %v5091_v51 = vsel %vm974_vm3, %v5088_v48, %v5090_v30  ;;  %v5200_v24 = vmax.f32 %v4966_v38, %v5085_v27  ;;  %v5199_v32 = vmax.f32 %v12419_v62, %v5086_v39  ;;  %v4321_v27 = vld [vmem:[%s10794_s22 + $0xa8] sm:$0xff] }
 0x3f8   : > { %v5345_v35 = vmax.f32 %v5201_v16, %v5249_v22  ;;  %v5202_v60 = vmax.f32 %v12430_v44, %v5091_v51  ;;  %v5203_v59 = vmax.f32 %v4970_v29, %v5090_v30  ;;  %v5248_v4 = vsel %vm1151_vm4, %v5246_v50, %v5247_v17  ;;  %v4323_v16 = vld [vmem:[%s10794_s22 + $0xb8] sm:$0xff]  ;;  %v12478_v30 = vld [vmem:[#allocation2 + $0x190] sm:$0xff] }
 0x3f9   : > { %v5534_v34 = vmax.f32 %v5342_v11, %v5418_v12  ;;  %v5251_v42 = vsel %vm1151_vm4, %v5249_v22, %v5250_v14  ;;  %v5344_v13 = vmax.f32 %v5200_v24, %v5247_v17  ;;  %v5343_v36 = vmax.f32 %v5199_v32, %v5248_v4  ;;  %v5840_v4 = vld [vmem:[#allocation3 + $0x28] sm:$0xff] }
 0x3fa   : > { %v5537_v37 = vmax.f32 %v5345_v35, %v5423_v33  ;;  %v5346_v26 = vmax.f32 %v5202_v60, %v5251_v42  ;;  %v5347_v58 = vmax.f32 %v5203_v59, %v5250_v14  ;;  %v5420_v40 = vsel %vm1312_vm5, %v5418_v12, %v5419_v6  ;;  %v12501_v60 = vld [vmem:[#allocation2 + $0x1b0] sm:$0xff] }
 0x3fb   : > { %v5710_v52 = vmax.f32 %v5534_v34, %v5594_v0  ;;  %v13557_v23 = vrot.slane %v11788_v7, 3  ;;  %v5425_v44 = vsel %vm1312_vm5, %v5423_v33, %v5424_v20  ;;  %v13558_v50 = vrot.slane %v11790_v49, 3  ;;  %v4326_v42 = vld [vmem:[%s10794_s22 + $0xd0] sm:$0xff] }
 0x3fc   : > { %v5713_v48 = vmax.f32 %v5537_v37, %v5599_v57  ;;  %v5535_v17 = vmax.f32 %v5343_v36, %v5420_v40  ;;  %v5538_v14 = vmax.f32 %v5346_v26, %v5425_v44  ;;  %v5595_v35 = vrot.slane %v4966_v38, 4  ;;  %v5843_v40 = vld [vmem:[#allocation3 + $0x50] sm:$0xff] }
 0x3fd   : > { %v5422_v62 = vsel %vm1312_vm5, %v5419_v6, %v13557_v23  ;;  %5758 = vst.msk [vmem:[#allocation3 + $0xe2] sm:$0xc0] %vm1667_vm8, %v5710_v52  ;;  %v5427_v22 = vsel %vm1312_vm5, %v5424_v20, %v13558_v50  ;;  %v5600_v6 = vrot.slane %v4970_v29, 4  ;;  %v4849_v33 = vmax.f32 %v4721_v19, %v12401_v28  ;;  %v4324_v50 = vld [vmem:[%s10794_s22 + $0xc0] sm:$0xff] }
 0x3fe   : > { %v5536_v11 = vmax.f32 %v5344_v13, %v5422_v62  ;;  %5761 = vst.msk [vmem:[#allocation3 + $0x102] sm:$0xc0] %vm1667_vm8, %v5713_v48  ;;  %v5539_v12 = vmax.f32 %v5347_v58, %v5427_v22  ;;  %v12487_v39 = vmax.f32 %v4845_v61, %v12401_v28  ;;  %v4355_v51 = vadd.f32 %v12172_v1, %v4323_v16  ;;  %v5841_v58 = vld [vmem:[#allocation3 + $0x30] sm:$0xff]  ;;  %v5842_v48 = vld [vmem:[#allocation3 + $0x48] sm:$0xff] }
 0x3ff   : > { %v4353_v24 = vadd.f32 %v4321_v27, %v12179_v10  ;;  %v4602_v20 = vmax.f32 %v12376_v31, %v12478_v30  ;;  %v5596_v34 = vsel %vm1489_vm6, %v5594_v0, %v5595_v35  ;;  %v13559_v32 = vrot.slane %v11788_v7, 4  ;;  %v12543_v22 = vld [vmem:[#allocation2 + $0x1c8] sm:$0xff] }
 0x400   : > { %v5601_v29 = vsel %vm1489_vm6, %v5599_v57, %v5600_v6  ;;  %v13560_v19 = vrot.slane %v11790_v49, 4  ;;  %v5711_v1 = vmax.f32 %v5535_v17, %v5596_v34  ;;  %4387 = vst.msk [vmem:[%s10794_s22 + $0xb8] sm:$0xff] %vm145_vm1, %v4355_v51  ;;  %v12508_v7 = vmax.f32 %v4849_v33, %v12399_v41  ;;  %v12557_v51 = vld [vmem:[%s13459_s1 + $0x16] sm:$0x3] }
 0x401   : > { %v5598_v38 = vsel %vm1489_vm6, %v5595_v35, %v13559_v32  ;;  %v5714_v59 = vmax.f32 %v5538_v14, %v5601_v29  ;;  %4385 = vst.msk [vmem:[%s10794_s22 + $0xa8] sm:$0xff] %vm145_vm1, %v4353_v24  ;;  %v5093_v0 = vrot.slane %v12487_v39, 1  ;;  %v5252_v57 = vrot.slane %v12487_v39, 2 }
 0x402   : > { %v5603_v61 = vsel %vm1489_vm6, %v5600_v6, %v13560_v19  ;;  %v5712_v10 = vmax.f32 %v5536_v11, %v5598_v38  ;;  %v5428_v49 = vrot.slane %v12487_v39, 3  ;;  %5759 = vst.msk [vmem:[#allocation3 + $0xea] sm:$0xff] %vm145_vm1, %v5711_v1  ;;  %v5604_v13 = vrot.slane %v12487_v39, 4 }
 0x403   : > { %v5715_v37 = vmax.f32 %v5539_v12, %v5603_v61  ;;  %5762 = vst.msk [vmem:[#allocation3 + $0x10a] sm:$0xff] %vm145_vm1, %v5714_v59  ;;  %v4606_v52 = vmax.f32 %v12478_v30, %v12501_v60  ;;  %v4722_v36 = vmax.f32 %v4594_v45, %v12376_v31  ;;  %v12529_v26 = vmax.f32 %v4598_v43, %v12478_v30 }
 0x404   : > { %5760 = vst.msk [vmem:[#allocation3 + $0xf2] sm:$0x3f] %vm1670_vm7, %v5712_v10  ;;  %v13561_v23 = vrot.slane %v11796_v46, 1  ;;  %v5098_v44 = vrot.slane %v12508_v7, 1  ;;  %v5255_v16 = vrot.slane %v12508_v7, 2  ;;  %v5433_v2 = vrot.slane %v12508_v7, 3 }
 0x405   : > { %5763 = vst.msk [vmem:[#allocation3 + $0x112] sm:$0x3f] %vm1670_vm7, %v5715_v37  ;;  %v5609_v56 = vrot.slane %v12508_v7, 4  ;;  %v4846_v43 = vmax.f32 %v12416_v55, %v12376_v31  ;;  %v4850_v27 = vmax.f32 %v4722_v36, %v12478_v30  ;;  %v13562_v17 = vrot.slane %v11800_v5, 1 }
 0x406   : > { %v5094_v62 = vsel %vm974_vm3, %v13561_v23, %v5093_v0  ;;  %v5871_v14 = vpack.c.bf16 %v5841_v58, %v5840_v4  ;;  %v5872_v12 = vpack.c.bf16 %v5843_v40, %v5842_v48  ;;  %v4358_v35 = vadd.f32 %v12203_v21, %v4326_v42 }
 0x407   : > { %v5204_v45 = vmax.f32 %v11796_v46, %v5094_v62  ;;  %v5099_v11 = vsel %vm974_vm3, %v13562_v17, %v5098_v44  ;;  %v4974_v55 = vmax.f32 %v4846_v43, %v12478_v30  ;;  %v4978_v33 = vmax.f32 %v4850_v27, %v12501_v60  ;;  %v4327_v17 = vld [vmem:[%s10794_s22 + $0xd8] sm:$0xff] }
 0x408   : > { %v5207_v46 = vmax.f32 %v11800_v5, %v5099_v11  ;;  %9454 = vmatmul.mubr.msk.bf16.vlgmr.msra.gmra.mrb[0].mxu1 %vm145_vm1, %v5871_v14  ;;  %4390 = vst.msk [vmem:[%s10794_s22 + $0xd0] sm:$0xff] %vm145_vm1, %v4358_v35  ;;  %v4356_v21 = vadd.f32 %v4324_v50, %v12216_v15  ;;  %v4609_v5 = vmax.f32 %v12399_v41, %v12543_v22  ;;  %v4325_v35 = vld [vmem:[%s10794_s22 + $0xc8] sm:$0xff] }
 0x409   : > { %v5348_v6 = vmax.f32 %v5204_v45, %v5252_v57  ;;  %v4729_v24 = vmax.f32 %v4601_v47, %v12399_v41  ;;  %v12573_v34 = vmax.f32 %v4605_v63, %v12543_v22  ;;  %v5095_v29 = vrot.slane %v4974_v55, 1  ;;  %9486 = vmatpush3.bf16.msra.mxu1 %v11842_v53  ;;  %9457 = vmatprep.mubr.msk.bf16.mxu1 %vm145_vm1, %v5872_v12 }
 0x40a   : > { %v5351_v32 = vmax.f32 %v5207_v46, %v5255_v16  ;;  %v5100_v15 = vrot.slane %v4978_v33, 1  ;;  %v5253_v19 = vrot.slane %v4974_v55, 2  ;;  %v5256_v61 = vrot.slane %v4978_v33, 2  ;;  %4388 = vst.msk [vmem:[%s10794_s22 + $0xc0] sm:$0xff] %vm145_vm1, %v4356_v21  ;;  %10280 = vmatprep.subr.msk.bf16.mxu1 %vm1864_vm0, %v12557_v51 }
 0x40b   : > { %v5540_v38 = vmax.f32 %v5348_v6, %v5428_v49  ;;  %v5429_v18 = vrot.slane %v4974_v55, 3  ;;  %v5434_v47 = vrot.slane %v4978_v33, 3  ;;  %v5096_v1 = vsel %vm974_vm3, %v5093_v0, %v5095_v29 }
 0x40c   : > { %v5543_v28 = vmax.f32 %v5351_v32, %v5433_v2  ;;  %v5101_v10 = vsel %vm974_vm3, %v5098_v44, %v5100_v15  ;;  %v5205_v53 = vmax.f32 %v12487_v39, %v5096_v1  ;;  %v5206_v59 = vmax.f32 %v4974_v55, %v5095_v29 }
 0x40d   : > { %v5716_v63 = vmax.f32 %v5540_v38, %v5604_v13  ;;  %v5208_v37 = vmax.f32 %v12508_v7, %v5101_v10  ;;  %v5209_v4 = vmax.f32 %v4978_v33, %v5100_v15  ;;  %v5254_v36 = vsel %vm1151_vm4, %v5252_v57, %v5253_v19  ;;  %v13564_v57 = vld [vmem:[#allocation4_spill] sm:$0xff]  ;;  %v5846_v10 = vld [vmem:[#allocation3 + $0x88] sm:$0xff] }
 0x40e   : > { %v5719_v42 = vmax.f32 %v5543_v28, %v5609_v56  ;;  %v5257_v0 = vsel %vm1151_vm4, %v5255_v16, %v5256_v61  ;;  %v5430_v58 = vsel %vm1312_vm5, %v5428_v49, %v5429_v18  ;;  %v5349_v48 = vmax.f32 %v5205_v53, %v5254_v36  ;;  %v5847_v53 = vld [vmem:[#allocation3 + $0x90] sm:$0xff] }
 0x40f   : > { %5764 = vst.msk [vmem:[#allocation3 + $0x122] sm:$0xc0] %vm1667_vm8, %v5716_v63  ;;  %v5350_v40 = vmax.f32 %v5206_v59, %v5253_v19  ;;  %v5352_v23 = vmax.f32 %v5208_v37, %v5257_v0  ;;  %v5353_v62 = vmax.f32 %v5209_v4, %v5256_v61  ;;  %v13563_v44 = vrot.slane %v11802_v9, 3  ;;  %v4330_v36 = vld [vmem:[%s10794_s22 + $0xf0] sm:$0xff]  ;;  %v13568_v0 = vld [vmem:[#allocation5_spill] sm:$0xff] }
 0x410   : > { %5767 = vst.msk [vmem:[#allocation3 + $0x142] sm:$0xc0] %vm1667_vm8, %v5719_v42  ;;  %v5435_v43 = vsel %vm1312_vm5, %v5433_v2, %v5434_v47  ;;  %v13565_v27 = vrot.slane %v13564_v57, 3  ;;  %v5605_v50 = vrot.slane %v4974_v55, 4  ;;  %v5541_v11 = vmax.f32 %v5349_v48, %v5430_v58  ;;  %v12617_v55 = vld [vmem:[#allocation2 + $0x1d0] sm:$0xff] }
 0x411   : > { %v5432_v45 = vsel %vm1312_vm5, %v5429_v18, %v13563_v44  ;;  %v5544_v14 = vmax.f32 %v5352_v23, %v5435_v43  ;;  %v13566_v6 = vrot.slane %v11802_v9, 4  ;;  %v5610_v2 = vrot.slane %v4978_v33, 4  ;;  %v12627_v33 = vld [vmem:[#allocation2 + $0x1e8] sm:$0xff]  ;;  %v4328_v44 = vld [vmem:[%s10794_s22 + $0xe0] sm:$0xff]  ;;  %v13570_v43 = vld [vmem:[#allocation6_spill] sm:$0xff] }
 0x412   : > { %v5437_v16 = vsel %vm1312_vm5, %v5434_v47, %v13565_v27  ;;  %v5542_v49 = vmax.f32 %v5350_v40, %v5432_v45  ;;  %v5606_v46 = vsel %vm1489_vm6, %v5604_v13, %v5605_v50  ;;  %v4853_v32 = vmax.f32 %v12460_v54, %v12399_v41  ;;  %v5845_v47 = vld [vmem:[#allocation3 + $0x70] sm:$0xff]  ;;  %v12671_v45 = vld [vmem:[#allocation2 + $0x208] sm:$0xff] }
 0x413   : > { %v5545_v12 = vmax.f32 %v5353_v62, %v5437_v16  ;;  %v5608_v21 = vsel %vm1489_vm6, %v5605_v50, %v13566_v6  ;;  %v5717_v38 = vmax.f32 %v5541_v11, %v5606_v46  ;;  %v4857_v15 = vmax.f32 %v4729_v24, %v12543_v22  ;;  %v12681_v11 = vld [vmem:[#allocation2 + $0x1f0] sm:$0xff] }
 0x414   : > { %v5718_v29 = vmax.f32 %v5542_v49, %v5608_v21  ;;  %v4359_v19 = vadd.f32 %v12223_v25, %v4327_v17  ;;  %v5611_v39 = vsel %vm1489_vm6, %v5609_v56, %v5610_v2  ;;  %v13567_v9 = vrot.slane %v13564_v57, 4  ;;  %v5844_v56 = vld [vmem:[#allocation3 + $0x68] sm:$0xff]  ;;  %v13572_v49 = vld [vmem:[#allocation20_spill] sm:$0xff] }
 0x415   : > { %v12630_v54 = vmax.f32 %v4853_v32, %v12543_v22  ;;  %v4357_v61 = vadd.f32 %v4325_v35, %v12232_v3  ;;  %v5720_v18 = vmax.f32 %v5544_v14, %v5611_v39  ;;  %5765 = vst.msk [vmem:[#allocation3 + $0x12a] sm:$0xff] %vm145_vm1, %v5717_v38  ;;  %v12636_v25 = vmax.f32 %v4857_v15, %v12627_v33 }
 0x416   : > { %v5613_v13 = vsel %vm1489_vm6, %v5610_v2, %v13567_v9  ;;  %5766 = vst.msk [vmem:[#allocation3 + $0x132] sm:$0x3f] %vm1670_vm7, %v5718_v29  ;;  %v4610_v7 = vmax.f32 %v12501_v60, %v12617_v55  ;;  %v13569_v58 = vrot.slane %v13568_v0, 1  ;;  %v4730_v40 = vmax.f32 %v4602_v20, %v12501_v60 }
 0x417   : > { %v5721_v24 = vmax.f32 %v5545_v12, %v5613_v13  ;;  %4391 = vst.msk [vmem:[%s10794_s22 + $0xd8] sm:$0xff] %vm145_vm1, %v4359_v19  ;;  %v5103_v28 = vrot.slane %v12630_v54, 1  ;;  %v5258_v3 = vrot.slane %v12630_v54, 2  ;;  %v5438_v63 = vrot.slane %v12630_v54, 3  ;;  %4389 = vst.msk [vmem:[%s10794_s22 + $0xc8] sm:$0xff] %vm145_vm1, %v4357_v61 }
 0x418   : > { %v5614_v1 = vrot.slane %v12630_v54, 4  ;;  %5768 = vst.msk [vmem:[#allocation3 + $0x14a] sm:$0xff] %vm145_vm1, %v5720_v18  ;;  %v5108_v59 = vrot.slane %v12636_v25, 1  ;;  %v5261_v37 = vrot.slane %v12636_v25, 2  ;;  %v5443_v4 = vrot.slane %v12636_v25, 3 }
 0x419   : > { %5769 = vst.msk [vmem:[#allocation3 + $0x152] sm:$0x3f] %vm1670_vm7, %v5721_v24  ;;  %v5619_v42 = vrot.slane %v12636_v25, 4  ;;  %v5104_v48 = vsel %vm974_vm3, %v13569_v58, %v5103_v28  ;;  %v12666_v23 = vmax.f32 %v4606_v52, %v12617_v55  ;;  %v4854_v62 = vmax.f32 %v12529_v26, %v12501_v60 }
 0x41a   : > { %v13571_v57 = vrot.slane %v13570_v43, 1  ;;  %v5210_v16 = vmax.f32 %v13568_v0, %v5104_v48  ;;  %v5873_v31 = vpack.c.bf16 %v5845_v47, %v5844_v56  ;;  %v5874_v20 = vpack.c.bf16 %v5847_v53, %v5846_v10 }
 0x41b   : > { %v4858_v30 = vmax.f32 %v4730_v40, %v12617_v55  ;;  %v4982_v52 = vmax.f32 %v4854_v62, %v12617_v55  ;;  %v4362_v26 = vadd.f32 %v12294_v8, %v4330_v36  ;;  %v4360_v14 = vadd.f32 %v4328_v44, %v13572_v49  ;;  %v13573_v36 = vld [vmem:[#allocation7_spill] sm:$0xff]  ;;  %v4329_v49 = vld [vmem:[%s10794_s22 + $0xe8] sm:$0xff] }
 0x41c   : > { %v5109_v27 = vsel %vm974_vm3, %v13571_v57, %v5108_v59  ;;  %v5354_v17 = vmax.f32 %v5210_v16, %v5258_v3  ;;  %9458 = vmatmul.mubr.msk.bf16.gmra.mrb[4].mxu1 %vm145_vm1, %v5873_v31  ;;  %v4613_v12 = vmax.f32 %v12543_v22, %v12627_v33  ;;  %v4617_v35 = vmax.f32 %v12627_v33, %v12671_v45  ;;  %v13576_v57 = vld [vmem:[#allocation8_spill] sm:$0xff] }
 0x41d   : > { %v5213_v50 = vmax.f32 %v13570_v43, %v5109_v27  ;;  %v4986_v6 = vmax.f32 %v4858_v30, %v12681_v11  ;;  %v5105_v21 = vrot.slane %v4982_v52, 1  ;;  %v5259_v2 = vrot.slane %v4982_v52, 2  ;;  %9461 = vmatprep.mubr.msk.bf16.mxu1 %vm145_vm1, %v5874_v20  ;;  %4394 = vst.msk [vmem:[%s10794_s22 + $0xf0] sm:$0xff] %vm145_vm1, %v4362_v26  ;;  %4392 = vst.msk [vmem:[%s10794_s22 + $0xe0] sm:$0xff] %vm145_vm1, %v4360_v14  ;;  %v4681_v26 = vld [vmem:[#allocation2 + $0x228] sm:$0xff] }
 0x41e   : > { %v5546_v8 = vmax.f32 %v5354_v17, %v5438_v63  ;;  %v5439_v32 = vrot.slane %v4982_v52, 3  ;;  %v5615_v38 = vrot.slane %v4982_v52, 4  ;;  %v4737_v29 = vmax.f32 %v4609_v5, %v12627_v33  ;;  %v4809_v17 = vld [vmem:[#allocation2 + $0x248] sm:$0xff] }
 0x41f   : > { %v5357_v46 = vmax.f32 %v5213_v50, %v5261_v37  ;;  %v5106_v19 = vsel %vm974_vm3, %v5103_v28, %v5105_v21  ;;  %v5110_v39 = vrot.slane %v4986_v6, 1  ;;  %v5212_v9 = vmax.f32 %v4982_v52, %v5105_v21 }
 0x420   : > { %v5722_v13 = vmax.f32 %v5546_v8, %v5614_v1  ;;  %v5211_v61 = vmax.f32 %v12630_v54, %v5106_v19  ;;  %v5260_v18 = vsel %vm1151_vm4, %v5258_v3, %v5259_v2  ;;  %v5262_v24 = vrot.slane %v4986_v6, 2  ;;  %v4331_v54 = vld [vmem:[%s10794_s22 + $0xf8] sm:$0xff] }
 0x421   : > { %v5549_v15 = vmax.f32 %v5357_v46, %v5443_v4  ;;  %v5111_v41 = vsel %vm974_vm3, %v5108_v59, %v5110_v39  ;;  %v5215_v22 = vmax.f32 %v4986_v6, %v5110_v39  ;;  %v5356_v5 = vmax.f32 %v5212_v9, %v5259_v2 }
 0x422   : > { %5770 = vst.msk [vmem:[#allocation3 + $0x162] sm:$0xc0] %vm1667_vm8, %v5722_v13  ;;  %v5214_v47 = vmax.f32 %v12636_v25, %v5111_v41  ;;  %v5263_v28 = vsel %vm1151_vm4, %v5261_v37, %v5262_v24  ;;  %v5355_v10 = vmax.f32 %v5211_v61, %v5260_v18  ;;  %v5440_v53 = vsel %vm1312_vm5, %v5438_v63, %v5439_v32 }
 0x423   : > { %v5725_v56 = vmax.f32 %v5549_v15, %v5619_v42  ;;  %v5359_v3 = vmax.f32 %v5215_v22, %v5262_v24  ;;  %v13574_v0 = vrot.slane %v13573_v36, 3  ;;  %v5444_v59 = vrot.slane %v4986_v6, 3  ;;  %v13579_v15 = vld [vmem:[#allocation21_spill] sm:$0xff] }
 0x424   : > { %v5616_v48 = vsel %vm1489_vm6, %v5614_v1, %v5615_v38  ;;  %v5358_v40 = vmax.f32 %v5214_v47, %v5263_v28  ;;  %v5547_v62 = vmax.f32 %v5355_v10, %v5440_v53  ;;  %v13575_v44 = vrot.slane %v13573_v36, 4  ;;  %v13581_v47 = vld [vmem:[#allocation9_spill] sm:$0xff] }
 0x425   : > { %5773 = vst.msk [vmem:[#allocation3 + $0x182] sm:$0xc0] %vm1667_vm8, %v5725_v56  ;;  %v5442_v58 = vsel %vm1312_vm5, %v5439_v32, %v13574_v0  ;;  %v5445_v43 = vsel %vm1312_vm5, %v5443_v4, %v5444_v59  ;;  %v13577_v27 = vrot.slane %v13576_v57, 3  ;;  %v5620_v31 = vrot.slane %v4986_v6, 4  ;;  %v12736_v6 = vld [vmem:[#allocation2 + $0x210] sm:$0xff] }
 0x426   : > { %v5548_v37 = vmax.f32 %v5356_v5, %v5442_v58  ;;  %v5618_v63 = vsel %vm1489_vm6, %v5615_v38, %v13575_v44  ;;  %v4741_v20 = vmax.f32 %v4613_v12, %v12671_v45  ;;  %v5550_v50 = vmax.f32 %v5358_v40, %v5445_v43  ;;  %v13583_v0 = vld [vmem:[#allocation10_spill] sm:$0xff] }
 0x427   : > { %v5447_v16 = vsel %vm1312_vm5, %v5444_v59, %v13577_v27  ;;  %v5723_v30 = vmax.f32 %v5547_v62, %v5616_v48  ;;  %v5621_v14 = vsel %vm1489_vm6, %v5619_v42, %v5620_v31  ;;  %v13578_v4 = vrot.slane %v13576_v57, 4  ;;  %v4937_v42 = vld [vmem:[#allocation2 + $0x268] sm:$0xff]  ;;  %v13585_v48 = vld [vmem:[#allocation11_spill] sm:$0xff] }
 0x428   : > { %v5551_v1 = vmax.f32 %v5359_v3, %v5447_v16  ;;  %v5724_v52 = vmax.f32 %v5548_v37, %v5618_v63  ;;  %v4745_v21 = vmax.f32 %v4617_v35, %v4681_v26  ;;  %v4861_v12 = vmax.f32 %v12573_v34, %v12627_v33  ;;  %v13580_v33 = vld [vmem:[#allocation22_spill] sm:$0xff]  ;;  %v13587_v63 = vld [vmem:[#allocation12_spill] sm:$0xff] }
 0x429   : > { %v5623_v46 = vsel %vm1489_vm6, %v5620_v31, %v13578_v4  ;;  %v5726_v2 = vmax.f32 %v5550_v50, %v5621_v14  ;;  %5771 = vst.msk [vmem:[#allocation3 + $0x16a] sm:$0xff] %vm145_vm1, %v5723_v30  ;;  %v4865_v25 = vmax.f32 %v4737_v29, %v12671_v45  ;;  %v4869_v32 = vmax.f32 %v4741_v20, %v4681_v26  ;;  %v4682_v4 = vld [vmem:[#allocation2 + $0x230] sm:$0xff] }
 0x42a   : > { %v5727_v8 = vmax.f32 %v5551_v1, %v5623_v46  ;;  %5772 = vst.msk [vmem:[#allocation3 + $0x172] sm:$0x3f] %vm1670_vm7, %v5724_v52  ;;  %v4873_v38 = vmax.f32 %v4745_v21, %v4809_v17  ;;  %v12742_v35 = vmax.f32 %v4861_v12, %v12671_v45  ;;  %v4363_v34 = vadd.f32 %v13579_v15, %v4331_v54  ;;  %v4810_v12 = vld [vmem:[#allocation2 + $0x250] sm:$0xff] }
 0x42b   : > { %v4361_v19 = vadd.f32 %v4329_v49, %v13580_v33  ;;  %5774 = vst.msk [vmem:[#allocation3 + $0x18a] sm:$0xff] %vm145_vm1, %v5726_v2  ;;  %v12748_v39 = vmax.f32 %v4865_v25, %v4681_v26  ;;  %v12750_v9 = vmax.f32 %v4869_v32, %v4809_v17  ;;  %v4614_v29 = vmax.f32 %v12617_v55, %v12681_v11  ;;  %v4811_v2 = vld [vmem:[#allocation2 + $0x258] sm:$0x3] }
 0x42c   : > { %5775 = vst.msk [vmem:[#allocation3 + $0x192] sm:$0x3f] %vm1670_vm7, %v5727_v8  ;;  %v4618_v13 = vmax.f32 %v12681_v11, %v12736_v6  ;;  %v12756_v45 = vmax.f32 %v4873_v38, %v4937_v42  ;;  %v5113_v61 = vrot.slane %v12742_v35, 1  ;;  %v5264_v18 = vrot.slane %v12742_v35, 2  ;;  %v4927_v38 = vld [vmem:[#allocation2 + $0x218] sm:$0x3] }
 0x42d   : > { %v5448_v24 = vrot.slane %v12742_v35, 3  ;;  %4395 = vst.msk [vmem:[%s10794_s22 + $0xf8] sm:$0xff] %vm145_vm1, %v4363_v34  ;;  %4393 = vst.msk [vmem:[%s10794_s22 + $0xe8] sm:$0xff] %vm145_vm1, %v4361_v19  ;;  %v5118_v56 = vrot.slane %v12748_v39, 1  ;;  %v5123_v41 = vrot.slane %v12750_v9, 1  ;;  %v5267_v22 = vrot.slane %v12748_v39, 2 }
 0x42e   : > { %v5270_v5 = vrot.slane %v12750_v9, 2  ;;  %v13582_v28 = vrot.slane %v13581_v47, 1  ;;  %v5128_v53 = vrot.slane %v12756_v45, 1  ;;  %v5273_v3 = vrot.slane %v12756_v45, 2  ;;  %v4931_v34 = vld [vmem:[#allocation2 + $0x238] sm:$0x3] }
 0x42f   : > { %v5453_v36 = vrot.slane %v12748_v39, 3  ;;  %v13584_v58 = vrot.slane %v13583_v0, 1  ;;  %v13586_v40 = vrot.slane %v13585_v48, 1  ;;  %v5458_v44 = vrot.slane %v12750_v9, 3  ;;  %v4935_v33 = vld [vmem:[#allocation2 + $0x258] sm:$0x3] }
 0x430   : > { %v5114_v10 = vsel %vm974_vm3, %v13582_v28, %v5113_v61  ;;  %v13588_v43 = vrot.slane %v13587_v63, 1  ;;  %v5463_v31 = vrot.slane %v12756_v45, 3  ;;  %v5624_v50 = vrot.slane %v12742_v35, 4  ;;  %v4938_v19 = vld [vmem:[#allocation2 + $0x270] sm:$0xff]  ;;  %v4939_v28 = vld [vmem:[#allocation2 + $0x278] sm:$0x3] }
 0x431   : > { %v5119_v59 = vsel %vm974_vm3, %v13584_v58, %v5118_v56  ;;  %v5124_v62 = vsel %vm974_vm3, %v13586_v40, %v5123_v41  ;;  %v5216_v37 = vmax.f32 %v13581_v47, %v5114_v10  ;;  %v5629_v1 = vrot.slane %v12748_v39, 4  ;;  %v13590_v58 = vld [vmem:[#allocation13_spill] sm:$0xff] }
 0x432   : > { %v5129_v57 = vsel %vm974_vm3, %v13588_v43, %v5128_v53  ;;  %v5219_v27 = vmax.f32 %v13583_v0, %v5119_v59  ;;  %v5222_v16 = vmax.f32 %v13585_v48, %v5124_v62  ;;  %v5634_v26 = vrot.slane %v12750_v9, 4  ;;  %v13591_v59 = vld [vmem:[#allocation14_spill] sm:$0xff] }
 0x433   : > { %v5225_v20 = vmax.f32 %v13587_v63, %v5129_v57  ;;  %v5360_v54 = vmax.f32 %v5216_v37, %v5264_v18  ;;  %v5639_v17 = vrot.slane %v12756_v45, 4  ;;  %v4738_v46 = vmax.f32 %v4610_v7, %v12681_v11  ;;  %v13593_v37 = vld [vmem:[#allocation15_spill] sm:$0xff]  ;;  %v13594_v63 = vld [vmem:[#allocation16_spill] sm:$0xff] }
 0x434   : > { %v5363_v30 = vmax.f32 %v5219_v27, %v5267_v22  ;;  %v5366_v52 = vmax.f32 %v5222_v16, %v5270_v5  ;;  %v4742_v21 = vmax.f32 %v4614_v29, %v12736_v6  ;;  %v4746_v32 = vmax.f32 %v4618_v13, %v4682_v4  ;;  %v13597_v16 = vld [vmem:[#allocation19_spill] sm:$0xff] }
 0x435   : > { %v5369_v49 = vmax.f32 %v5225_v20, %v5273_v3  ;;  %v5552_v14 = vmax.f32 %v5360_v54, %v5448_v24  ;;  %v4862_v42 = vmax.f32 %v12666_v23, %v12681_v11  ;;  %v4866_v55 = vmax.f32 %v4738_v46, %v12736_v6  ;;  %v13589_v11 = vld [vmem:[#allocation18_spill] sm:$0xff] }
 0x436   : > { %v5555_v8 = vmax.f32 %v5363_v30, %v5453_v36  ;;  %v5558_v25 = vmax.f32 %v5366_v52, %v5458_v44  ;;  %v4870_v7 = vmax.f32 %v4742_v21, %v4682_v4  ;;  %v4874_v23 = vmax.f32 %v4746_v32, %v4810_v12 }
 0x437   : > { %v5561_v15 = vmax.f32 %v5369_v49, %v5463_v31  ;;  %v5728_v60 = vmax.f32 %v5552_v14, %v5624_v50  ;;  %v4875_v47 = vmax.f32 %v13589_v11, %v4811_v2  ;;  %v12837_v0 = vmax.f32 %v4862_v42, %v12736_v6  ;;  %v13596_v6 = vld [vmem:[#allocation17_spill] sm:$0xff] }
 0x438   : > { %v5731_v29 = vmax.f32 %v5555_v8, %v5629_v1  ;;  %v5734_v13 = vmax.f32 %v5558_v25, %v5634_v26  ;;  %v13592_v48 = vmax.f32 %v13590_v58, %v13591_v59  ;;  %v12844_v62 = vmax.f32 %v4866_v55, %v4682_v4 }
 0x439   : > { %v5737_v10 = vmax.f32 %v5561_v15, %v5639_v17  ;;  %5776 = vst.msk [vmem:[#allocation3 + $0x1a2] sm:$0xc0] %vm1667_vm8, %v5728_v60  ;;  %v13595_v43 = vmax.f32 %v13593_v37, %v13594_v63  ;;  %v12853_v27 = vmax.f32 %v4870_v7, %v4810_v12  ;;  %v13598_v20 = vmax.f32 %v13596_v6, %v13597_v16 }
 0x43a   : > { %v12842_v40 = vmax.f32 %v13592_v48, %v4927_v38  ;;  %5779 = vst.msk [vmem:[#allocation3 + $0x1c2] sm:$0xc0] %vm1667_vm8, %v5731_v29  ;;  %5782 = vst.msk [vmem:[#allocation3 + $0x1e2] sm:$0xc0] %vm1667_vm8, %v5734_v13  ;;  %v12860_v30 = vmax.f32 %v4874_v23, %v4938_v19  ;;  %v12863_v52 = vmax.f32 %v4875_v47, %v4939_v28  ;;  %v5115_v49 = vrot.slane %v12837_v0, 1 }
 0x43b   : > { %v12851_v57 = vmax.f32 %v13595_v43, %v4931_v34  ;;  %v12858_v54 = vmax.f32 %v13598_v20, %v4935_v33  ;;  %5785 = vst.msk [vmem:[#allocation3 + $0x202] sm:$0xc0] %vm1667_vm8, %v5737_v10  ;;  %v5120_v14 = vrot.slane %v12844_v62, 1  ;;  %v5265_v4 = vrot.slane %v12837_v0, 2 }
 0x43c   : > { %v5125_v46 = vrot.slane %v12853_v27, 1  ;;  %v5130_v21 = vrot.slane %v12860_v30, 1  ;;  %v5268_v12 = vrot.slane %v12844_v62, 2  ;;  %v5271_v2 = vrot.slane %v12853_v27, 2 }
 0x43d   : > { %v5116_v8 = vsel %vm974_vm3, %v5113_v61, %v5115_v49  ;;  %v5121_v25 = vsel %vm974_vm3, %v5118_v56, %v5120_v14  ;;  %v5218_v32 = vmax.f32 %v12837_v0, %v5115_v49  ;;  %v5221_v42 = vmax.f32 %v12844_v62, %v5120_v14 }
 0x43e   : > { %v5126_v38 = vsel %vm974_vm3, %v5123_v41, %v5125_v46  ;;  %v5131_v15 = vsel %vm974_vm3, %v5128_v53, %v5130_v21  ;;  %v5217_v60 = vmax.f32 %v12742_v35, %v5116_v8  ;;  %v5220_v61 = vmax.f32 %v12748_v39, %v5121_v25  ;;  %v5851_v39 = vld [vmem:[#allocation3 + $0xd0] sm:$0xff] }
 0x43f   : > { %v5223_v55 = vmax.f32 %v12750_v9, %v5126_v38  ;;  %v5224_v56 = vmax.f32 %v12853_v27, %v5125_v46  ;;  %v5226_v7 = vmax.f32 %v12756_v45, %v5131_v15  ;;  %v5227_v34 = vmax.f32 %v12860_v30, %v5130_v21 }
 0x440   : > { %v5266_v41 = vsel %vm1151_vm4, %v5264_v18, %v5265_v4  ;;  %v5269_v53 = vsel %vm1151_vm4, %v5267_v22, %v5268_v12  ;;  %v5272_v33 = vsel %vm1151_vm4, %v5270_v5, %v5271_v2  ;;  %v5274_v19 = vrot.slane %v12860_v30, 2 }
 0x441   : > { %v5361_v29 = vmax.f32 %v5217_v60, %v5266_v41  ;;  %v5362_v13 = vmax.f32 %v5218_v32, %v5265_v4  ;;  %v5364_v23 = vmax.f32 %v5220_v61, %v5269_v53  ;;  %v5365_v11 = vmax.f32 %v5221_v42, %v5268_v12 }
 0x442   : > { %v5275_v47 = vsel %vm1151_vm4, %v5273_v3, %v5274_v19  ;;  %v5367_v28 = vmax.f32 %v5223_v55, %v5272_v33  ;;  %v5368_v18 = vmax.f32 %v5224_v56, %v5271_v2  ;;  %v5371_v10 = vmax.f32 %v5227_v34, %v5274_v19 }
 0x443   : > { %v5370_v58 = vmax.f32 %v5226_v7, %v5275_v47  ;;  %v5449_v22 = vrot.slane %v12837_v0, 3  ;;  %v5451_v59 = vrot.slane %v12842_v40, 3  ;;  %v5454_v5 = vrot.slane %v12844_v62, 3 }
 0x444   : > { %v5456_v48 = vrot.slane %v12851_v57, 3  ;;  %v5459_v37 = vrot.slane %v12853_v27, 3  ;;  %v5461_v63 = vrot.slane %v12858_v54, 3  ;;  %v5464_v43 = vrot.slane %v12860_v30, 3 }
 0x445   : > { %v5450_v3 = vsel %vm1312_vm5, %v5448_v24, %v5449_v22  ;;  %v5452_v6 = vsel %vm1312_vm5, %v5449_v22, %v5451_v59  ;;  %v5455_v16 = vsel %vm1312_vm5, %v5453_v36, %v5454_v5  ;;  %v5466_v20 = vrot.slane %v12863_v52, 3  ;;  %v5859_v22 = vld [vmem:[#allocation3 + $0x150] sm:$0xff] }
 0x446   : > { %v5457_v49 = vsel %vm1312_vm5, %v5454_v5, %v5456_v48  ;;  %v5460_v14 = vsel %vm1312_vm5, %v5458_v44, %v5459_v37  ;;  %v5462_v4 = vsel %vm1312_vm5, %v5459_v37, %v5461_v63  ;;  %v5465_v24 = vsel %vm1312_vm5, %v5463_v31, %v5464_v43  ;;  %v5860_v48 = vld [vmem:[#allocation3 + $0x168] sm:$0xff]  ;;  %v5861_v37 = vld [vmem:[#allocation3 + $0x170] sm:$0xff] }
 0x447   : > { %v5467_v46 = vsel %vm1312_vm5, %v5464_v43, %v5466_v20  ;;  %v5553_v21 = vmax.f32 %v5361_v29, %v5450_v3  ;;  %v5554_v12 = vmax.f32 %v5362_v13, %v5452_v6  ;;  %v5556_v2 = vmax.f32 %v5364_v23, %v5455_v16  ;;  %v5853_v13 = vld [vmem:[#allocation3 + $0xf0] sm:$0xff]  ;;  %v5854_v23 = vld [vmem:[#allocation3 + $0x108] sm:$0xff] }
 0x448   : > { %v5557_v36 = vmax.f32 %v5365_v11, %v5457_v49  ;;  %v5559_v8 = vmax.f32 %v5367_v28, %v5460_v14  ;;  %v5560_v25 = vmax.f32 %v5368_v18, %v5462_v4  ;;  %v5562_v32 = vmax.f32 %v5370_v58, %v5465_v24  ;;  %v5855_v11 = vld [vmem:[#allocation3 + $0x110] sm:$0xff]  ;;  %v5856_v18 = vld [vmem:[#allocation3 + $0x128] sm:$0xff] }
 0x449   : > { %v5563_v42 = vmax.f32 %v5371_v10, %v5467_v46  ;;  %v5625_v38 = vrot.slane %v12837_v0, 4  ;;  %v5627_v44 = vrot.slane %v12842_v40, 4  ;;  %v5630_v15 = vrot.slane %v12844_v62, 4  ;;  %v5848_v62 = vld [vmem:[#allocation3 + $0xa8] sm:$0xff]  ;;  %v5857_v10 = vld [vmem:[#allocation3 + $0x130] sm:$0xff] }
 0x44a   : > { %v5632_v60 = vrot.slane %v12851_v57, 4  ;;  %v5635_v31 = vrot.slane %v12853_v27, 4  ;;  %v5637_v61 = vrot.slane %v12858_v54, 4  ;;  %v5640_v55 = vrot.slane %v12860_v30, 4  ;;  %v5850_v30 = vld [vmem:[#allocation3 + $0xc8] sm:$0xff]  ;;  %v5863_v43 = vld [vmem:[#allocation3 + $0x190] sm:$0xff] }
 0x44b   : > { %v5626_v56 = vsel %vm1489_vm6, %v5624_v50, %v5625_v38  ;;  %v5628_v7 = vsel %vm1489_vm6, %v5625_v38, %v5627_v44  ;;  %v5631_v0 = vsel %vm1489_vm6, %v5629_v1, %v5630_v15  ;;  %v5642_v40 = vrot.slane %v12863_v52, 4  ;;  %v5849_v50 = vld [vmem:[#allocation3 + $0xb0] sm:$0xff]  ;;  %v5858_v58 = vld [vmem:[#allocation3 + $0x148] sm:$0xff] }
 0x44c   : > { %v5633_v57 = vsel %vm1489_vm6, %v5630_v15, %v5632_v60  ;;  %v5636_v27 = vsel %vm1489_vm6, %v5634_v26, %v5635_v31  ;;  %v5638_v54 = vsel %vm1489_vm6, %v5635_v31, %v5637_v61  ;;  %v5641_v35 = vsel %vm1489_vm6, %v5639_v17, %v5640_v55  ;;  %v5852_v17 = vld [vmem:[#allocation3 + $0xe8] sm:$0xff]  ;;  %v13015_v31 = vld [vmem:[%s13459_s1 + $0x18] sm:$0x3] }
 0x44d   : > { %v5643_v1 = vsel %vm1489_vm6, %v5640_v55, %v5642_v40  ;;  %v5729_v34 = vmax.f32 %v5553_v21, %v5626_v56  ;;  %v5730_v52 = vmax.f32 %v5554_v12, %v5628_v7  ;;  %v5732_v41 = vmax.f32 %v5556_v2, %v5631_v0  ;;  %v5862_v63 = vld [vmem:[#allocation3 + $0x188] sm:$0xff] }
 0x44e   : > { %v5733_v53 = vmax.f32 %v5557_v36, %v5633_v57  ;;  %v5735_v33 = vmax.f32 %v5559_v8, %v5636_v27  ;;  %v5736_v19 = vmax.f32 %v5560_v25, %v5638_v54  ;;  %v5738_v9 = vmax.f32 %v5562_v32, %v5641_v35  ;;  %v5788_v46 = vld [vmem:[#allocation3 + $0x7] sm:$0xff]  ;;  %v5789_v21 = vld [vmem:[#allocation3 + $0xf] sm:$0xff] }
 0x44f   : > { %v5739_v29 = vmax.f32 %v5563_v42, %v5643_v1  ;;  %5777 = vst.msk [vmem:[#allocation3 + $0x1aa] sm:$0xff] %vm145_vm1, %v5729_v34  ;;  %5780 = vst.msk [vmem:[#allocation3 + $0x1ca] sm:$0xff] %vm145_vm1, %v5732_v41  ;;  %v12956_v45 = vpack.c.bf16 %v5849_v50, %v5848_v62  ;;  %v12958_v26 = vpack.c.bf16 %v5851_v39, %v5850_v30  ;;  %v5790_v25 = vld [vmem:[#allocation3 + $0x27] sm:$0xff]  ;;  %v5791_v32 = vld [vmem:[#allocation3 + $0x2f] sm:$0xff]  ;;  %v6411_v15 = vsel %vm1864_vm0, %v12557_v51, 0 }
 0x450   : > { %5778 = vst.msk [vmem:[#allocation3 + $0x1b2] sm:$0x3f] %vm1670_vm7, %v5730_v52  ;;  %5781 = vst.msk [vmem:[#allocation3 + $0x1d2] sm:$0x3f] %vm1670_vm7, %v5733_v53  ;;  %v12969_v47 = vpack.c.bf16 %v5853_v13, %v5852_v17  ;;  %v12971_v28 = vpack.c.bf16 %v5855_v11, %v5854_v23  ;;  %v12977_v59 = vpack.c.bf16 %v5857_v10, %v5856_v18  ;;  %v5792_v42 = vld [vmem:[#allocation3 + $0x47] sm:$0xff]  ;;  %v5793_v38 = vld [vmem:[#allocation3 + $0x4f] sm:$0xff] }
 0x451   : > { %5783 = vst.msk [vmem:[#allocation3 + $0x1ea] sm:$0xff] %vm145_vm1, %v5735_v33  ;;  %5786 = vst.msk [vmem:[#allocation3 + $0x20a] sm:$0xff] %vm145_vm1, %v5738_v9  ;;  %9462 = vmatmul.mubr.msk.bf16.gmra.mrb[8].mxu1 %vm145_vm1, %v12956_v45  ;;  %v12979_v5 = vpack.c.bf16 %v5859_v22, %v5858_v58  ;;  %v12985_v3 = vpack.c.bf16 %v5861_v37, %v5860_v48  ;;  %v12987_v6 = vpack.c.bf16 %v5863_v43, %v5862_v63  ;;  %v5794_v61 = vld [vmem:[#allocation3 + $0x67] sm:$0xff]  ;;  %v5795_v55 = vld [vmem:[#allocation3 + $0x6f] sm:$0xff] }
 0x452   : > { %5784 = vst.msk [vmem:[#allocation3 + $0x1f2] sm:$0x3f] %vm1670_vm7, %v5736_v19  ;;  %5787 = vst.msk [vmem:[#allocation3 + $0x212] sm:$0x3f] %vm1670_vm7, %v5739_v29  ;;  %9465 = vmatprep.mubr.msk.bf16.mxu1 %vm145_vm1, %v12958_v26  ;;  %v5820_v36 = vpack.c.bf16 %v5789_v21, %v5788_v46  ;;  %v13006_v44 = vpack.c.bf16 %v5791_v32, %v5790_v25  ;;  %v13010_v60 = vpack.c.bf16 %v5793_v38, %v5792_v42  ;;  %v5796_v51 = vld [vmem:[#allocation3 + $0x87] sm:$0xff]  ;;  %v5797_v56 = vld [vmem:[#allocation3 + $0x8f] sm:$0xff] }
 0x453   : > { %v13023_v7 = vpack.c.bf16 %v5795_v55, %v5794_v61  ;;  %v13025_v0 = vpack.c.bf16 %v5797_v56, %v5796_v51  ;;  %v5798_v40 = vld [vmem:[#allocation3 + $0xa7] sm:$0xff]  ;;  %v5799_v62 = vld [vmem:[#allocation3 + $0xaf] sm:$0xff]  ;;  %v6705_v42 = vsel %vm1864_vm0, %v13015_v31, 0 }
 0x454   : > { %v5800_v57 = vld [vmem:[#allocation3 + $0xc7] sm:$0xff]  ;;  %v5801_v27 = vld [vmem:[#allocation3 + $0xcf] sm:$0xff]  ;;  %v13031_v54 = vpack.c.bf16 %v5799_v62, %v5798_v40 }
 0x455   : > { %v13033_v35 = vpack.c.bf16 %v5801_v27, %v5800_v57  ;;  %v5802_v50 = vld [vmem:[#allocation3 + $0xe7] sm:$0xff]  ;;  %v5803_v30 = vld [vmem:[#allocation3 + $0xef] sm:$0xff] }
 0x456   : > { %v5864_v16 = vld [vmem:[#allocation3 + $0x1a8] sm:$0xff]  ;;  %v13039_v34 = vpack.c.bf16 %v5803_v30, %v5802_v50  ;;  %v6317_v25 = vld [vmem:[#allocation3 + $0x51] sm:$0xff] }
 0x457   : > { %v5865_v20 = vld [vmem:[#allocation3 + $0x1b0] sm:$0xff]  ;;  %v5866_v49 = vld [vmem:[#allocation3 + $0x1c8] sm:$0xff] }
 0x458   : > { %v5867_v14 = vld [vmem:[#allocation3 + $0x1d0] sm:$0xff]  ;;  %v12993_v4 = vpack.c.bf16 %v5865_v20, %v5864_v16  ;;  %v5868_v12 = vld [vmem:[#allocation3 + $0x1e8] sm:$0xff] }
 0x459   : > { %9466 = vmatmul.mubr.msk.bf16.gmra.mrb[12].mxu1 %vm145_vm1, %v12969_v47  ;;  %v12995_v24 = vpack.c.bf16 %v5867_v14, %v5866_v49  ;;  %v5869_v2 = vld [vmem:[#allocation3 + $0x1f0] sm:$0xff]  ;;  %v5804_v39 = vld [vmem:[#allocation3 + $0x107] sm:$0xff] }
 0x45a   : > { %9469 = vmatprep.mubr.msk.bf16.mxu1 %vm145_vm1, %v12971_v28  ;;  %v13001_v8 = vpack.c.bf16 %v5869_v2, %v5868_v12  ;;  %v5805_v1 = vld [vmem:[#allocation3 + $0x10f] sm:$0xff]  ;;  %v5806_v41 = vld [vmem:[#allocation3 + $0x127] sm:$0xff] }
 0x45b   : > { %v13041_v52 = vpack.c.bf16 %v5805_v1, %v5804_v39  ;;  %v5807_v53 = vld [vmem:[#allocation3 + $0x12f] sm:$0xff]  ;;  %v5808_v33 = vld [vmem:[#allocation3 + $0x147] sm:$0xff] }
 0x45c   : > { %v5809_v19 = vld [vmem:[#allocation3 + $0x14f] sm:$0xff]  ;;  %v13047_v9 = vpack.c.bf16 %v5807_v53, %v5806_v41  ;;  %v5810_v17 = vld [vmem:[#allocation3 + $0x167] sm:$0xff] }
 0x45d   : > { %v13049_v29 = vpack.c.bf16 %v5809_v19, %v5808_v33  ;;  %v5811_v13 = vld [vmem:[#allocation3 + $0x16f] sm:$0xff]  ;;  %v5812_v23 = vld [vmem:[#allocation3 + $0x187] sm:$0xff] }
 0x45e   : > { %v5813_v11 = vld [vmem:[#allocation3 + $0x18f] sm:$0xff]  ;;  %v13055_v18 = vpack.c.bf16 %v5811_v13, %v5810_v17  ;;  %v5814_v58 = vld [vmem:[#allocation3 + $0x1a7] sm:$0xff] }
 0x45f   : > { %v13057_v10 = vpack.c.bf16 %v5813_v11, %v5812_v23  ;;  %v5815_v22 = vld [vmem:[#allocation3 + $0x1af] sm:$0xff]  ;;  %v5816_v48 = vld [vmem:[#allocation3 + $0x1c7] sm:$0xff] }
 0x460   : > { %v5817_v37 = vld [vmem:[#allocation3 + $0x1cf] sm:$0xff]  ;;  %v13063_v63 = vpack.c.bf16 %v5815_v22, %v5814_v58  ;;  %v5818_v49 = vld [vmem:[#allocation3 + $0x1e7] sm:$0xff] }
 0x461   : > { %9470 = vmatmul.mubr.msk.bf16.gmra.mrb[16].mxu1 %vm145_vm1, %v12977_v59  ;;  %v13065_v43 = vpack.c.bf16 %v5817_v37, %v5816_v48  ;;  %v6312_v16 = vld [vmem:[#allocation3 + $0x9] sm:$0xff]  ;;  %v6313_v20 = vld [vmem:[#allocation3 + $0x11] sm:$0xff] }
 0x462   : > { %9473 = vmatprep.mubr.msk.bf16.mxu1 %vm145_vm1, %v12979_v5  ;;  %v5819_v14 = vld [vmem:[#allocation3 + $0x1ef] sm:$0xff]  ;;  %v6344_v46 = vpack.c.bf16 %v6313_v20, %v6312_v16 }
 0x463   : > { %v13071_v21 = vpack.c.bf16 %v5819_v14, %v5818_v49  ;;  %v6314_v12 = vld [vmem:[#allocation3 + $0x29] sm:$0xff]  ;;  %v6315_v2 = vld [vmem:[#allocation3 + $0x31] sm:$0xff] }
 0x464   : > { %v13076_v32 = vpack.c.bf16 %v6315_v2, %v6314_v12  ;;  %v6318_v61 = vld [vmem:[#allocation3 + $0x69] sm:$0xff]  ;;  %v6319_v55 = vld [vmem:[#allocation3 + $0x71] sm:$0xff] }
 0x465   : > { %v6320_v51 = vld [vmem:[#allocation3 + $0x89] sm:$0xff]  ;;  %v6321_v56 = vld [vmem:[#allocation3 + $0x91] sm:$0xff] }
 0x466   : > { %v13092_v40 = vpack.c.bf16 %v6321_v56, %v6320_v51  ;;  %v6322_v62 = vld [vmem:[#allocation3 + $0xa9] sm:$0xff]  ;;  %v6323_v57 = vld [vmem:[#allocation3 + $0xb1] sm:$0xff] }
 0x467   : > { %v6324_v27 = vld [vmem:[#allocation3 + $0xc9] sm:$0xff]  ;;  %v6325_v50 = vld [vmem:[#allocation3 + $0xd1] sm:$0xff]  ;;  %v13098_v30 = vpack.c.bf16 %v6323_v57, %v6322_v62  ;;  %v8767_v57 = vld [vmem:[%s13459_s1 + $0x1c] sm:$0x3] }
 0x468   : > { %v13100_v39 = vpack.c.bf16 %v6325_v50, %v6324_v27  ;;  %v6326_v1 = vld [vmem:[#allocation3 + $0xe9] sm:$0xff]  ;;  %v6327_v41 = vld [vmem:[#allocation3 + $0xf1] sm:$0xff] }
 0x469   : > { %9474 = vmatmul.mubr.msk.bf16.gmra.mrb[20].mxu1 %vm145_vm1, %v12985_v3  ;;  %v6328_v53 = vld [vmem:[#allocation3 + $0x109] sm:$0xff]  ;;  %v6329_v33 = vld [vmem:[#allocation3 + $0x111] sm:$0xff]  ;;  %v13106_v19 = vpack.c.bf16 %v6327_v41, %v6326_v1 }
 0x46a   : > { %9477 = vmatprep.mubr.msk.bf16.mxu1 %vm145_vm1, %v12987_v6  ;;  %v13108_v17 = vpack.c.bf16 %v6329_v33, %v6328_v53  ;;  %v6330_v13 = vld [vmem:[#allocation3 + $0x129] sm:$0xff]  ;;  %v6331_v23 = vld [vmem:[#allocation3 + $0x131] sm:$0xff] }
 0x46b   : > { %v6332_v11 = vld [vmem:[#allocation3 + $0x149] sm:$0xff]  ;;  %v6333_v58 = vld [vmem:[#allocation3 + $0x151] sm:$0xff]  ;;  %v13114_v22 = vpack.c.bf16 %v6331_v23, %v6330_v13 }
 0x46c   : > { %v13116_v48 = vpack.c.bf16 %v6333_v58, %v6332_v11  ;;  %v6334_v37 = vld [vmem:[#allocation3 + $0x169] sm:$0xff]  ;;  %v6335_v16 = vld [vmem:[#allocation3 + $0x171] sm:$0xff]  ;;  %v7293_v58 = vsel %vm1864_vm0, %v8767_v57, 0 }
 0x46d   : > { %v6336_v20 = vld [vmem:[#allocation3 + $0x189] sm:$0xff]  ;;  %v6337_v49 = vld [vmem:[#allocation3 + $0x191] sm:$0xff]  ;;  %v13122_v14 = vpack.c.bf16 %v6335_v16, %v6334_v37  ;;  %v8784_v16 = vld [vmem:[%s13459_s1 + $0x1e] sm:$0x3] }
 0x46e   : > { %v6338_v12 = vld [vmem:[#allocation3 + $0x1a9] sm:$0xff]  ;;  %v6339_v2 = vld [vmem:[#allocation3 + $0x1b1] sm:$0xff] }
 0x46f   : > { %v6343_v51 = vld [vmem:[#allocation3 + $0x1f1] sm:$0xff]  ;;  %v6900_v27 = vld [vmem:[#allocation3 + $0x28] sm:$0xff] }
 0x470   : > { %v6901_v50 = vld [vmem:[#allocation3 + $0x30] sm:$0xff]  ;;  %v6902_v53 = vld [vmem:[#allocation3 + $0x48] sm:$0xff] }
 0x471   : > { %9478 = vmatmul.mubr.msk.bf16.gmra.mrb[24].mxu1 %vm145_vm1, %v12993_v4  ;;  %v6932_v41 = vpack.c.bf16 %v6901_v50, %v6900_v27  ;;  %v6903_v33 = vld [vmem:[#allocation3 + $0x50] sm:$0xff]  ;;  %v6904_v13 = vld [vmem:[#allocation3 + $0x68] sm:$0xff] }
 0x472   : > { %9481 = vmatprep.mubr.msk.bf16.mxu1 %vm145_vm1, %v12995_v24  ;;  %v6905_v23 = vld [vmem:[#allocation3 + $0x70] sm:$0xff]  ;;  %v13182_v11 = vpack.c.bf16 %v6903_v33, %v6902_v53  ;;  %v8379_v33 = vld [vmem:[%s10794_s22 + $0x48] sm:$0xff] }
 0x473   : > { %v13185_v37 = vpack.c.bf16 %v6905_v23, %v6904_v13 }
 0x479   : > { %9482 = vmatmul.mubr.msk.bf16.gmra.mrb[28].mxu1 %vm145_vm1, %v13001_v8 }
 0x47a   : > { %9487 = vmatprep.mubr.msk.bf16.mxu1 %vm145_vm1, %v5820_v36  ;;  %v6316_v36 = vld [vmem:[#allocation3 + $0x49] sm:$0xff] }
 0x47b   : > { %v13080_v38 = vpack.c.bf16 %v6317_v25, %v6316_v36  ;;  %v6340_v36 = vld [vmem:[#allocation3 + $0x1c9] sm:$0xff]  ;;  %v6341_v25 = vld [vmem:[#allocation3 + $0x1d1] sm:$0xff] }
 0x481   : > { %9488 = vmatmul.mubr.msk.bf16.vlgmr.msra.gmra.mrb[0].mxu1 %vm145_vm1, %v13006_v44 }
 0x482   : > { %9520 = vmatpush3.bf16.msra.mxu1 %v6411_v15  ;;  %9491 = vmatprep.mubr.msk.bf16.mxu1 %vm145_vm1, %v13010_v60  ;;  %v8750_v15 = vld [vmem:[%s13459_s1 + $0x1a] sm:$0x3] }
 0x483   : > { %10281 = vmatprep.subr.msk.bf16.mxu1 %vm1864_vm0, %v13015_v31  ;;  %v13090_v31 = vpack.c.bf16 %v6319_v55, %v6318_v61  ;;  %v13132_v61 = vpack.c.bf16 %v6341_v25, %v6340_v36  ;;  %v6342_v55 = vld [vmem:[#allocation3 + $0x1e9] sm:$0xff]  ;;  %v6999_v62 = vsel %vm1864_vm0, %v8750_v15, 0 }
 0x484   : > { %v13138_v56 = vpack.c.bf16 %v6343_v51, %v6342_v55  ;;  %v6931_v36 = vld [vmem:[#allocation3 + $0x210] sm:$0xff]  ;;  %v7587_v55 = vsel %vm1864_vm0, %v8784_v16, 0  ;;  %v8801_v51 = vld [vmem:[%s13459_s1 + $0x20] sm:$0x3] }
 0x489   : > { %9492 = vmatmul.mubr.msk.bf16.gmra.mrb[4].mxu1 %vm145_vm1, %v13023_v7 }
 0x48a   : > { %9495 = vmatprep.mubr.msk.bf16.mxu1 %vm145_vm1, %v13025_v0 }
 0x491   : > { %9496 = vmatmul.mubr.msk.bf16.gmra.mrb[8].mxu1 %vm145_vm1, %v13031_v54 }
 0x492   : > { %9499 = vmatprep.mubr.msk.bf16.mxu1 %vm145_vm1, %v13033_v35 }
 0x499   : > { %9500 = vmatmul.mubr.msk.bf16.gmra.mrb[12].mxu1 %vm145_vm1, %v13039_v34 }
 0x49a   : > { %9503 = vmatprep.mubr.msk.bf16.mxu1 %vm145_vm1, %v13041_v52 }
 0x4a1   : > { %9504 = vmatmul.mubr.msk.bf16.gmra.mrb[16].mxu1 %vm145_vm1, %v13047_v9 }
 0x4a2   : > { %9507 = vmatprep.mubr.msk.bf16.mxu1 %vm145_vm1, %v13049_v29 }
 0x4a9   : > { %9508 = vmatmul.mubr.msk.bf16.gmra.mrb[20].mxu1 %vm145_vm1, %v13055_v18 }
 0x4aa   : > { %9511 = vmatprep.mubr.msk.bf16.mxu1 %vm145_vm1, %v13057_v10 }
 0x4b1   : > { %9512 = vmatmul.mubr.msk.bf16.gmra.mrb[24].mxu1 %vm145_vm1, %v13063_v63 }
 0x4b2   : > { %9515 = vmatprep.mubr.msk.bf16.mxu1 %vm145_vm1, %v13065_v43 }
 0x4b9   : > { %9516 = vmatmul.mubr.msk.bf16.gmra.mrb[28].mxu1 %vm145_vm1, %v13071_v21 }
 0x4ba   : > { %9521 = vmatprep.mubr.msk.bf16.mxu1 %vm145_vm1, %v6344_v46  ;;  %v13124_v46 = vpack.c.bf16 %v6337_v49, %v6336_v20  ;;  %v6906_v20 = vld [vmem:[#allocation3 + $0x88] sm:$0xff]  ;;  %v6907_v49 = vld [vmem:[#allocation3 + $0x90] sm:$0xff] }
 0x4c1   : > { %9522 = vmatmul.mubr.msk.bf16.vlgmr.msra.gmra.mrb[0].mxu1 %vm145_vm1, %v13076_v32 }
 0x4c2   : > { %9554 = vmatpush3.bf16.msra.mxu1 %v6705_v42  ;;  %9525 = vmatprep.mubr.msk.bf16.mxu1 %vm145_vm1, %v13080_v38  ;;  %v13130_v42 = vpack.c.bf16 %v6339_v2, %v6338_v12  ;;  %v13195_v12 = vpack.c.bf16 %v6907_v49, %v6906_v20  ;;  %v6930_v2 = vld [vmem:[#allocation3 + $0x208] sm:$0xff] }
 0x4c3   : > { %10282 = vmatprep.subr.msk.bf16.mxu1 %vm1864_vm0, %v8750_v15  ;;  %v6637_v15 = vld [vmem:[#allocation3 + $0x20f] sm:$0xff]  ;;  %v13221_v25 = vpack.c.bf16 %v6931_v36, %v6930_v2 }
 0x4c9   : > { %9526 = vmatmul.mubr.msk.bf16.gmra.mrb[4].mxu1 %vm145_vm1, %v13090_v31 }
 0x4ca   : > { %9529 = vmatprep.mubr.msk.bf16.mxu1 %vm145_vm1, %v13092_v40 }
 0x4d1   : > { %9530 = vmatmul.mubr.msk.bf16.gmra.mrb[8].mxu1 %vm145_vm1, %v13098_v30 }
 0x4d2   : > { %9533 = vmatprep.mubr.msk.bf16.mxu1 %vm145_vm1, %v13100_v39 }
 0x4d9   : > { %9534 = vmatmul.mubr.msk.bf16.gmra.mrb[12].mxu1 %vm145_vm1, %v13106_v19 }
 0x4da   : > { %9537 = vmatprep.mubr.msk.bf16.mxu1 %vm145_vm1, %v13108_v17 }
 0x4e1   : > { %9538 = vmatmul.mubr.msk.bf16.gmra.mrb[16].mxu1 %vm145_vm1, %v13114_v22 }
 0x4e2   : > { %9541 = vmatprep.mubr.msk.bf16.mxu1 %vm145_vm1, %v13116_v48 }
 0x4e9   : > { %9542 = vmatmul.mubr.msk.bf16.gmra.mrb[20].mxu1 %vm145_vm1, %v13122_v14 }
 0x4ea   : > { %9545 = vmatprep.mubr.msk.bf16.mxu1 %vm145_vm1, %v13124_v46 }
 0x4f1   : > { %9546 = vmatmul.mubr.msk.bf16.gmra.mrb[24].mxu1 %vm145_vm1, %v13130_v42 }
 0x4f2   : > { %9549 = vmatprep.mubr.msk.bf16.mxu1 %vm145_vm1, %v13132_v61 }
 0x4f9   : > { %9550 = vmatmul.mubr.msk.bf16.gmra.mrb[28].mxu1 %vm145_vm1, %v13138_v56 }
 0x4fa   : > { %9555 = vmatprep.mubr.msk.bf16.mxu1 %vm145_vm1, %v13006_v44  ;;  %v6636_v44 = vld [vmem:[#allocation3 + $0x207] sm:$0xff] }
 0x4fb   : > { %v13177_v1 = vpack.c.bf16 %v6637_v15, %v6636_v44  ;;  %v7881_v44 = vsel %vm1864_vm0, %v8801_v51, 0  ;;  %v8818_v15 = vld [vmem:[%s13459_s1 + $0x22] sm:$0x3] }
 0x501   : > { %9556 = vmatmul.mubr.msk.bf16.vlgmr.msra.gmra.mrb[0].mxu1 %vm145_vm1, %v13010_v60 }
 0x502   : > { %9588 = vmatpush3.bf16.msra.mxu1 %v6999_v62  ;;  %9559 = vmatprep.mubr.msk.bf16.mxu1 %vm145_vm1, %v13023_v7  ;;  %v7225_v62 = vld [vmem:[#allocation3 + $0x211] sm:$0xff] }
 0x503   : > { %10283 = vmatprep.subr.msk.bf16.mxu1 %vm1864_vm0, %v8767_v57 }
 0x509   : > { %9560 = vmatmul.mubr.msk.bf16.gmra.mrb[4].mxu1 %vm145_vm1, %v13025_v0 }
 0x50a   : > { %9563 = vmatprep.mubr.msk.bf16.mxu1 %vm145_vm1, %v13031_v54 }
 0x511   : > { %9564 = vmatmul.mubr.msk.bf16.gmra.mrb[8].mxu1 %vm145_vm1, %v13033_v35 }
 0x512   : > { %9567 = vmatprep.mubr.msk.bf16.mxu1 %vm145_vm1, %v13039_v34 }
 0x519   : > { %9568 = vmatmul.mubr.msk.bf16.gmra.mrb[12].mxu1 %vm145_vm1, %v13041_v52 }
 0x51a   : > { %9571 = vmatprep.mubr.msk.bf16.mxu1 %vm145_vm1, %v13047_v9 }
 0x521   : > { %9572 = vmatmul.mubr.msk.bf16.gmra.mrb[16].mxu1 %vm145_vm1, %v13049_v29 }
 0x522   : > { %9575 = vmatprep.mubr.msk.bf16.mxu1 %vm145_vm1, %v13055_v18 }
 0x529   : > { %9576 = vmatmul.mubr.msk.bf16.gmra.mrb[20].mxu1 %vm145_vm1, %v13057_v10 }
 0x52a   : > { %9579 = vmatprep.mubr.msk.bf16.mxu1 %vm145_vm1, %v13063_v63 }
 0x531   : > { %9580 = vmatmul.mubr.msk.bf16.gmra.mrb[24].mxu1 %vm145_vm1, %v13065_v43 }
 0x532   : > { %9583 = vmatprep.mubr.msk.bf16.mxu1 %vm145_vm1, %v13071_v21 }
 0x539   : > { %9584 = vmatmul.mubr.msk.bf16.gmra.mrb[28].mxu1 %vm145_vm1, %v13177_v1 }
 0x53a   : > { %9589 = vmatprep.mubr.msk.bf16.mxu1 %vm145_vm1, %v6932_v41 }
 0x541   : > { %9590 = vmatmul.mubr.msk.bf16.vlgmr.msra.gmra.mrb[0].mxu1 %vm145_vm1, %v13182_v11 }
 0x542   : > { %9622 = vmatpush3.bf16.msra.mxu1 %v7293_v58  ;;  %9593 = vmatprep.mubr.msk.bf16.mxu1 %vm145_vm1, %v13185_v37 }
 0x543   : > { %10284 = vmatprep.subr.msk.bf16.mxu1 %vm1864_vm0, %v8784_v16  ;;  %v8382_v16 = vld [vmem:[%s10794_s22 + $0x60] sm:$0xff] }
 0x549   : > { %9594 = vmatmul.mubr.msk.bf16.gmra.mrb[4].mxu1 %vm145_vm1, %v13195_v12 }
 0x54a   : > { %9597 = vmatprep.mubr.msk.bf16.mxu1 %vm145_vm1, %v12956_v45 }
 0x551   : > { %9598 = vmatmul.mubr.msk.bf16.gmra.mrb[8].mxu1 %vm145_vm1, %v12958_v26 }
 0x552   : > { %9601 = vmatprep.mubr.msk.bf16.mxu1 %vm145_vm1, %v12969_v47 }
 0x559   : > { %9602 = vmatmul.mubr.msk.bf16.gmra.mrb[12].mxu1 %vm145_vm1, %v12971_v28 }
 0x55a   : > { %9605 = vmatprep.mubr.msk.bf16.mxu1 %vm145_vm1, %v12977_v59 }
 0x561   : > { %9606 = vmatmul.mubr.msk.bf16.gmra.mrb[16].mxu1 %vm145_vm1, %v12979_v5 }
 0x562   : > { %9609 = vmatprep.mubr.msk.bf16.mxu1 %vm145_vm1, %v12985_v3 }
 0x569   : > { %9610 = vmatmul.mubr.msk.bf16.gmra.mrb[20].mxu1 %vm145_vm1, %v12987_v6 }
 0x56a   : > { %9613 = vmatprep.mubr.msk.bf16.mxu1 %vm145_vm1, %v12993_v4 }
 0x571   : > { %9614 = vmatmul.mubr.msk.bf16.gmra.mrb[24].mxu1 %vm145_vm1, %v12995_v24 }
 0x572   : > { %9617 = vmatprep.mubr.msk.bf16.mxu1 %vm145_vm1, %v13001_v8 }
 0x579   : > { %9618 = vmatmul.mubr.msk.bf16.gmra.mrb[28].mxu1 %vm145_vm1, %v13221_v25 }
 0x57a   : > { %9623 = vmatprep.mubr.msk.bf16.mxu1 %vm145_vm1, %v13076_v32  ;;  %v7224_v32 = vld [vmem:[#allocation3 + $0x209] sm:$0xff] }
 0x57b   : > { %v7241_v57 = vpack.c.bf16 %v7225_v62, %v7224_v32  ;;  %v8388_v32 = vld [vmem:[%s10794_s22 + $0x90] sm:$0xff] }
 0x581   : > { %9624 = vmatmul.mubr.msk.bf16.vlgmr.msra.gmra.mrb[0].mxu1 %vm145_vm1, %v13080_v38 }
 0x582   : > { %9656 = vmatpush3.bf16.msra.mxu1 %v7587_v55  ;;  %9627 = vmatprep.mubr.msk.bf16.mxu1 %vm145_vm1, %v13090_v31 }
 0x583   : > { %10285 = vmatprep.subr.msk.bf16.mxu1 %vm1864_vm0, %v8801_v51 }
 0x589   : > { %9628 = vmatmul.mubr.msk.bf16.gmra.mrb[4].mxu1 %vm145_vm1, %v13092_v40 }
 0x58a   : > { %9631 = vmatprep.mubr.msk.bf16.mxu1 %vm145_vm1, %v13098_v30 }
 0x591   : > { %9632 = vmatmul.mubr.msk.bf16.gmra.mrb[8].mxu1 %vm145_vm1, %v13100_v39 }
 0x592   : > { %9635 = vmatprep.mubr.msk.bf16.mxu1 %vm145_vm1, %v13106_v19 }
 0x599   : > { %9636 = vmatmul.mubr.msk.bf16.gmra.mrb[12].mxu1 %vm145_vm1, %v13108_v17 }
 0x59a   : > { %9639 = vmatprep.mubr.msk.bf16.mxu1 %vm145_vm1, %v13114_v22 }
 0x5a1   : > { %9640 = vmatmul.mubr.msk.bf16.gmra.mrb[16].mxu1 %vm145_vm1, %v13116_v48 }
 0x5a2   : > { %9643 = vmatprep.mubr.msk.bf16.mxu1 %vm145_vm1, %v13122_v14 }
 0x5a9   : > { %9644 = vmatmul.mubr.msk.bf16.gmra.mrb[20].mxu1 %vm145_vm1, %v13124_v46 }
 0x5aa   : > { %9647 = vmatprep.mubr.msk.bf16.mxu1 %vm145_vm1, %v13130_v42 }
 0x5b1   : > { %9648 = vmatmul.mubr.msk.bf16.gmra.mrb[24].mxu1 %vm145_vm1, %v13132_v61 }
 0x5b2   : > { %9651 = vmatprep.mubr.msk.bf16.mxu1 %vm145_vm1, %v13138_v56 }
 0x5b9   : > { %9652 = vmatmul.mubr.msk.bf16.gmra.mrb[28].mxu1 %vm145_vm1, %v7241_v57 }
 0x5ba   : > { %9657 = vmatprep.mubr.msk.bf16.mxu1 %vm145_vm1, %v13010_v60  ;;  %v7518_v60 = vld [vmem:[#allocation3 + $0x227] sm:$0xff] }
 0x5c1   : > { %9658 = vmatmul.mubr.msk.bf16.vlgmr.msra.gmra.mrb[0].mxu1 %vm145_vm1, %v13023_v7  ;;  %v7519_v7 = vld [vmem:[#allocation3 + $0x22f] sm:$0xff] }
 0x5c2   : > { %9690 = vmatpush3.bf16.msra.mxu1 %v7881_v44  ;;  %9661 = vmatprep.mubr.msk.bf16.mxu1 %vm145_vm1, %v13025_v0  ;;  %v7535_v0 = vpack.c.bf16 %v7519_v7, %v7518_v60  ;;  %v8386_v44 = vld [vmem:[%s10794_s22 + $0x80] sm:$0xff]  ;;  %v8389_v7 = vld [vmem:[%s10794_s22 + $0x98] sm:$0xff] }
 0x5c3   : > { %10286 = vmatprep.subr.msk.bf16.mxu1 %vm1864_vm0, %v8818_v15 }
 0x5c9   : > { %9662 = vmatmul.mubr.msk.bf16.gmra.mrb[4].mxu1 %vm145_vm1, %v13031_v54  ;;  %v8175_v54 = vsel %vm1864_vm0, %v8818_v15, 0 }
 0x5ca   : > { %9665 = vmatprep.mubr.msk.bf16.mxu1 %vm145_vm1, %v13033_v35 }
 0x5d1   : > { %9666 = vmatmul.mubr.msk.bf16.gmra.mrb[8].mxu1 %vm145_vm1, %v13039_v34 }
 0x5d2   : > { %9669 = vmatprep.mubr.msk.bf16.mxu1 %vm145_vm1, %v13041_v52  ;;  %v8373_v52 = vld [vmem:[%s10794_s22 + $0x18] sm:$0xff] }
 0x5d9   : > { %9670 = vmatmul.mubr.msk.bf16.gmra.mrb[12].mxu1 %vm145_vm1, %v13047_v9 }
 0x5da   : > { %9673 = vmatprep.mubr.msk.bf16.mxu1 %vm145_vm1, %v13049_v29 }
 0x5e1   : > { %9674 = vmatmul.mubr.msk.bf16.gmra.mrb[16].mxu1 %vm145_vm1, %v13055_v18  ;;  %v8371_v18 = vld [vmem:[%s10794_s22 + $0x8] sm:$0xff] }
 0x5e2   : > { %9677 = vmatprep.mubr.msk.bf16.mxu1 %vm145_vm1, %v13057_v10 }
 0x5e9   : > { %9678 = vmatmul.mubr.msk.bf16.gmra.mrb[20].mxu1 %vm145_vm1, %v13063_v63 }
 0x5ea   : > { %9681 = vmatprep.mubr.msk.bf16.mxu1 %vm145_vm1, %v13065_v43  ;;  %v8376_v43 = vld [vmem:[%s10794_s22 + $0x30] sm:$0xff] }
 0x5f1   : > { %9682 = vmatmul.mubr.msk.bf16.gmra.mrb[24].mxu1 %vm145_vm1, %v13071_v21 }
 0x5f2   : > { %9685 = vmatprep.mubr.msk.bf16.mxu1 %vm145_vm1, %v13177_v1  ;;  %v8381_v1 = vld [vmem:[%s10794_s22 + $0x58] sm:$0xff] }
 0x5f9   : > { %9686 = vmatmul.mubr.msk.bf16.gmra.mrb[28].mxu1 %vm145_vm1, %v7535_v0 }
 0x5fa   : > { %9691 = vmatprep.mubr.msk.bf16.mxu1 %vm145_vm1, %v13182_v11  ;;  %v8384_v11 = vld [vmem:[%s10794_s22 + $0x70] sm:$0xff] }
 0x601   : > { %9692 = vmatmul.mubr.msk.bf16.vlgmr.msra.gmra.mrb[0].mxu1 %vm145_vm1, %v13185_v37 }
 0x602   : > { %9724 = vmatpush3.bf16.msra.mxu1 %v8175_v54  ;;  %9695 = vmatprep.mubr.msk.bf16.mxu1 %vm145_vm1, %v13195_v12  ;;  %v8385_v12 = vld [vmem:[%s10794_s22 + $0x78] sm:$0xff] }
 0x609   : > { %9696 = vmatmul.mubr.msk.bf16.gmra.mrb[4].mxu1 %vm145_vm1, %v12956_v45  ;;  %v7812_v45 = vld [vmem:[#allocation3 + $0x228] sm:$0xff] }
 0x60a   : > { %9699 = vmatprep.mubr.msk.bf16.mxu1 %vm145_vm1, %v12958_v26  ;;  %v7813_v26 = vld [vmem:[#allocation3 + $0x230] sm:$0xff] }
 0x611   : > { %9700 = vmatmul.mubr.msk.bf16.gmra.mrb[8].mxu1 %vm145_vm1, %v12969_v47  ;;  %v7829_v47 = vpack.c.bf16 %v7813_v26, %v7812_v45  ;;  %v8387_v45 = vld [vmem:[%s10794_s22 + $0x88] sm:$0xff] }
 0x612   : > { %9703 = vmatprep.mubr.msk.bf16.mxu1 %vm145_vm1, %v12971_v28  ;;  %v8106_v28 = vld [vmem:[#allocation3 + $0x229] sm:$0xff] }
 0x619   : > { %9704 = vmatmul.mubr.msk.bf16.gmra.mrb[12].mxu1 %vm145_vm1, %v12977_v59  ;;  %v8107_v59 = vld [vmem:[#allocation3 + $0x231] sm:$0xff] }
 0x61a   : > { %9707 = vmatprep.mubr.msk.bf16.mxu1 %vm145_vm1, %v12979_v5  ;;  %v8123_v5 = vpack.c.bf16 %v8107_v59, %v8106_v28  ;;  %v8392_v28 = vld [vmem:[%s10794_s22 + $0xb0] sm:$0xff] }
 0x621   : > { %9708 = vmatmul.mubr.msk.bf16.gmra.mrb[16].mxu1 %vm145_vm1, %v12985_v3 }
 0x622   : > { %9711 = vmatprep.mubr.msk.bf16.mxu1 %vm145_vm1, %v12987_v6  ;;  %v8372_v6 = vld [vmem:[%s10794_s22 + $0x10] sm:$0xff] }
 0x629   : > { %9712 = vmatmul.mubr.msk.bf16.gmra.mrb[20].mxu1 %vm145_vm1, %v12993_v4 }
 0x62a   : > { %9715 = vmatprep.mubr.msk.bf16.mxu1 %vm145_vm1, %v12995_v24 }
 0x631   : > { %9716 = vmatmul.mubr.msk.bf16.gmra.mrb[24].mxu1 %vm145_vm1, %v13001_v8  ;;  %v8370_v8 = vld [vmem:[%s10794_s22] sm:$0xff] }
 0x632   : > { %9719 = vmatprep.mubr.msk.bf16.mxu1 %vm145_vm1, %v13221_v25  ;;  %v8383_v25 = vld [vmem:[%s10794_s22 + $0x68] sm:$0xff] }
 0x639   : > { %9720 = vmatmul.mubr.msk.bf16.gmra.mrb[28].mxu1 %vm145_vm1, %v7829_v47 }
 0x63a   : > { %9725 = vmatprep.mubr.msk.bf16.mxu1 %vm145_vm1, %v13080_v38 }
 0x641   : > { %9726 = vmatmul.mubr.msk.bf16.vlgmr.msra.gmra.mrb[0].mxu1 %vm145_vm1, %v13090_v31  ;;  %v8374_v31 = vld [vmem:[%s10794_s22 + $0x20] sm:$0xff] }
 0x642   : > { %9729 = vmatprep.mubr.msk.bf16.mxu1 %vm145_vm1, %v13092_v40 }
 0x649   : > { %9730 = vmatmul.mubr.msk.bf16.gmra.mrb[4].mxu1 %vm145_vm1, %v13098_v30 }
 0x64a   : > { %9733 = vmatprep.mubr.msk.bf16.mxu1 %vm145_vm1, %v13100_v39  ;;  %v8377_v39 = vld [vmem:[%s10794_s22 + $0x38] sm:$0xff] }
 0x651   : > { %9734 = vmatmul.mubr.msk.bf16.gmra.mrb[8].mxu1 %vm145_vm1, %v13106_v19 }
 0x652   : > { %9737 = vmatprep.mubr.msk.bf16.mxu1 %vm145_vm1, %v13108_v17 }
 0x659   : > { %9738 = vmatmul.mubr.msk.bf16.gmra.mrb[12].mxu1 %vm145_vm1, %v13114_v22  ;;  %v8375_v22 = vld [vmem:[%s10794_s22 + $0x28] sm:$0xff] }
 0x65a   : > { %9741 = vmatprep.mubr.msk.bf16.mxu1 %vm145_vm1, %v13116_v48 }
 0x661   : > { %9742 = vmatmul.mubr.msk.bf16.gmra.mrb[16].mxu1 %vm145_vm1, %v13122_v14 }
 0x662   : > { %9745 = vmatprep.mubr.msk.bf16.mxu1 %vm145_vm1, %v13124_v46  ;;  %v8380_v46 = vld [vmem:[%s10794_s22 + $0x50] sm:$0xff] }
 0x669   : > { %9746 = vmatmul.mubr.msk.bf16.gmra.mrb[20].mxu1 %vm145_vm1, %v13130_v42 }
 0x66a   : > { %9749 = vmatprep.mubr.msk.bf16.mxu1 %vm145_vm1, %v13132_v61 }
 0x671   : > { %9750 = vmatmul.mubr.msk.bf16.gmra.mrb[24].mxu1 %vm145_vm1, %v13138_v56  ;;  %v8378_v56 = vld [vmem:[%s10794_s22 + $0x40] sm:$0xff] }
 0x672   : > { %9753 = vmatprep.mubr.msk.bf16.mxu1 %vm145_vm1, %v7241_v57 }
 0x679   : > { %9754 = vmatmul.mubr.msk.bf16.gmra.mrb[28].mxu1 %vm145_vm1, %v8123_v5 }
 0x714   : > { %v9727_v3 = vpop.f32.mrb[0].mxu1 }
 0x715   : > { %v8404_v4 = vadd.f32 %v9727_v3, %v8372_v6  ;;  %v8211_v24 = vpop.f32.mrb[1].mxu1  ;;  %v8390_v3 = vld [vmem:[%s10794_s22 + $0xa0] sm:$0xff] }
 0x716   : > { %v8402_v35 = vadd.f32 %v8370_v8, %v8211_v24  ;;  %v9728_v34 = vpop.f32.mrb[2].mxu1  ;;  %v8393_v24 = vld [vmem:[%s10794_s22 + $0xb8] sm:$0xff] }
 0x717   : > { %8436 = vst.msk [vmem:[%s10794_s22 + $0x10] sm:$0xff] %vm145_vm1, %v8404_v4  ;;  %v8405_v9 = vadd.f32 %v9728_v34, %v8373_v52  ;;  %v8214_v29 = vpop.f32.mrb[3].mxu1  ;;  %v8391_v34 = vld [vmem:[%s10794_s22 + $0xa8] sm:$0xff] }
 0x718   : > { %8434 = vst.msk [vmem:[%s10794_s22] sm:$0xff] %vm145_vm1, %v8402_v35  ;;  %v8403_v10 = vadd.f32 %v8371_v18, %v8214_v29  ;;  %v8396_v29 = vld [vmem:[%s10794_s22 + $0xd0] sm:$0xff] }
 0x719   : > { %8437 = vst.msk [vmem:[%s10794_s22 + $0x18] sm:$0xff] %vm145_vm1, %v8405_v9 }
 0x71a   : > { %8435 = vst.msk [vmem:[%s10794_s22 + $0x8] sm:$0xff] %vm145_vm1, %v8403_v10 }
 0x71c   : > { %v9731_v63 = vpop.f32.mrb[4].mxu1 }
 0x71d   : > { %v8408_v21 = vadd.f32 %v9731_v63, %v8376_v43  ;;  %v8227_v38 = vpop.f32.mrb[5].mxu1  ;;  %v8394_v63 = vld [vmem:[%s10794_s22 + $0xc0] sm:$0xff] }
 0x71e   : > { %v8406_v40 = vadd.f32 %v8374_v31, %v8227_v38  ;;  %v9732_v30 = vpop.f32.mrb[6].mxu1  ;;  %v8397_v38 = vld [vmem:[%s10794_s22 + $0xd8] sm:$0xff] }
 0x71f   : > { %8440 = vst.msk [vmem:[%s10794_s22 + $0x30] sm:$0xff] %vm145_vm1, %v8408_v21  ;;  %v8409_v19 = vadd.f32 %v9732_v30, %v8377_v39  ;;  %v8230_v17 = vpop.f32.mrb[7].mxu1  ;;  %v8395_v30 = vld [vmem:[%s10794_s22 + $0xc8] sm:$0xff] }
 0x720   : > { %8438 = vst.msk [vmem:[%s10794_s22 + $0x20] sm:$0xff] %vm145_vm1, %v8406_v40  ;;  %v8407_v48 = vadd.f32 %v8375_v22, %v8230_v17  ;;  %v8400_v17 = vld [vmem:[%s10794_s22 + $0xf0] sm:$0xff] }
 0x721   : > { %8441 = vst.msk [vmem:[%s10794_s22 + $0x38] sm:$0xff] %vm145_vm1, %v8409_v19 }
 0x722   : > { %8439 = vst.msk [vmem:[%s10794_s22 + $0x28] sm:$0xff] %vm145_vm1, %v8407_v48 }
 0x724   : > { %v9735_v14 = vpop.f32.mrb[8].mxu1 }
 0x725   : > { %v8412_v42 = vadd.f32 %v9735_v14, %v8380_v46  ;;  %v8243_v61 = vpop.f32.mrb[9].mxu1  ;;  %v8398_v14 = vld [vmem:[%s10794_s22 + $0xe0] sm:$0xff] }
 0x726   : > { %v8410_v27 = vadd.f32 %v8378_v56, %v8243_v61  ;;  %v9736_v50 = vpop.f32.mrb[10].mxu1  ;;  %v8401_v61 = vld [vmem:[%s10794_s22 + $0xf8] sm:$0xff] }
 0x727   : > { %8444 = vst.msk [vmem:[%s10794_s22 + $0x50] sm:$0xff] %vm145_vm1, %v8412_v42  ;;  %v8413_v41 = vadd.f32 %v9736_v50, %v8381_v1  ;;  %v8246_v53 = vpop.f32.mrb[11].mxu1  ;;  %v8399_v50 = vld [vmem:[%s10794_s22 + $0xe8] sm:$0xff] }
 0x728   : > { %8442 = vst.msk [vmem:[%s10794_s22 + $0x40] sm:$0xff] %vm145_vm1, %v8410_v27  ;;  %v8411_v13 = vadd.f32 %v8379_v33, %v8246_v53 }
 0x729   : > { %8445 = vst.msk [vmem:[%s10794_s22 + $0x58] sm:$0xff] %vm145_vm1, %v8413_v41 }
 0x72a   : > { %8443 = vst.msk [vmem:[%s10794_s22 + $0x48] sm:$0xff] %vm145_vm1, %v8411_v13 }
 0x72c   : > { %v9739_v23 = vpop.f32.mrb[12].mxu1 }
 0x72d   : > { %v8416_v58 = vadd.f32 %v9739_v23, %v8384_v11  ;;  %v8259_v37 = vpop.f32.mrb[13].mxu1 }
 0x72e   : > { %v8414_v20 = vadd.f32 %v8382_v16, %v8259_v37  ;;  %v9740_v49 = vpop.f32.mrb[14].mxu1 }
 0x72f   : > { %8448 = vst.msk [vmem:[%s10794_s22 + $0x70] sm:$0xff] %vm145_vm1, %v8416_v58  ;;  %v8417_v2 = vadd.f32 %v9740_v49, %v8385_v12  ;;  %v8262_v36 = vpop.f32.mrb[15].mxu1 }
 0x730   : > { %8446 = vst.msk [vmem:[%s10794_s22 + $0x60] sm:$0xff] %vm145_vm1, %v8414_v20  ;;  %v8415_v55 = vadd.f32 %v8383_v25, %v8262_v36 }
 0x731   : > { %8449 = vst.msk [vmem:[%s10794_s22 + $0x78] sm:$0xff] %vm145_vm1, %v8417_v2 }
 0x732   : > { %8447 = vst.msk [vmem:[%s10794_s22 + $0x68] sm:$0xff] %vm145_vm1, %v8415_v55 }
 0x734   : > { %v9743_v51 = vpop.f32.mrb[16].mxu1 }
 0x735   : > { %v8420_v62 = vadd.f32 %v9743_v51, %v8388_v32  ;;  %v8275_v57 = vpop.f32.mrb[17].mxu1 }
 0x736   : > { %v8418_v15 = vadd.f32 %v8386_v44, %v8275_v57  ;;  %v9744_v60 = vpop.f32.mrb[18].mxu1 }
 0x737   : > { %8452 = vst.msk [vmem:[%s10794_s22 + $0x90] sm:$0xff] %vm145_vm1, %v8420_v62  ;;  %v8421_v0 = vadd.f32 %v9744_v60, %v8389_v7  ;;  %v8278_v54 = vpop.f32.mrb[19].mxu1 }
 0x738   : > { %8450 = vst.msk [vmem:[%s10794_s22 + $0x80] sm:$0xff] %vm145_vm1, %v8418_v15  ;;  %v8419_v26 = vadd.f32 %v8387_v45, %v8278_v54 }
 0x739   : > { %8453 = vst.msk [vmem:[%s10794_s22 + $0x98] sm:$0xff] %vm145_vm1, %v8421_v0 }
 0x73a   : > { %8451 = vst.msk [vmem:[%s10794_s22 + $0x88] sm:$0xff] %vm145_vm1, %v8419_v26 }
 0x73c   : > { %v9747_v47 = vpop.f32.mrb[20].mxu1 }
 0x73d   : > { %v8424_v59 = vadd.f32 %v9747_v47, %v8392_v28  ;;  %v8291_v5 = vpop.f32.mrb[21].mxu1 }
 0x73e   : > { %v8422_v6 = vadd.f32 %v8390_v3, %v8291_v5  ;;  %v9748_v4 = vpop.f32.mrb[22].mxu1 }
 0x73f   : > { %8456 = vst.msk [vmem:[%s10794_s22 + $0xb0] sm:$0xff] %vm145_vm1, %v8424_v59  ;;  %v8425_v8 = vadd.f32 %v9748_v4, %v8393_v24  ;;  %v8294_v35 = vpop.f32.mrb[23].mxu1 }
 0x740   : > { %8454 = vst.msk [vmem:[%s10794_s22 + $0xa0] sm:$0xff] %vm145_vm1, %v8422_v6  ;;  %v8423_v52 = vadd.f32 %v8391_v34, %v8294_v35 }
 0x741   : > { %8457 = vst.msk [vmem:[%s10794_s22 + $0xb8] sm:$0xff] %vm145_vm1, %v8425_v8 }
 0x742   : > { %8455 = vst.msk [vmem:[%s10794_s22 + $0xa8] sm:$0xff] %vm145_vm1, %v8423_v52 }
 0x744   : > { %v9751_v9 = vpop.f32.mrb[24].mxu1 }
 0x745   : > { %v8428_v18 = vadd.f32 %v9751_v9, %v8396_v29  ;;  %v8307_v10 = vpop.f32.mrb[25].mxu1 }
 0x746   : > { %v8426_v43 = vadd.f32 %v8394_v63, %v8307_v10  ;;  %v9752_v21 = vpop.f32.mrb[26].mxu1 }
 0x747   : > { %8460 = vst.msk [vmem:[%s10794_s22 + $0xd0] sm:$0xff] %vm145_vm1, %v8428_v18  ;;  %v8429_v31 = vadd.f32 %v9752_v21, %v8397_v38  ;;  %v8310_v40 = vpop.f32.mrb[27].mxu1 }
 0x748   : > { %8458 = vst.msk [vmem:[%s10794_s22 + $0xc0] sm:$0xff] %vm145_vm1, %v8426_v43  ;;  %v8427_v39 = vadd.f32 %v8395_v30, %v8310_v40 }
 0x749   : > { %8461 = vst.msk [vmem:[%s10794_s22 + $0xd8] sm:$0xff] %vm145_vm1, %v8429_v31 }
 0x74a   : > { %8459 = vst.msk [vmem:[%s10794_s22 + $0xc8] sm:$0xff] %vm145_vm1, %v8427_v39 }
 0x74c   : > { %v9755_v19 = vpop.f32.mrb[28].mxu1 }
 0x74d   : > { %v8432_v22 = vadd.f32 %v9755_v19, %v8400_v17  ;;  %v8323_v48 = vpop.f32.mrb[29].mxu1 }
 0x74e   : > { %v8430_v46 = vadd.f32 %v8398_v14, %v8323_v48  ;;  %v9756_v42 = vpop.f32.mrb[30].mxu1 }
 0x74f   : > { %8464 = vst.msk [vmem:[%s10794_s22 + $0xf0] sm:$0xff] %vm145_vm1, %v8432_v22  ;;  %v8433_v56 = vadd.f32 %v9756_v42, %v8401_v61  ;;  %v8326_v27 = vpop.f32.mrb[31].mxu1 }
 0x750   : > { %8462 = vst.msk [vmem:[%s10794_s22 + $0xe0] sm:$0xff] %vm145_vm1, %v8430_v46  ;;  %v8431_v1 = vadd.f32 %v8399_v50, %v8326_v27 }
 0x751   : > { %8465 = vst.msk [vmem:[%s10794_s22 + $0xf8] sm:$0xff] %vm145_vm1, %v8433_v56 }
 0x752   : > { %8463 = vst.msk [vmem:[%s10794_s22 + $0xe8] sm:$0xff] %vm145_vm1, %v8431_v1 }
 0x753 PF: > { %s12_s9 = sadd.s32 1, %s10304_s9  }
 0x754   : > { %p9_p4 = scmp.ge.s32.totalorder %s12_s9, 4  }
 0x756   :  { %11 = sbr.rel (!%p9_p4) target bundleno = 1 (0x1), region = 83 }

</bundles_post_ra>
